<compile_context>
chip_gen: v7x
topology: tpu7x:2x2x1
jax: 0.10.0
libtpu: 0.0.40
codegen_flags: <defaults>
</compile_context>

<pallas_src>
import numpy as np
import jax
import jax.numpy as jnp
from jax.experimental import pallas as pl
from jax.experimental.pallas import tpu as pltpu


def conv_transpose2d_sigmoid(x, weight, bias):
    """Depthwise ConvTranspose2d(stride=1, pad=0) + sigmoid.

    x:      (N, C, H, W) float32
    weight: (C, 1, K, K) float32  (PyTorch ConvTranspose2d layout, groups=C)
    bias:   (C,) float32
    returns (N, C, H+K-1, W+K-1) float32
    """
    N, C, H, W = x.shape
    K = weight.shape[-1]
    Ho, Wo = H + K - 1, W + K - 1
    Hp = H + 2 * (K - 1)            # padded rows covering all p taps
    LANES = 128                     # scratch lane width (one vreg of lanes)
    assert Wo + (K - 1) <= LANES

    # stride-1 / pad-0 transposed conv == correlation of the zero-padded input
    # with the spatially flipped per-channel kernel. Flatten weights for SMEM.
    w_flip = weight[:, 0, ::-1, ::-1].reshape(C * K * K).astype(jnp.float32)
    b_f32 = bias.astype(jnp.float32)

    def kernel(x_ref, w_ref, b_ref, o_ref, xp):
        # x_ref: (N, C, H, W) VMEM     w_ref: (C*K*K,) SMEM    b_ref: (C,) SMEM
        # o_ref: (N, C, Ho, Wo) VMEM   xp: (Hp, 128) f32 VMEM scratch
        #
        # Zero the scratch once; its interior [K-1:K-1+H, K-1:K-1+W] is fully
        # overwritten for every (n, c), so the zero borders persist.
        xp[...] = jnp.zeros(xp.shape, xp.dtype)

        for n in range(N):                       # N * C == 6, fully unrolled
            for c in range(C):
                xp[K - 1:K - 1 + H, K - 1:K - 1 + W] = (
                    x_ref[n, c].astype(jnp.float32))
                xc = xp[...]                     # (Hp, 128)

                # Hoisted lane shifts: xq[q][i, j] == xc[i, j + q] for the
                # lanes j < Wo that are ever read (wrap-around lanes land at
                # j >= 128 - q and are sliced away below).
                xq = [xc] + [pltpu.roll(xc, LANES - q, 1)
                             for q in range(1, K)]

                acc = jnp.zeros((Ho, LANES), jnp.float32)
                for p in range(K):               # 16 static taps
                    for q in range(K):
                        w_pq = w_ref[c * K * K + p * K + q]      # SMEM scalar
                        acc = acc + xq[q][p:p + Ho, :] * w_pq

                o_ref[n, c] = jax.nn.sigmoid(
                    acc[:, :Wo] + b_ref[c]).astype(o_ref.dtype)

    return pl.pallas_call(
        kernel,
        out_shape=jax.ShapeDtypeStruct((N, C, Ho, Wo), x.dtype),
        in_specs=[
            pl.BlockSpec(memory_space=pltpu.MemorySpace.VMEM),
            pl.BlockSpec(memory_space=pltpu.MemorySpace.SMEM),
            pl.BlockSpec(memory_space=pltpu.MemorySpace.SMEM),
        ],
        out_specs=pl.BlockSpec(memory_space=pltpu.MemorySpace.VMEM),
        scratch_shapes=[pltpu.VMEM((Hp, LANES), jnp.float32)],
        cost_estimate=pl.CostEstimate(
            flops=2 * N * C * Ho * Wo * K * K,
            transcendentals=N * C * Ho * Wo,
            bytes_accessed=4 * (N * C * H * W + C * K * K + C
                                + N * C * Ho * Wo)),
    )(x, w_flip, b_f32)


def _reference(x, weight, bias):
    """Independent XLA reference: depthwise transposed conv as a direct conv."""
    C = x.shape[1]
    K = weight.shape[-1]
    rhs = weight[:, :, ::-1, ::-1]                 # (C, 1, K, K) OIHW, flipped
    y = jax.lax.conv_general_dilated(
        x, rhs,
        window_strides=(1, 1),
        padding=[(K - 1, K - 1), (K - 1, K - 1)],
        dimension_numbers=("NCHW", "OIHW", "NCHW"),
        feature_group_count=C,
    )
    y = y + bias.reshape(1, C, 1, 1)
    return jax.nn.sigmoid(y)


if __name__ == "__main__":
    key = jax.random.PRNGKey(0)
    kx, kw, kb = jax.random.split(key, 3)

    # Module spec: ConvTranspose2d(3, 3, groups=3, kernel_size=4, stride=1) on
    # a (N, 3, 14, 7) input; N=2 exercises the batched (in-kernel) loop.
    N, C, H, W, K = 2, 3, 14, 7, 4
    x = jax.random.normal(kx, (N, C, H, W), dtype=jnp.float32)

    # Deterministic PyTorch-style init: uniform(-s, s), s = 1/sqrt(fan)
    fan = 1 * K * K
    s = 1.0 / np.sqrt(fan)
    weight = jax.random.uniform(kw, (C, 1, K, K), jnp.float32, -s, s)
    bias = jax.random.uniform(kb, (C,), jnp.float32, -s, s)

    out = jax.block_until_ready(conv_transpose2d_sigmoid(x, weight, bias))
    ref = jax.block_until_ready(_reference(x, weight, bias))

    assert out.shape == (N, C, H + K - 1, W + K - 1), out.shape
    np.testing.assert_allclose(np.asarray(out), np.asarray(ref),
                               rtol=1e-5, atol=1e-5)

    print("KERNEL_OK")
</pallas_src>

<mosaic_0001>
module attributes {stable_mosaic.version = 11 : i64} {
  func.func @kernel(%arg0: memref<2x3x14x7xf32, #tpu.memory_space<vmem>>, %arg1: memref<48xf32, #tpu.memory_space<smem>>, %arg2: memref<3xf32, #tpu.memory_space<smem>>, %arg3: memref<2x3x17x10xf32, #tpu.memory_space<vmem>>, %arg4: memref<20x128xf32, #tpu.memory_space<vmem>>) attributes {dimension_semantics = [], scalar_prefetch = 0 : i64, scratch_operands = 1 : i64, tpu.core_type = #tpu.core_type<tc>} {
    %cst = arith.constant 0.000000e+00 : f32
    %0 = vector.broadcast %cst : f32 to vector<20x128xf32>
    %c0 = arith.constant 0 : index
    %c0_0 = arith.constant 0 : index
    %1 = vector.load %arg4[%c0, %c0_0] : memref<20x128xf32, #tpu.memory_space<vmem>>, vector<20x128xf32>
    tpu.vector_store %arg4[%c0, %c0_0], %0 {strides = array<i32>} : memref<20x128xf32, #tpu.memory_space<vmem>>, vector<20x128xf32>,
    %c0_1 = arith.constant 0 : index
    %c0_2 = arith.constant 0 : index
    %c0_3 = arith.constant 0 : index
    %c0_4 = arith.constant 0 : index
    %2 = vector.load %arg0[%c0_1, %c0_2, %c0_3, %c0_4] : memref<2x3x14x7xf32, #tpu.memory_space<vmem>>, vector<1x1x14x7xf32>
    %3 = vector.shape_cast %2 : vector<1x1x14x7xf32> to vector<14x7xf32>
    %c3 = arith.constant 3 : index
    %c3_5 = arith.constant 3 : index
    %4 = vector.load %arg4[%c3, %c3_5] : memref<20x128xf32, #tpu.memory_space<vmem>>, vector<14x7xf32>
    tpu.vector_store %arg4[%c3, %c3_5], %3 {strides = array<i32>} : memref<20x128xf32, #tpu.memory_space<vmem>>, vector<14x7xf32>,
    %c0_6 = arith.constant 0 : index
    %c0_7 = arith.constant 0 : index
    %5 = vector.load %arg4[%c0_6, %c0_7] : memref<20x128xf32, #tpu.memory_space<vmem>>, vector<20x128xf32>
    %c127_i32 = arith.constant 127 : i32
    %6 = tpu.dynamic_rotate %5 by %c127_i32 dim 1 : vector<20x128xf32>, i32 -> vector<20x128xf32>
    %c126_i32 = arith.constant 126 : i32
    %7 = tpu.dynamic_rotate %5 by %c126_i32 dim 1 : vector<20x128xf32>, i32 -> vector<20x128xf32>
    %c125_i32 = arith.constant 125 : i32
    %8 = tpu.dynamic_rotate %5 by %c125_i32 dim 1 : vector<20x128xf32>, i32 -> vector<20x128xf32>
    %cst_8 = arith.constant 0.000000e+00 : f32
    %9 = vector.broadcast %cst_8 : f32 to vector<17x128xf32>
    %c0_9 = arith.constant 0 : index
    %10 = memref.load %arg1[%c0_9] : memref<48xf32, #tpu.memory_space<smem>>
    %11 = vector.extract_strided_slice %5 {offsets = [0, 0], sizes = [17, 128], strides = [1, 1]} : vector<20x128xf32> to vector<17x128xf32>
    %12 = vector.broadcast %10 : f32 to vector<17x128xf32>
    %13 = arith.mulf %11, %12 : vector<17x128xf32>
    %14 = arith.addf %9, %13 : vector<17x128xf32>
    %c1 = arith.constant 1 : index
    %15 = memref.load %arg1[%c1] : memref<48xf32, #tpu.memory_space<smem>>
    %16 = vector.extract_strided_slice %6 {offsets = [0, 0], sizes = [17, 128], strides = [1, 1]} : vector<20x128xf32> to vector<17x128xf32>
    %17 = vector.broadcast %15 : f32 to vector<17x128xf32>
    %18 = arith.mulf %16, %17 : vector<17x128xf32>
    %19 = arith.addf %14, %18 : vector<17x128xf32>
    %c2 = arith.constant 2 : index
    %20 = memref.load %arg1[%c2] : memref<48xf32, #tpu.memory_space<smem>>
    %21 = vector.extract_strided_slice %7 {offsets = [0, 0], sizes = [17, 128], strides = [1, 1]} : vector<20x128xf32> to vector<17x128xf32>
    %22 = vector.broadcast %20 : f32 to vector<17x128xf32>
    %23 = arith.mulf %21, %22 : vector<17x128xf32>
    %24 = arith.addf %19, %23 : vector<17x128xf32>
    %c3_10 = arith.constant 3 : index
    %25 = memref.load %arg1[%c3_10] : memref<48xf32, #tpu.memory_space<smem>>
    %26 = vector.extract_strided_slice %8 {offsets = [0, 0], sizes = [17, 128], strides = [1, 1]} : vector<20x128xf32> to vector<17x128xf32>
    %27 = vector.broadcast %25 : f32 to vector<17x128xf32>
    %28 = arith.mulf %26, %27 : vector<17x128xf32>
    %29 = arith.addf %24, %28 : vector<17x128xf32>
    %c4 = arith.constant 4 : index
    %30 = memref.load %arg1[%c4] : memref<48xf32, #tpu.memory_space<smem>>
    %31 = vector.extract_strided_slice %5 {offsets = [1, 0], sizes = [17, 128], strides = [1, 1]} : vector<20x128xf32> to vector<17x128xf32>
    %32 = vector.broadcast %30 : f32 to vector<17x128xf32>
    %33 = arith.mulf %31, %32 : vector<17x128xf32>
    %34 = arith.addf %29, %33 : vector<17x128xf32>
    %c5 = arith.constant 5 : index
    %35 = memref.load %arg1[%c5] : memref<48xf32, #tpu.memory_space<smem>>
    %36 = vector.extract_strided_slice %6 {offsets = [1, 0], sizes = [17, 128], strides = [1, 1]} : vector<20x128xf32> to vector<17x128xf32>
    %37 = vector.broadcast %35 : f32 to vector<17x128xf32>
    %38 = arith.mulf %36, %37 : vector<17x128xf32>
    %39 = arith.addf %34, %38 : vector<17x128xf32>
    %c6 = arith.constant 6 : index
    %40 = memref.load %arg1[%c6] : memref<48xf32, #tpu.memory_space<smem>>
    %41 = vector.extract_strided_slice %7 {offsets = [1, 0], sizes = [17, 128], strides = [1, 1]} : vector<20x128xf32> to vector<17x128xf32>
    %42 = vector.broadcast %40 : f32 to vector<17x128xf32>
    %43 = arith.mulf %41, %42 : vector<17x128xf32>
    %44 = arith.addf %39, %43 : vector<17x128xf32>
    %c7 = arith.constant 7 : index
    %45 = memref.load %arg1[%c7] : memref<48xf32, #tpu.memory_space<smem>>
    %46 = vector.extract_strided_slice %8 {offsets = [1, 0], sizes = [17, 128], strides = [1, 1]} : vector<20x128xf32> to vector<17x128xf32>
    %47 = vector.broadcast %45 : f32 to vector<17x128xf32>
    %48 = arith.mulf %46, %47 : vector<17x128xf32>
    %49 = arith.addf %44, %48 : vector<17x128xf32>
    %c8 = arith.constant 8 : index
    %50 = memref.load %arg1[%c8] : memref<48xf32, #tpu.memory_space<smem>>
    %51 = vector.extract_strided_slice %5 {offsets = [2, 0], sizes = [17, 128], strides = [1, 1]} : vector<20x128xf32> to vector<17x128xf32>
    %52 = vector.broadcast %50 : f32 to vector<17x128xf32>
    %53 = arith.mulf %51, %52 : vector<17x128xf32>
    %54 = arith.addf %49, %53 : vector<17x128xf32>
    %c9 = arith.constant 9 : index
    %55 = memref.load %arg1[%c9] : memref<48xf32, #tpu.memory_space<smem>>
    %56 = vector.extract_strided_slice %6 {offsets = [2, 0], sizes = [17, 128], strides = [1, 1]} : vector<20x128xf32> to vector<17x128xf32>
    %57 = vector.broadcast %55 : f32 to vector<17x128xf32>
    %58 = arith.mulf %56, %57 : vector<17x128xf32>
    %59 = arith.addf %54, %58 : vector<17x128xf32>
    %c10 = arith.constant 10 : index
    %60 = memref.load %arg1[%c10] : memref<48xf32, #tpu.memory_space<smem>>
    %61 = vector.extract_strided_slice %7 {offsets = [2, 0], sizes = [17, 128], strides = [1, 1]} : vector<20x128xf32> to vector<17x128xf32>
    %62 = vector.broadcast %60 : f32 to vector<17x128xf32>
    %63 = arith.mulf %61, %62 : vector<17x128xf32>
    %64 = arith.addf %59, %63 : vector<17x128xf32>
    %c11 = arith.constant 11 : index
    %65 = memref.load %arg1[%c11] : memref<48xf32, #tpu.memory_space<smem>>
    %66 = vector.extract_strided_slice %8 {offsets = [2, 0], sizes = [17, 128], strides = [1, 1]} : vector<20x128xf32> to vector<17x128xf32>
    %67 = vector.broadcast %65 : f32 to vector<17x128xf32>
    %68 = arith.mulf %66, %67 : vector<17x128xf32>
    %69 = arith.addf %64, %68 : vector<17x128xf32>
    %c12 = arith.constant 12 : index
    %70 = memref.load %arg1[%c12] : memref<48xf32, #tpu.memory_space<smem>>
    %71 = vector.extract_strided_slice %5 {offsets = [3, 0], sizes = [17, 128], strides = [1, 1]} : vector<20x128xf32> to vector<17x128xf32>
    %72 = vector.broadcast %70 : f32 to vector<17x128xf32>
    %73 = arith.mulf %71, %72 : vector<17x128xf32>
    %74 = arith.addf %69, %73 : vector<17x128xf32>
    %c13 = arith.constant 13 : index
    %75 = memref.load %arg1[%c13] : memref<48xf32, #tpu.memory_space<smem>>
    %76 = vector.extract_strided_slice %6 {offsets = [3, 0], sizes = [17, 128], strides = [1, 1]} : vector<20x128xf32> to vector<17x128xf32>
    %77 = vector.broadcast %75 : f32 to vector<17x128xf32>
    %78 = arith.mulf %76, %77 : vector<17x128xf32>
    %79 = arith.addf %74, %78 : vector<17x128xf32>
    %c14 = arith.constant 14 : index
    %80 = memref.load %arg1[%c14] : memref<48xf32, #tpu.memory_space<smem>>
    %81 = vector.extract_strided_slice %7 {offsets = [3, 0], sizes = [17, 128], strides = [1, 1]} : vector<20x128xf32> to vector<17x128xf32>
    %82 = vector.broadcast %80 : f32 to vector<17x128xf32>
    %83 = arith.mulf %81, %82 : vector<17x128xf32>
    %84 = arith.addf %79, %83 : vector<17x128xf32>
    %c15 = arith.constant 15 : index
    %85 = memref.load %arg1[%c15] : memref<48xf32, #tpu.memory_space<smem>>
    %86 = vector.extract_strided_slice %8 {offsets = [3, 0], sizes = [17, 128], strides = [1, 1]} : vector<20x128xf32> to vector<17x128xf32>
    %87 = vector.broadcast %85 : f32 to vector<17x128xf32>
    %88 = arith.mulf %86, %87 : vector<17x128xf32>
    %89 = arith.addf %84, %88 : vector<17x128xf32>
    %90 = vector.extract_strided_slice %89 {offsets = [0, 0], sizes = [17, 10], strides = [1, 1]} : vector<17x128xf32> to vector<17x10xf32>
    %c0_11 = arith.constant 0 : index
    %91 = memref.load %arg2[%c0_11] : memref<3xf32, #tpu.memory_space<smem>>
    %92 = vector.broadcast %91 : f32 to vector<17x10xf32>
    %93 = arith.addf %90, %92 : vector<17x10xf32>
    %94 = arith.negf %93 : vector<17x10xf32>
    %95 = math.exp %94 : vector<17x10xf32>
    %cst_12 = arith.constant 1.000000e+00 : f32
    %96 = vector.broadcast %cst_12 : f32 to vector<17x10xf32>
    %97 = arith.addf %96, %95 : vector<17x10xf32>
    %98 = arith.divf %96, %97 : vector<17x10xf32>
    %c0_13 = arith.constant 0 : index
    %c0_14 = arith.constant 0 : index
    %c0_15 = arith.constant 0 : index
    %c0_16 = arith.constant 0 : index
    %99 = vector.load %arg3[%c0_13, %c0_14, %c0_15, %c0_16] : memref<2x3x17x10xf32, #tpu.memory_space<vmem>>, vector<1x1x17x10xf32>
    %100 = vector.shape_cast %99 : vector<1x1x17x10xf32> to vector<17x10xf32>
    %101 = vector.shape_cast %98 : vector<17x10xf32> to vector<1x1x17x10xf32>
    tpu.vector_store %arg3[%c0_13, %c0_14, %c0_15, %c0_16], %101 {strides = array<i32>} : memref<2x3x17x10xf32, #tpu.memory_space<vmem>>, vector<1x1x17x10xf32>,
    %c0_17 = arith.constant 0 : index
    %c1_18 = arith.constant 1 : index
    %c0_19 = arith.constant 0 : index
    %c0_20 = arith.constant 0 : index
    %102 = vector.load %arg0[%c0_17, %c1_18, %c0_19, %c0_20] : memref<2x3x14x7xf32, #tpu.memory_space<vmem>>, vector<1x1x14x7xf32>
    %103 = vector.shape_cast %102 : vector<1x1x14x7xf32> to vector<14x7xf32>
    %c3_21 = arith.constant 3 : index
    %c3_22 = arith.constant 3 : index
    %104 = vector.load %arg4[%c3_21, %c3_22] : memref<20x128xf32, #tpu.memory_space<vmem>>, vector<14x7xf32>
    tpu.vector_store %arg4[%c3_21, %c3_22], %103 {strides = array<i32>} : memref<20x128xf32, #tpu.memory_space<vmem>>, vector<14x7xf32>,
    %c0_23 = arith.constant 0 : index
    %c0_24 = arith.constant 0 : index
    %105 = vector.load %arg4[%c0_23, %c0_24] : memref<20x128xf32, #tpu.memory_space<vmem>>, vector<20x128xf32>
    %c127_i32_25 = arith.constant 127 : i32
    %106 = tpu.dynamic_rotate %105 by %c127_i32_25 dim 1 : vector<20x128xf32>, i32 -> vector<20x128xf32>
    %c126_i32_26 = arith.constant 126 : i32
    %107 = tpu.dynamic_rotate %105 by %c126_i32_26 dim 1 : vector<20x128xf32>, i32 -> vector<20x128xf32>
    %c125_i32_27 = arith.constant 125 : i32
    %108 = tpu.dynamic_rotate %105 by %c125_i32_27 dim 1 : vector<20x128xf32>, i32 -> vector<20x128xf32>
    %cst_28 = arith.constant 0.000000e+00 : f32
    %109 = vector.broadcast %cst_28 : f32 to vector<17x128xf32>
    %c16 = arith.constant 16 : index
    %110 = memref.load %arg1[%c16] : memref<48xf32, #tpu.memory_space<smem>>
    %111 = vector.extract_strided_slice %105 {offsets = [0, 0], sizes = [17, 128], strides = [1, 1]} : vector<20x128xf32> to vector<17x128xf32>
    %112 = vector.broadcast %110 : f32 to vector<17x128xf32>
    %113 = arith.mulf %111, %112 : vector<17x128xf32>
    %114 = arith.addf %109, %113 : vector<17x128xf32>
    %c17 = arith.constant 17 : index
    %115 = memref.load %arg1[%c17] : memref<48xf32, #tpu.memory_space<smem>>
    %116 = vector.extract_strided_slice %106 {offsets = [0, 0], sizes = [17, 128], strides = [1, 1]} : vector<20x128xf32> to vector<17x128xf32>
    %117 = vector.broadcast %115 : f32 to vector<17x128xf32>
    %118 = arith.mulf %116, %117 : vector<17x128xf32>
    %119 = arith.addf %114, %118 : vector<17x128xf32>
    %c18 = arith.constant 18 : index
    %120 = memref.load %arg1[%c18] : memref<48xf32, #tpu.memory_space<smem>>
    %121 = vector.extract_strided_slice %107 {offsets = [0, 0], sizes = [17, 128], strides = [1, 1]} : vector<20x128xf32> to vector<17x128xf32>
    %122 = vector.broadcast %120 : f32 to vector<17x128xf32>
    %123 = arith.mulf %121, %122 : vector<17x128xf32>
    %124 = arith.addf %119, %123 : vector<17x128xf32>
    %c19 = arith.constant 19 : index
    %125 = memref.load %arg1[%c19] : memref<48xf32, #tpu.memory_space<smem>>
    %126 = vector.extract_strided_slice %108 {offsets = [0, 0], sizes = [17, 128], strides = [1, 1]} : vector<20x128xf32> to vector<17x128xf32>
    %127 = vector.broadcast %125 : f32 to vector<17x128xf32>
    %128 = arith.mulf %126, %127 : vector<17x128xf32>
    %129 = arith.addf %124, %128 : vector<17x128xf32>
    %c20 = arith.constant 20 : index
    %130 = memref.load %arg1[%c20] : memref<48xf32, #tpu.memory_space<smem>>
    %131 = vector.extract_strided_slice %105 {offsets = [1, 0], sizes = [17, 128], strides = [1, 1]} : vector<20x128xf32> to vector<17x128xf32>
    %132 = vector.broadcast %130 : f32 to vector<17x128xf32>
    %133 = arith.mulf %131, %132 : vector<17x128xf32>
    %134 = arith.addf %129, %133 : vector<17x128xf32>
    %c21 = arith.constant 21 : index
    %135 = memref.load %arg1[%c21] : memref<48xf32, #tpu.memory_space<smem>>
    %136 = vector.extract_strided_slice %106 {offsets = [1, 0], sizes = [17, 128], strides = [1, 1]} : vector<20x128xf32> to vector<17x128xf32>
    %137 = vector.broadcast %135 : f32 to vector<17x128xf32>
    %138 = arith.mulf %136, %137 : vector<17x128xf32>
    %139 = arith.addf %134, %138 : vector<17x128xf32>
    %c22 = arith.constant 22 : index
    %140 = memref.load %arg1[%c22] : memref<48xf32, #tpu.memory_space<smem>>
    %141 = vector.extract_strided_slice %107 {offsets = [1, 0], sizes = [17, 128], strides = [1, 1]} : vector<20x128xf32> to vector<17x128xf32>
    %142 = vector.broadcast %140 : f32 to vector<17x128xf32>
    %143 = arith.mulf %141, %142 : vector<17x128xf32>
    %144 = arith.addf %139, %143 : vector<17x128xf32>
    %c23 = arith.constant 23 : index
    %145 = memref.load %arg1[%c23] : memref<48xf32, #tpu.memory_space<smem>>
    %146 = vector.extract_strided_slice %108 {offsets = [1, 0], sizes = [17, 128], strides = [1, 1]} : vector<20x128xf32> to vector<17x128xf32>
    %147 = vector.broadcast %145 : f32 to vector<17x128xf32>
    %148 = arith.mulf %146, %147 : vector<17x128xf32>
    %149 = arith.addf %144, %148 : vector<17x128xf32>
    %c24 = arith.constant 24 : index
    %150 = memref.load %arg1[%c24] : memref<48xf32, #tpu.memory_space<smem>>
    %151 = vector.extract_strided_slice %105 {offsets = [2, 0], sizes = [17, 128], strides = [1, 1]} : vector<20x128xf32> to vector<17x128xf32>
    %152 = vector.broadcast %150 : f32 to vector<17x128xf32>
    %153 = arith.mulf %151, %152 : vector<17x128xf32>
    %154 = arith.addf %149, %153 : vector<17x128xf32>
    %c25 = arith.constant 25 : index
    %155 = memref.load %arg1[%c25] : memref<48xf32, #tpu.memory_space<smem>>
    %156 = vector.extract_strided_slice %106 {offsets = [2, 0], sizes = [17, 128], strides = [1, 1]} : vector<20x128xf32> to vector<17x128xf32>
    %157 = vector.broadcast %155 : f32 to vector<17x128xf32>
    %158 = arith.mulf %156, %157 : vector<17x128xf32>
    %159 = arith.addf %154, %158 : vector<17x128xf32>
    %c26 = arith.constant 26 : index
    %160 = memref.load %arg1[%c26] : memref<48xf32, #tpu.memory_space<smem>>
    %161 = vector.extract_strided_slice %107 {offsets = [2, 0], sizes = [17, 128], strides = [1, 1]} : vector<20x128xf32> to vector<17x128xf32>
    %162 = vector.broadcast %160 : f32 to vector<17x128xf32>
    %163 = arith.mulf %161, %162 : vector<17x128xf32>
    %164 = arith.addf %159, %163 : vector<17x128xf32>
    %c27 = arith.constant 27 : index
    %165 = memref.load %arg1[%c27] : memref<48xf32, #tpu.memory_space<smem>>
    %166 = vector.extract_strided_slice %108 {offsets = [2, 0], sizes = [17, 128], strides = [1, 1]} : vector<20x128xf32> to vector<17x128xf32>
    %167 = vector.broadcast %165 : f32 to vector<17x128xf32>
    %168 = arith.mulf %166, %167 : vector<17x128xf32>
    %169 = arith.addf %164, %168 : vector<17x128xf32>
    %c28 = arith.constant 28 : index
    %170 = memref.load %arg1[%c28] : memref<48xf32, #tpu.memory_space<smem>>
    %171 = vector.extract_strided_slice %105 {offsets = [3, 0], sizes = [17, 128], strides = [1, 1]} : vector<20x128xf32> to vector<17x128xf32>
    %172 = vector.broadcast %170 : f32 to vector<17x128xf32>
    %173 = arith.mulf %171, %172 : vector<17x128xf32>
    %174 = arith.addf %169, %173 : vector<17x128xf32>
    %c29 = arith.constant 29 : index
    %175 = memref.load %arg1[%c29] : memref<48xf32, #tpu.memory_space<smem>>
    %176 = vector.extract_strided_slice %106 {offsets = [3, 0], sizes = [17, 128], strides = [1, 1]} : vector<20x128xf32> to vector<17x128xf32>
    %177 = vector.broadcast %175 : f32 to vector<17x128xf32>
    %178 = arith.mulf %176, %177 : vector<17x128xf32>
    %179 = arith.addf %174, %178 : vector<17x128xf32>
    %c30 = arith.constant 30 : index
    %180 = memref.load %arg1[%c30] : memref<48xf32, #tpu.memory_space<smem>>
    %181 = vector.extract_strided_slice %107 {offsets = [3, 0], sizes = [17, 128], strides = [1, 1]} : vector<20x128xf32> to vector<17x128xf32>
    %182 = vector.broadcast %180 : f32 to vector<17x128xf32>
    %183 = arith.mulf %181, %182 : vector<17x128xf32>
    %184 = arith.addf %179, %183 : vector<17x128xf32>
    %c31 = arith.constant 31 : index
    %185 = memref.load %arg1[%c31] : memref<48xf32, #tpu.memory_space<smem>>
    %186 = vector.extract_strided_slice %108 {offsets = [3, 0], sizes = [17, 128], strides = [1, 1]} : vector<20x128xf32> to vector<17x128xf32>
    %187 = vector.broadcast %185 : f32 to vector<17x128xf32>
    %188 = arith.mulf %186, %187 : vector<17x128xf32>
    %189 = arith.addf %184, %188 : vector<17x128xf32>
    %190 = vector.extract_strided_slice %189 {offsets = [0, 0], sizes = [17, 10], strides = [1, 1]} : vector<17x128xf32> to vector<17x10xf32>
    %c1_29 = arith.constant 1 : index
    %191 = memref.load %arg2[%c1_29] : memref<3xf32, #tpu.memory_space<smem>>
    %192 = vector.broadcast %191 : f32 to vector<17x10xf32>
    %193 = arith.addf %190, %192 : vector<17x10xf32>
    %194 = arith.negf %193 : vector<17x10xf32>
    %195 = math.exp %194 : vector<17x10xf32>
    %cst_30 = arith.constant 1.000000e+00 : f32
    %196 = vector.broadcast %cst_30 : f32 to vector<17x10xf32>
    %197 = arith.addf %196, %195 : vector<17x10xf32>
    %198 = arith.divf %196, %197 : vector<17x10xf32>
    %c0_31 = arith.constant 0 : index
    %c1_32 = arith.constant 1 : index
    %c0_33 = arith.constant 0 : index
    %c0_34 = arith.constant 0 : index
    %199 = vector.load %arg3[%c0_31, %c1_32, %c0_33, %c0_34] : memref<2x3x17x10xf32, #tpu.memory_space<vmem>>, vector<1x1x17x10xf32>
    %200 = vector.shape_cast %199 : vector<1x1x17x10xf32> to vector<17x10xf32>
    %201 = vector.shape_cast %198 : vector<17x10xf32> to vector<1x1x17x10xf32>
    tpu.vector_store %arg3[%c0_31, %c1_32, %c0_33, %c0_34], %201 {strides = array<i32>} : memref<2x3x17x10xf32, #tpu.memory_space<vmem>>, vector<1x1x17x10xf32>,
    %c0_35 = arith.constant 0 : index
    %c2_36 = arith.constant 2 : index
    %c0_37 = arith.constant 0 : index
    %c0_38 = arith.constant 0 : index
    %202 = vector.load %arg0[%c0_35, %c2_36, %c0_37, %c0_38] : memref<2x3x14x7xf32, #tpu.memory_space<vmem>>, vector<1x1x14x7xf32>
    %203 = vector.shape_cast %202 : vector<1x1x14x7xf32> to vector<14x7xf32>
    %c3_39 = arith.constant 3 : index
    %c3_40 = arith.constant 3 : index
    %204 = vector.load %arg4[%c3_39, %c3_40] : memref<20x128xf32, #tpu.memory_space<vmem>>, vector<14x7xf32>
    tpu.vector_store %arg4[%c3_39, %c3_40], %203 {strides = array<i32>} : memref<20x128xf32, #tpu.memory_space<vmem>>, vector<14x7xf32>,
    %c0_41 = arith.constant 0 : index
    %c0_42 = arith.constant 0 : index
    %205 = vector.load %arg4[%c0_41, %c0_42] : memref<20x128xf32, #tpu.memory_space<vmem>>, vector<20x128xf32>
    %c127_i32_43 = arith.constant 127 : i32
    %206 = tpu.dynamic_rotate %205 by %c127_i32_43 dim 1 : vector<20x128xf32>, i32 -> vector<20x128xf32>
    %c126_i32_44 = arith.constant 126 : i32
    %207 = tpu.dynamic_rotate %205 by %c126_i32_44 dim 1 : vector<20x128xf32>, i32 -> vector<20x128xf32>
    %c125_i32_45 = arith.constant 125 : i32
    %208 = tpu.dynamic_rotate %205 by %c125_i32_45 dim 1 : vector<20x128xf32>, i32 -> vector<20x128xf32>
    %cst_46 = arith.constant 0.000000e+00 : f32
    %209 = vector.broadcast %cst_46 : f32 to vector<17x128xf32>
    %c32 = arith.constant 32 : index
    %210 = memref.load %arg1[%c32] : memref<48xf32, #tpu.memory_space<smem>>
    %211 = vector.extract_strided_slice %205 {offsets = [0, 0], sizes = [17, 128], strides = [1, 1]} : vector<20x128xf32> to vector<17x128xf32>
    %212 = vector.broadcast %210 : f32 to vector<17x128xf32>
    %213 = arith.mulf %211, %212 : vector<17x128xf32>
    %214 = arith.addf %209, %213 : vector<17x128xf32>
    %c33 = arith.constant 33 : index
    %215 = memref.load %arg1[%c33] : memref<48xf32, #tpu.memory_space<smem>>
    %216 = vector.extract_strided_slice %206 {offsets = [0, 0], sizes = [17, 128], strides = [1, 1]} : vector<20x128xf32> to vector<17x128xf32>
    %217 = vector.broadcast %215 : f32 to vector<17x128xf32>
    %218 = arith.mulf %216, %217 : vector<17x128xf32>
    %219 = arith.addf %214, %218 : vector<17x128xf32>
    %c34 = arith.constant 34 : index
    %220 = memref.load %arg1[%c34] : memref<48xf32, #tpu.memory_space<smem>>
    %221 = vector.extract_strided_slice %207 {offsets = [0, 0], sizes = [17, 128], strides = [1, 1]} : vector<20x128xf32> to vector<17x128xf32>
    %222 = vector.broadcast %220 : f32 to vector<17x128xf32>
    %223 = arith.mulf %221, %222 : vector<17x128xf32>
    %224 = arith.addf %219, %223 : vector<17x128xf32>
    %c35 = arith.constant 35 : index
    %225 = memref.load %arg1[%c35] : memref<48xf32, #tpu.memory_space<smem>>
    %226 = vector.extract_strided_slice %208 {offsets = [0, 0], sizes = [17, 128], strides = [1, 1]} : vector<20x128xf32> to vector<17x128xf32>
    %227 = vector.broadcast %225 : f32 to vector<17x128xf32>
    %228 = arith.mulf %226, %227 : vector<17x128xf32>
    %229 = arith.addf %224, %228 : vector<17x128xf32>
    %c36 = arith.constant 36 : index
    %230 = memref.load %arg1[%c36] : memref<48xf32, #tpu.memory_space<smem>>
    %231 = vector.extract_strided_slice %205 {offsets = [1, 0], sizes = [17, 128], strides = [1, 1]} : vector<20x128xf32> to vector<17x128xf32>
    %232 = vector.broadcast %230 : f32 to vector<17x128xf32>
    %233 = arith.mulf %231, %232 : vector<17x128xf32>
    %234 = arith.addf %229, %233 : vector<17x128xf32>
    %c37 = arith.constant 37 : index
    %235 = memref.load %arg1[%c37] : memref<48xf32, #tpu.memory_space<smem>>
    %236 = vector.extract_strided_slice %206 {offsets = [1, 0], sizes = [17, 128], strides = [1, 1]} : vector<20x128xf32> to vector<17x128xf32>
    %237 = vector.broadcast %235 : f32 to vector<17x128xf32>
    %238 = arith.mulf %236, %237 : vector<17x128xf32>
    %239 = arith.addf %234, %238 : vector<17x128xf32>
    %c38 = arith.constant 38 : index
    %240 = memref.load %arg1[%c38] : memref<48xf32, #tpu.memory_space<smem>>
    %241 = vector.extract_strided_slice %207 {offsets = [1, 0], sizes = [17, 128], strides = [1, 1]} : vector<20x128xf32> to vector<17x128xf32>
    %242 = vector.broadcast %240 : f32 to vector<17x128xf32>
    %243 = arith.mulf %241, %242 : vector<17x128xf32>
    %244 = arith.addf %239, %243 : vector<17x128xf32>
    %c39 = arith.constant 39 : index
    %245 = memref.load %arg1[%c39] : memref<48xf32, #tpu.memory_space<smem>>
    %246 = vector.extract_strided_slice %208 {offsets = [1, 0], sizes = [17, 128], strides = [1, 1]} : vector<20x128xf32> to vector<17x128xf32>
    %247 = vector.broadcast %245 : f32 to vector<17x128xf32>
    %248 = arith.mulf %246, %247 : vector<17x128xf32>
    %249 = arith.addf %244, %248 : vector<17x128xf32>
    %c40 = arith.constant 40 : index
    %250 = memref.load %arg1[%c40] : memref<48xf32, #tpu.memory_space<smem>>
    %251 = vector.extract_strided_slice %205 {offsets = [2, 0], sizes = [17, 128], strides = [1, 1]} : vector<20x128xf32> to vector<17x128xf32>
    %252 = vector.broadcast %250 : f32 to vector<17x128xf32>
    %253 = arith.mulf %251, %252 : vector<17x128xf32>
    %254 = arith.addf %249, %253 : vector<17x128xf32>
    %c41 = arith.constant 41 : index
    %255 = memref.load %arg1[%c41] : memref<48xf32, #tpu.memory_space<smem>>
    %256 = vector.extract_strided_slice %206 {offsets = [2, 0], sizes = [17, 128], strides = [1, 1]} : vector<20x128xf32> to vector<17x128xf32>
    %257 = vector.broadcast %255 : f32 to vector<17x128xf32>
    %258 = arith.mulf %256, %257 : vector<17x128xf32>
    %259 = arith.addf %254, %258 : vector<17x128xf32>
    %c42 = arith.constant 42 : index
    %260 = memref.load %arg1[%c42] : memref<48xf32, #tpu.memory_space<smem>>
    %261 = vector.extract_strided_slice %207 {offsets = [2, 0], sizes = [17, 128], strides = [1, 1]} : vector<20x128xf32> to vector<17x128xf32>
    %262 = vector.broadcast %260 : f32 to vector<17x128xf32>
    %263 = arith.mulf %261, %262 : vector<17x128xf32>
    %264 = arith.addf %259, %263 : vector<17x128xf32>
    %c43 = arith.constant 43 : index
    %265 = memref.load %arg1[%c43] : memref<48xf32, #tpu.memory_space<smem>>
    %266 = vector.extract_strided_slice %208 {offsets = [2, 0], sizes = [17, 128], strides = [1, 1]} : vector<20x128xf32> to vector<17x128xf32>
    %267 = vector.broadcast %265 : f32 to vector<17x128xf32>
    %268 = arith.mulf %266, %267 : vector<17x128xf32>
    %269 = arith.addf %264, %268 : vector<17x128xf32>
    %c44 = arith.constant 44 : index
    %270 = memref.load %arg1[%c44] : memref<48xf32, #tpu.memory_space<smem>>
    %271 = vector.extract_strided_slice %205 {offsets = [3, 0], sizes = [17, 128], strides = [1, 1]} : vector<20x128xf32> to vector<17x128xf32>
    %272 = vector.broadcast %270 : f32 to vector<17x128xf32>
    %273 = arith.mulf %271, %272 : vector<17x128xf32>
    %274 = arith.addf %269, %273 : vector<17x128xf32>
    %c45 = arith.constant 45 : index
    %275 = memref.load %arg1[%c45] : memref<48xf32, #tpu.memory_space<smem>>
    %276 = vector.extract_strided_slice %206 {offsets = [3, 0], sizes = [17, 128], strides = [1, 1]} : vector<20x128xf32> to vector<17x128xf32>
    %277 = vector.broadcast %275 : f32 to vector<17x128xf32>
    %278 = arith.mulf %276, %277 : vector<17x128xf32>
    %279 = arith.addf %274, %278 : vector<17x128xf32>
    %c46 = arith.constant 46 : index
    %280 = memref.load %arg1[%c46] : memref<48xf32, #tpu.memory_space<smem>>
    %281 = vector.extract_strided_slice %207 {offsets = [3, 0], sizes = [17, 128], strides = [1, 1]} : vector<20x128xf32> to vector<17x128xf32>
    %282 = vector.broadcast %280 : f32 to vector<17x128xf32>
    %283 = arith.mulf %281, %282 : vector<17x128xf32>
    %284 = arith.addf %279, %283 : vector<17x128xf32>
    %c47 = arith.constant 47 : index
    %285 = memref.load %arg1[%c47] : memref<48xf32, #tpu.memory_space<smem>>
    %286 = vector.extract_strided_slice %208 {offsets = [3, 0], sizes = [17, 128], strides = [1, 1]} : vector<20x128xf32> to vector<17x128xf32>
    %287 = vector.broadcast %285 : f32 to vector<17x128xf32>
    %288 = arith.mulf %286, %287 : vector<17x128xf32>
    %289 = arith.addf %284, %288 : vector<17x128xf32>
    %290 = vector.extract_strided_slice %289 {offsets = [0, 0], sizes = [17, 10], strides = [1, 1]} : vector<17x128xf32> to vector<17x10xf32>
    %c2_47 = arith.constant 2 : index
    %291 = memref.load %arg2[%c2_47] : memref<3xf32, #tpu.memory_space<smem>>
    %292 = vector.broadcast %291 : f32 to vector<17x10xf32>
    %293 = arith.addf %290, %292 : vector<17x10xf32>
    %294 = arith.negf %293 : vector<17x10xf32>
    %295 = math.exp %294 : vector<17x10xf32>
    %cst_48 = arith.constant 1.000000e+00 : f32
    %296 = vector.broadcast %cst_48 : f32 to vector<17x10xf32>
    %297 = arith.addf %296, %295 : vector<17x10xf32>
    %298 = arith.divf %296, %297 : vector<17x10xf32>
    %c0_49 = arith.constant 0 : index
    %c2_50 = arith.constant 2 : index
    %c0_51 = arith.constant 0 : index
    %c0_52 = arith.constant 0 : index
    %299 = vector.load %arg3[%c0_49, %c2_50, %c0_51, %c0_52] : memref<2x3x17x10xf32, #tpu.memory_space<vmem>>, vector<1x1x17x10xf32>
    %300 = vector.shape_cast %299 : vector<1x1x17x10xf32> to vector<17x10xf32>
    %301 = vector.shape_cast %298 : vector<17x10xf32> to vector<1x1x17x10xf32>
    tpu.vector_store %arg3[%c0_49, %c2_50, %c0_51, %c0_52], %301 {strides = array<i32>} : memref<2x3x17x10xf32, #tpu.memory_space<vmem>>, vector<1x1x17x10xf32>,
    %c1_53 = arith.constant 1 : index
    %c0_54 = arith.constant 0 : index
    %c0_55 = arith.constant 0 : index
    %c0_56 = arith.constant 0 : index
    %302 = vector.load %arg0[%c1_53, %c0_54, %c0_55, %c0_56] : memref<2x3x14x7xf32, #tpu.memory_space<vmem>>, vector<1x1x14x7xf32>
    %303 = vector.shape_cast %302 : vector<1x1x14x7xf32> to vector<14x7xf32>
    %c3_57 = arith.constant 3 : index
    %c3_58 = arith.constant 3 : index
    %304 = vector.load %arg4[%c3_57, %c3_58] : memref<20x128xf32, #tpu.memory_space<vmem>>, vector<14x7xf32>
    tpu.vector_store %arg4[%c3_57, %c3_58], %303 {strides = array<i32>} : memref<20x128xf32, #tpu.memory_space<vmem>>, vector<14x7xf32>,
    %c0_59 = arith.constant 0 : index
    %c0_60 = arith.constant 0 : index
    %305 = vector.load %arg4[%c0_59, %c0_60] : memref<20x128xf32, #tpu.memory_space<vmem>>, vector<20x128xf32>
    %c127_i32_61 = arith.constant 127 : i32
    %306 = tpu.dynamic_rotate %305 by %c127_i32_61 dim 1 : vector<20x128xf32>, i32 -> vector<20x128xf32>
    %c126_i32_62 = arith.constant 126 : i32
    %307 = tpu.dynamic_rotate %305 by %c126_i32_62 dim 1 : vector<20x128xf32>, i32 -> vector<20x128xf32>
    %c125_i32_63 = arith.constant 125 : i32
    %308 = tpu.dynamic_rotate %305 by %c125_i32_63 dim 1 : vector<20x128xf32>, i32 -> vector<20x128xf32>
    %cst_64 = arith.constant 0.000000e+00 : f32
    %309 = vector.broadcast %cst_64 : f32 to vector<17x128xf32>
    %c0_65 = arith.constant 0 : index
    %310 = memref.load %arg1[%c0_65] : memref<48xf32, #tpu.memory_space<smem>>
    %311 = vector.extract_strided_slice %305 {offsets = [0, 0], sizes = [17, 128], strides = [1, 1]} : vector<20x128xf32> to vector<17x128xf32>
    %312 = vector.broadcast %310 : f32 to vector<17x128xf32>
    %313 = arith.mulf %311, %312 : vector<17x128xf32>
    %314 = arith.addf %309, %313 : vector<17x128xf32>
    %c1_66 = arith.constant 1 : index
    %315 = memref.load %arg1[%c1_66] : memref<48xf32, #tpu.memory_space<smem>>
    %316 = vector.extract_strided_slice %306 {offsets = [0, 0], sizes = [17, 128], strides = [1, 1]} : vector<20x128xf32> to vector<17x128xf32>
    %317 = vector.broadcast %315 : f32 to vector<17x128xf32>
    %318 = arith.mulf %316, %317 : vector<17x128xf32>
    %319 = arith.addf %314, %318 : vector<17x128xf32>
    %c2_67 = arith.constant 2 : index
    %320 = memref.load %arg1[%c2_67] : memref<48xf32, #tpu.memory_space<smem>>
    %321 = vector.extract_strided_slice %307 {offsets = [0, 0], sizes = [17, 128], strides = [1, 1]} : vector<20x128xf32> to vector<17x128xf32>
    %322 = vector.broadcast %320 : f32 to vector<17x128xf32>
    %323 = arith.mulf %321, %322 : vector<17x128xf32>
    %324 = arith.addf %319, %323 : vector<17x128xf32>
    %c3_68 = arith.constant 3 : index
    %325 = memref.load %arg1[%c3_68] : memref<48xf32, #tpu.memory_space<smem>>
    %326 = vector.extract_strided_slice %308 {offsets = [0, 0], sizes = [17, 128], strides = [1, 1]} : vector<20x128xf32> to vector<17x128xf32>
    %327 = vector.broadcast %325 : f32 to vector<17x128xf32>
    %328 = arith.mulf %326, %327 : vector<17x128xf32>
    %329 = arith.addf %324, %328 : vector<17x128xf32>
    %c4_69 = arith.constant 4 : index
    %330 = memref.load %arg1[%c4_69] : memref<48xf32, #tpu.memory_space<smem>>
    %331 = vector.extract_strided_slice %305 {offsets = [1, 0], sizes = [17, 128], strides = [1, 1]} : vector<20x128xf32> to vector<17x128xf32>
    %332 = vector.broadcast %330 : f32 to vector<17x128xf32>
    %333 = arith.mulf %331, %332 : vector<17x128xf32>
    %334 = arith.addf %329, %333 : vector<17x128xf32>
    %c5_70 = arith.constant 5 : index
    %335 = memref.load %arg1[%c5_70] : memref<48xf32, #tpu.memory_space<smem>>
    %336 = vector.extract_strided_slice %306 {offsets = [1, 0], sizes = [17, 128], strides = [1, 1]} : vector<20x128xf32> to vector<17x128xf32>
    %337 = vector.broadcast %335 : f32 to vector<17x128xf32>
    %338 = arith.mulf %336, %337 : vector<17x128xf32>
    %339 = arith.addf %334, %338 : vector<17x128xf32>
    %c6_71 = arith.constant 6 : index
    %340 = memref.load %arg1[%c6_71] : memref<48xf32, #tpu.memory_space<smem>>
    %341 = vector.extract_strided_slice %307 {offsets = [1, 0], sizes = [17, 128], strides = [1, 1]} : vector<20x128xf32> to vector<17x128xf32>
    %342 = vector.broadcast %340 : f32 to vector<17x128xf32>
    %343 = arith.mulf %341, %342 : vector<17x128xf32>
    %344 = arith.addf %339, %343 : vector<17x128xf32>
    %c7_72 = arith.constant 7 : index
    %345 = memref.load %arg1[%c7_72] : memref<48xf32, #tpu.memory_space<smem>>
    %346 = vector.extract_strided_slice %308 {offsets = [1, 0], sizes = [17, 128], strides = [1, 1]} : vector<20x128xf32> to vector<17x128xf32>
    %347 = vector.broadcast %345 : f32 to vector<17x128xf32>
    %348 = arith.mulf %346, %347 : vector<17x128xf32>
    %349 = arith.addf %344, %348 : vector<17x128xf32>
    %c8_73 = arith.constant 8 : index
    %350 = memref.load %arg1[%c8_73] : memref<48xf32, #tpu.memory_space<smem>>
    %351 = vector.extract_strided_slice %305 {offsets = [2, 0], sizes = [17, 128], strides = [1, 1]} : vector<20x128xf32> to vector<17x128xf32>
    %352 = vector.broadcast %350 : f32 to vector<17x128xf32>
    %353 = arith.mulf %351, %352 : vector<17x128xf32>
    %354 = arith.addf %349, %353 : vector<17x128xf32>
    %c9_74 = arith.constant 9 : index
    %355 = memref.load %arg1[%c9_74] : memref<48xf32, #tpu.memory_space<smem>>
    %356 = vector.extract_strided_slice %306 {offsets = [2, 0], sizes = [17, 128], strides = [1, 1]} : vector<20x128xf32> to vector<17x128xf32>
    %357 = vector.broadcast %355 : f32 to vector<17x128xf32>
    %358 = arith.mulf %356, %357 : vector<17x128xf32>
    %359 = arith.addf %354, %358 : vector<17x128xf32>
    %c10_75 = arith.constant 10 : index
    %360 = memref.load %arg1[%c10_75] : memref<48xf32, #tpu.memory_space<smem>>
    %361 = vector.extract_strided_slice %307 {offsets = [2, 0], sizes = [17, 128], strides = [1, 1]} : vector<20x128xf32> to vector<17x128xf32>
    %362 = vector.broadcast %360 : f32 to vector<17x128xf32>
    %363 = arith.mulf %361, %362 : vector<17x128xf32>
    %364 = arith.addf %359, %363 : vector<17x128xf32>
    %c11_76 = arith.constant 11 : index
    %365 = memref.load %arg1[%c11_76] : memref<48xf32, #tpu.memory_space<smem>>
    %366 = vector.extract_strided_slice %308 {offsets = [2, 0], sizes = [17, 128], strides = [1, 1]} : vector<20x128xf32> to vector<17x128xf32>
    %367 = vector.broadcast %365 : f32 to vector<17x128xf32>
    %368 = arith.mulf %366, %367 : vector<17x128xf32>
    %369 = arith.addf %364, %368 : vector<17x128xf32>
    %c12_77 = arith.constant 12 : index
    %370 = memref.load %arg1[%c12_77] : memref<48xf32, #tpu.memory_space<smem>>
    %371 = vector.extract_strided_slice %305 {offsets = [3, 0], sizes = [17, 128], strides = [1, 1]} : vector<20x128xf32> to vector<17x128xf32>
    %372 = vector.broadcast %370 : f32 to vector<17x128xf32>
    %373 = arith.mulf %371, %372 : vector<17x128xf32>
    %374 = arith.addf %369, %373 : vector<17x128xf32>
    %c13_78 = arith.constant 13 : index
    %375 = memref.load %arg1[%c13_78] : memref<48xf32, #tpu.memory_space<smem>>
    %376 = vector.extract_strided_slice %306 {offsets = [3, 0], sizes = [17, 128], strides = [1, 1]} : vector<20x128xf32> to vector<17x128xf32>
    %377 = vector.broadcast %375 : f32 to vector<17x128xf32>
    %378 = arith.mulf %376, %377 : vector<17x128xf32>
    %379 = arith.addf %374, %378 : vector<17x128xf32>
    %c14_79 = arith.constant 14 : index
    %380 = memref.load %arg1[%c14_79] : memref<48xf32, #tpu.memory_space<smem>>
    %381 = vector.extract_strided_slice %307 {offsets = [3, 0], sizes = [17, 128], strides = [1, 1]} : vector<20x128xf32> to vector<17x128xf32>
    %382 = vector.broadcast %380 : f32 to vector<17x128xf32>
    %383 = arith.mulf %381, %382 : vector<17x128xf32>
    %384 = arith.addf %379, %383 : vector<17x128xf32>
    %c15_80 = arith.constant 15 : index
    %385 = memref.load %arg1[%c15_80] : memref<48xf32, #tpu.memory_space<smem>>
    %386 = vector.extract_strided_slice %308 {offsets = [3, 0], sizes = [17, 128], strides = [1, 1]} : vector<20x128xf32> to vector<17x128xf32>
    %387 = vector.broadcast %385 : f32 to vector<17x128xf32>
    %388 = arith.mulf %386, %387 : vector<17x128xf32>
    %389 = arith.addf %384, %388 : vector<17x128xf32>
    %390 = vector.extract_strided_slice %389 {offsets = [0, 0], sizes = [17, 10], strides = [1, 1]} : vector<17x128xf32> to vector<17x10xf32>
    %c0_81 = arith.constant 0 : index
    %391 = memref.load %arg2[%c0_81] : memref<3xf32, #tpu.memory_space<smem>>
    %392 = vector.broadcast %391 : f32 to vector<17x10xf32>
    %393 = arith.addf %390, %392 : vector<17x10xf32>
    %394 = arith.negf %393 : vector<17x10xf32>
    %395 = math.exp %394 : vector<17x10xf32>
    %cst_82 = arith.constant 1.000000e+00 : f32
    %396 = vector.broadcast %cst_82 : f32 to vector<17x10xf32>
    %397 = arith.addf %396, %395 : vector<17x10xf32>
    %398 = arith.divf %396, %397 : vector<17x10xf32>
    %c1_83 = arith.constant 1 : index
    %c0_84 = arith.constant 0 : index
    %c0_85 = arith.constant 0 : index
    %c0_86 = arith.constant 0 : index
    %399 = vector.load %arg3[%c1_83, %c0_84, %c0_85, %c0_86] : memref<2x3x17x10xf32, #tpu.memory_space<vmem>>, vector<1x1x17x10xf32>
    %400 = vector.shape_cast %399 : vector<1x1x17x10xf32> to vector<17x10xf32>
    %401 = vector.shape_cast %398 : vector<17x10xf32> to vector<1x1x17x10xf32>
    tpu.vector_store %arg3[%c1_83, %c0_84, %c0_85, %c0_86], %401 {strides = array<i32>} : memref<2x3x17x10xf32, #tpu.memory_space<vmem>>, vector<1x1x17x10xf32>,
    %c1_87 = arith.constant 1 : index
    %c1_88 = arith.constant 1 : index
    %c0_89 = arith.constant 0 : index
    %c0_90 = arith.constant 0 : index
    %402 = vector.load %arg0[%c1_87, %c1_88, %c0_89, %c0_90] : memref<2x3x14x7xf32, #tpu.memory_space<vmem>>, vector<1x1x14x7xf32>
    %403 = vector.shape_cast %402 : vector<1x1x14x7xf32> to vector<14x7xf32>
    %c3_91 = arith.constant 3 : index
    %c3_92 = arith.constant 3 : index
    %404 = vector.load %arg4[%c3_91, %c3_92] : memref<20x128xf32, #tpu.memory_space<vmem>>, vector<14x7xf32>
    tpu.vector_store %arg4[%c3_91, %c3_92], %403 {strides = array<i32>} : memref<20x128xf32, #tpu.memory_space<vmem>>, vector<14x7xf32>,
    %c0_93 = arith.constant 0 : index
    %c0_94 = arith.constant 0 : index
    %405 = vector.load %arg4[%c0_93, %c0_94] : memref<20x128xf32, #tpu.memory_space<vmem>>, vector<20x128xf32>
    %c127_i32_95 = arith.constant 127 : i32
    %406 = tpu.dynamic_rotate %405 by %c127_i32_95 dim 1 : vector<20x128xf32>, i32 -> vector<20x128xf32>
    %c126_i32_96 = arith.constant 126 : i32
    %407 = tpu.dynamic_rotate %405 by %c126_i32_96 dim 1 : vector<20x128xf32>, i32 -> vector<20x128xf32>
    %c125_i32_97 = arith.constant 125 : i32
    %408 = tpu.dynamic_rotate %405 by %c125_i32_97 dim 1 : vector<20x128xf32>, i32 -> vector<20x128xf32>
    %cst_98 = arith.constant 0.000000e+00 : f32
    %409 = vector.broadcast %cst_98 : f32 to vector<17x128xf32>
    %c16_99 = arith.constant 16 : index
    %410 = memref.load %arg1[%c16_99] : memref<48xf32, #tpu.memory_space<smem>>
    %411 = vector.extract_strided_slice %405 {offsets = [0, 0], sizes = [17, 128], strides = [1, 1]} : vector<20x128xf32> to vector<17x128xf32>
    %412 = vector.broadcast %410 : f32 to vector<17x128xf32>
    %413 = arith.mulf %411, %412 : vector<17x128xf32>
    %414 = arith.addf %409, %413 : vector<17x128xf32>
    %c17_100 = arith.constant 17 : index
    %415 = memref.load %arg1[%c17_100] : memref<48xf32, #tpu.memory_space<smem>>
    %416 = vector.extract_strided_slice %406 {offsets = [0, 0], sizes = [17, 128], strides = [1, 1]} : vector<20x128xf32> to vector<17x128xf32>
    %417 = vector.broadcast %415 : f32 to vector<17x128xf32>
    %418 = arith.mulf %416, %417 : vector<17x128xf32>
    %419 = arith.addf %414, %418 : vector<17x128xf32>
    %c18_101 = arith.constant 18 : index
    %420 = memref.load %arg1[%c18_101] : memref<48xf32, #tpu.memory_space<smem>>
    %421 = vector.extract_strided_slice %407 {offsets = [0, 0], sizes = [17, 128], strides = [1, 1]} : vector<20x128xf32> to vector<17x128xf32>
    %422 = vector.broadcast %420 : f32 to vector<17x128xf32>
    %423 = arith.mulf %421, %422 : vector<17x128xf32>
    %424 = arith.addf %419, %423 : vector<17x128xf32>
    %c19_102 = arith.constant 19 : index
    %425 = memref.load %arg1[%c19_102] : memref<48xf32, #tpu.memory_space<smem>>
    %426 = vector.extract_strided_slice %408 {offsets = [0, 0], sizes = [17, 128], strides = [1, 1]} : vector<20x128xf32> to vector<17x128xf32>
    %427 = vector.broadcast %425 : f32 to vector<17x128xf32>
    %428 = arith.mulf %426, %427 : vector<17x128xf32>
    %429 = arith.addf %424, %428 : vector<17x128xf32>
    %c20_103 = arith.constant 20 : index
    %430 = memref.load %arg1[%c20_103] : memref<48xf32, #tpu.memory_space<smem>>
    %431 = vector.extract_strided_slice %405 {offsets = [1, 0], sizes = [17, 128], strides = [1, 1]} : vector<20x128xf32> to vector<17x128xf32>
    %432 = vector.broadcast %430 : f32 to vector<17x128xf32>
    %433 = arith.mulf %431, %432 : vector<17x128xf32>
    %434 = arith.addf %429, %433 : vector<17x128xf32>
    %c21_104 = arith.constant 21 : index
    %435 = memref.load %arg1[%c21_104] : memref<48xf32, #tpu.memory_space<smem>>
    %436 = vector.extract_strided_slice %406 {offsets = [1, 0], sizes = [17, 128], strides = [1, 1]} : vector<20x128xf32> to vector<17x128xf32>
    %437 = vector.broadcast %435 : f32 to vector<17x128xf32>
    %438 = arith.mulf %436, %437 : vector<17x128xf32>
    %439 = arith.addf %434, %438 : vector<17x128xf32>
    %c22_105 = arith.constant 22 : index
    %440 = memref.load %arg1[%c22_105] : memref<48xf32, #tpu.memory_space<smem>>
    %441 = vector.extract_strided_slice %407 {offsets = [1, 0], sizes = [17, 128], strides = [1, 1]} : vector<20x128xf32> to vector<17x128xf32>
    %442 = vector.broadcast %440 : f32 to vector<17x128xf32>
    %443 = arith.mulf %441, %442 : vector<17x128xf32>
    %444 = arith.addf %439, %443 : vector<17x128xf32>
    %c23_106 = arith.constant 23 : index
    %445 = memref.load %arg1[%c23_106] : memref<48xf32, #tpu.memory_space<smem>>
    %446 = vector.extract_strided_slice %408 {offsets = [1, 0], sizes = [17, 128], strides = [1, 1]} : vector<20x128xf32> to vector<17x128xf32>
    %447 = vector.broadcast %445 : f32 to vector<17x128xf32>
    %448 = arith.mulf %446, %447 : vector<17x128xf32>
    %449 = arith.addf %444, %448 : vector<17x128xf32>
    %c24_107 = arith.constant 24 : index
    %450 = memref.load %arg1[%c24_107] : memref<48xf32, #tpu.memory_space<smem>>
    %451 = vector.extract_strided_slice %405 {offsets = [2, 0], sizes = [17, 128], strides = [1, 1]} : vector<20x128xf32> to vector<17x128xf32>
    %452 = vector.broadcast %450 : f32 to vector<17x128xf32>
    %453 = arith.mulf %451, %452 : vector<17x128xf32>
    %454 = arith.addf %449, %453 : vector<17x128xf32>
    %c25_108 = arith.constant 25 : index
    %455 = memref.load %arg1[%c25_108] : memref<48xf32, #tpu.memory_space<smem>>
    %456 = vector.extract_strided_slice %406 {offsets = [2, 0], sizes = [17, 128], strides = [1, 1]} : vector<20x128xf32> to vector<17x128xf32>
    %457 = vector.broadcast %455 : f32 to vector<17x128xf32>
    %458 = arith.mulf %456, %457 : vector<17x128xf32>
    %459 = arith.addf %454, %458 : vector<17x128xf32>
    %c26_109 = arith.constant 26 : index
    %460 = memref.load %arg1[%c26_109] : memref<48xf32, #tpu.memory_space<smem>>
    %461 = vector.extract_strided_slice %407 {offsets = [2, 0], sizes = [17, 128], strides = [1, 1]} : vector<20x128xf32> to vector<17x128xf32>
    %462 = vector.broadcast %460 : f32 to vector<17x128xf32>
    %463 = arith.mulf %461, %462 : vector<17x128xf32>
    %464 = arith.addf %459, %463 : vector<17x128xf32>
    %c27_110 = arith.constant 27 : index
    %465 = memref.load %arg1[%c27_110] : memref<48xf32, #tpu.memory_space<smem>>
    %466 = vector.extract_strided_slice %408 {offsets = [2, 0], sizes = [17, 128], strides = [1, 1]} : vector<20x128xf32> to vector<17x128xf32>
    %467 = vector.broadcast %465 : f32 to vector<17x128xf32>
    %468 = arith.mulf %466, %467 : vector<17x128xf32>
    %469 = arith.addf %464, %468 : vector<17x128xf32>
    %c28_111 = arith.constant 28 : index
    %470 = memref.load %arg1[%c28_111] : memref<48xf32, #tpu.memory_space<smem>>
    %471 = vector.extract_strided_slice %405 {offsets = [3, 0], sizes = [17, 128], strides = [1, 1]} : vector<20x128xf32> to vector<17x128xf32>
    %472 = vector.broadcast %470 : f32 to vector<17x128xf32>
    %473 = arith.mulf %471, %472 : vector<17x128xf32>
    %474 = arith.addf %469, %473 : vector<17x128xf32>
    %c29_112 = arith.constant 29 : index
    %475 = memref.load %arg1[%c29_112] : memref<48xf32, #tpu.memory_space<smem>>
    %476 = vector.extract_strided_slice %406 {offsets = [3, 0], sizes = [17, 128], strides = [1, 1]} : vector<20x128xf32> to vector<17x128xf32>
    %477 = vector.broadcast %475 : f32 to vector<17x128xf32>
    %478 = arith.mulf %476, %477 : vector<17x128xf32>
    %479 = arith.addf %474, %478 : vector<17x128xf32>
    %c30_113 = arith.constant 30 : index
    %480 = memref.load %arg1[%c30_113] : memref<48xf32, #tpu.memory_space<smem>>
    %481 = vector.extract_strided_slice %407 {offsets = [3, 0], sizes = [17, 128], strides = [1, 1]} : vector<20x128xf32> to vector<17x128xf32>
    %482 = vector.broadcast %480 : f32 to vector<17x128xf32>
    %483 = arith.mulf %481, %482 : vector<17x128xf32>
    %484 = arith.addf %479, %483 : vector<17x128xf32>
    %c31_114 = arith.constant 31 : index
    %485 = memref.load %arg1[%c31_114] : memref<48xf32, #tpu.memory_space<smem>>
    %486 = vector.extract_strided_slice %408 {offsets = [3, 0], sizes = [17, 128], strides = [1, 1]} : vector<20x128xf32> to vector<17x128xf32>
    %487 = vector.broadcast %485 : f32 to vector<17x128xf32>
    %488 = arith.mulf %486, %487 : vector<17x128xf32>
    %489 = arith.addf %484, %488 : vector<17x128xf32>
    %490 = vector.extract_strided_slice %489 {offsets = [0, 0], sizes = [17, 10], strides = [1, 1]} : vector<17x128xf32> to vector<17x10xf32>
    %c1_115 = arith.constant 1 : index
    %491 = memref.load %arg2[%c1_115] : memref<3xf32, #tpu.memory_space<smem>>
    %492 = vector.broadcast %491 : f32 to vector<17x10xf32>
    %493 = arith.addf %490, %492 : vector<17x10xf32>
    %494 = arith.negf %493 : vector<17x10xf32>
    %495 = math.exp %494 : vector<17x10xf32>
    %cst_116 = arith.constant 1.000000e+00 : f32
    %496 = vector.broadcast %cst_116 : f32 to vector<17x10xf32>
    %497 = arith.addf %496, %495 : vector<17x10xf32>
    %498 = arith.divf %496, %497 : vector<17x10xf32>
    %c1_117 = arith.constant 1 : index
    %c1_118 = arith.constant 1 : index
    %c0_119 = arith.constant 0 : index
    %c0_120 = arith.constant 0 : index
    %499 = vector.load %arg3[%c1_117, %c1_118, %c0_119, %c0_120] : memref<2x3x17x10xf32, #tpu.memory_space<vmem>>, vector<1x1x17x10xf32>
    %500 = vector.shape_cast %499 : vector<1x1x17x10xf32> to vector<17x10xf32>
    %501 = vector.shape_cast %498 : vector<17x10xf32> to vector<1x1x17x10xf32>
    tpu.vector_store %arg3[%c1_117, %c1_118, %c0_119, %c0_120], %501 {strides = array<i32>} : memref<2x3x17x10xf32, #tpu.memory_space<vmem>>, vector<1x1x17x10xf32>,
    %c1_121 = arith.constant 1 : index
    %c2_122 = arith.constant 2 : index
    %c0_123 = arith.constant 0 : index
    %c0_124 = arith.constant 0 : index
    %502 = vector.load %arg0[%c1_121, %c2_122, %c0_123, %c0_124] : memref<2x3x14x7xf32, #tpu.memory_space<vmem>>, vector<1x1x14x7xf32>
    %503 = vector.shape_cast %502 : vector<1x1x14x7xf32> to vector<14x7xf32>
    %c3_125 = arith.constant 3 : index
    %c3_126 = arith.constant 3 : index
    %504 = vector.load %arg4[%c3_125, %c3_126] : memref<20x128xf32, #tpu.memory_space<vmem>>, vector<14x7xf32>
    tpu.vector_store %arg4[%c3_125, %c3_126], %503 {strides = array<i32>} : memref<20x128xf32, #tpu.memory_space<vmem>>, vector<14x7xf32>,
    %c0_127 = arith.constant 0 : index
    %c0_128 = arith.constant 0 : index
    %505 = vector.load %arg4[%c0_127, %c0_128] : memref<20x128xf32, #tpu.memory_space<vmem>>, vector<20x128xf32>
    %c127_i32_129 = arith.constant 127 : i32
    %506 = tpu.dynamic_rotate %505 by %c127_i32_129 dim 1 : vector<20x128xf32>, i32 -> vector<20x128xf32>
    %c126_i32_130 = arith.constant 126 : i32
    %507 = tpu.dynamic_rotate %505 by %c126_i32_130 dim 1 : vector<20x128xf32>, i32 -> vector<20x128xf32>
    %c125_i32_131 = arith.constant 125 : i32
    %508 = tpu.dynamic_rotate %505 by %c125_i32_131 dim 1 : vector<20x128xf32>, i32 -> vector<20x128xf32>
    %cst_132 = arith.constant 0.000000e+00 : f32
    %509 = vector.broadcast %cst_132 : f32 to vector<17x128xf32>
    %c32_133 = arith.constant 32 : index
    %510 = memref.load %arg1[%c32_133] : memref<48xf32, #tpu.memory_space<smem>>
    %511 = vector.extract_strided_slice %505 {offsets = [0, 0], sizes = [17, 128], strides = [1, 1]} : vector<20x128xf32> to vector<17x128xf32>
    %512 = vector.broadcast %510 : f32 to vector<17x128xf32>
    %513 = arith.mulf %511, %512 : vector<17x128xf32>
    %514 = arith.addf %509, %513 : vector<17x128xf32>
    %c33_134 = arith.constant 33 : index
    %515 = memref.load %arg1[%c33_134] : memref<48xf32, #tpu.memory_space<smem>>
    %516 = vector.extract_strided_slice %506 {offsets = [0, 0], sizes = [17, 128], strides = [1, 1]} : vector<20x128xf32> to vector<17x128xf32>
    %517 = vector.broadcast %515 : f32 to vector<17x128xf32>
    %518 = arith.mulf %516, %517 : vector<17x128xf32>
    %519 = arith.addf %514, %518 : vector<17x128xf32>
    %c34_135 = arith.constant 34 : index
    %520 = memref.load %arg1[%c34_135] : memref<48xf32, #tpu.memory_space<smem>>
    %521 = vector.extract_strided_slice %507 {offsets = [0, 0], sizes = [17, 128], strides = [1, 1]} : vector<20x128xf32> to vector<17x128xf32>
    %522 = vector.broadcast %520 : f32 to vector<17x128xf32>
    %523 = arith.mulf %521, %522 : vector<17x128xf32>
    %524 = arith.addf %519, %523 : vector<17x128xf32>
    %c35_136 = arith.constant 35 : index
    %525 = memref.load %arg1[%c35_136] : memref<48xf32, #tpu.memory_space<smem>>
    %526 = vector.extract_strided_slice %508 {offsets = [0, 0], sizes = [17, 128], strides = [1, 1]} : vector<20x128xf32> to vector<17x128xf32>
    %527 = vector.broadcast %525 : f32 to vector<17x128xf32>
    %528 = arith.mulf %526, %527 : vector<17x128xf32>
    %529 = arith.addf %524, %528 : vector<17x128xf32>
    %c36_137 = arith.constant 36 : index
    %530 = memref.load %arg1[%c36_137] : memref<48xf32, #tpu.memory_space<smem>>
    %531 = vector.extract_strided_slice %505 {offsets = [1, 0], sizes = [17, 128], strides = [1, 1]} : vector<20x128xf32> to vector<17x128xf32>
    %532 = vector.broadcast %530 : f32 to vector<17x128xf32>
    %533 = arith.mulf %531, %532 : vector<17x128xf32>
    %534 = arith.addf %529, %533 : vector<17x128xf32>
    %c37_138 = arith.constant 37 : index
    %535 = memref.load %arg1[%c37_138] : memref<48xf32, #tpu.memory_space<smem>>
    %536 = vector.extract_strided_slice %506 {offsets = [1, 0], sizes = [17, 128], strides = [1, 1]} : vector<20x128xf32> to vector<17x128xf32>
    %537 = vector.broadcast %535 : f32 to vector<17x128xf32>
    %538 = arith.mulf %536, %537 : vector<17x128xf32>
    %539 = arith.addf %534, %538 : vector<17x128xf32>
    %c38_139 = arith.constant 38 : index
    %540 = memref.load %arg1[%c38_139] : memref<48xf32, #tpu.memory_space<smem>>
    %541 = vector.extract_strided_slice %507 {offsets = [1, 0], sizes = [17, 128], strides = [1, 1]} : vector<20x128xf32> to vector<17x128xf32>
    %542 = vector.broadcast %540 : f32 to vector<17x128xf32>
    %543 = arith.mulf %541, %542 : vector<17x128xf32>
    %544 = arith.addf %539, %543 : vector<17x128xf32>
    %c39_140 = arith.constant 39 : index
    %545 = memref.load %arg1[%c39_140] : memref<48xf32, #tpu.memory_space<smem>>
    %546 = vector.extract_strided_slice %508 {offsets = [1, 0], sizes = [17, 128], strides = [1, 1]} : vector<20x128xf32> to vector<17x128xf32>
    %547 = vector.broadcast %545 : f32 to vector<17x128xf32>
    %548 = arith.mulf %546, %547 : vector<17x128xf32>
    %549 = arith.addf %544, %548 : vector<17x128xf32>
    %c40_141 = arith.constant 40 : index
    %550 = memref.load %arg1[%c40_141] : memref<48xf32, #tpu.memory_space<smem>>
    %551 = vector.extract_strided_slice %505 {offsets = [2, 0], sizes = [17, 128], strides = [1, 1]} : vector<20x128xf32> to vector<17x128xf32>
    %552 = vector.broadcast %550 : f32 to vector<17x128xf32>
    %553 = arith.mulf %551, %552 : vector<17x128xf32>
    %554 = arith.addf %549, %553 : vector<17x128xf32>
    %c41_142 = arith.constant 41 : index
    %555 = memref.load %arg1[%c41_142] : memref<48xf32, #tpu.memory_space<smem>>
    %556 = vector.extract_strided_slice %506 {offsets = [2, 0], sizes = [17, 128], strides = [1, 1]} : vector<20x128xf32> to vector<17x128xf32>
    %557 = vector.broadcast %555 : f32 to vector<17x128xf32>
    %558 = arith.mulf %556, %557 : vector<17x128xf32>
    %559 = arith.addf %554, %558 : vector<17x128xf32>
    %c42_143 = arith.constant 42 : index
    %560 = memref.load %arg1[%c42_143] : memref<48xf32, #tpu.memory_space<smem>>
    %561 = vector.extract_strided_slice %507 {offsets = [2, 0], sizes = [17, 128], strides = [1, 1]} : vector<20x128xf32> to vector<17x128xf32>
    %562 = vector.broadcast %560 : f32 to vector<17x128xf32>
    %563 = arith.mulf %561, %562 : vector<17x128xf32>
    %564 = arith.addf %559, %563 : vector<17x128xf32>
    %c43_144 = arith.constant 43 : index
    %565 = memref.load %arg1[%c43_144] : memref<48xf32, #tpu.memory_space<smem>>
    %566 = vector.extract_strided_slice %508 {offsets = [2, 0], sizes = [17, 128], strides = [1, 1]} : vector<20x128xf32> to vector<17x128xf32>
    %567 = vector.broadcast %565 : f32 to vector<17x128xf32>
    %568 = arith.mulf %566, %567 : vector<17x128xf32>
    %569 = arith.addf %564, %568 : vector<17x128xf32>
    %c44_145 = arith.constant 44 : index
    %570 = memref.load %arg1[%c44_145] : memref<48xf32, #tpu.memory_space<smem>>
    %571 = vector.extract_strided_slice %505 {offsets = [3, 0], sizes = [17, 128], strides = [1, 1]} : vector<20x128xf32> to vector<17x128xf32>
    %572 = vector.broadcast %570 : f32 to vector<17x128xf32>
    %573 = arith.mulf %571, %572 : vector<17x128xf32>
    %574 = arith.addf %569, %573 : vector<17x128xf32>
    %c45_146 = arith.constant 45 : index
    %575 = memref.load %arg1[%c45_146] : memref<48xf32, #tpu.memory_space<smem>>
    %576 = vector.extract_strided_slice %506 {offsets = [3, 0], sizes = [17, 128], strides = [1, 1]} : vector<20x128xf32> to vector<17x128xf32>
    %577 = vector.broadcast %575 : f32 to vector<17x128xf32>
    %578 = arith.mulf %576, %577 : vector<17x128xf32>
    %579 = arith.addf %574, %578 : vector<17x128xf32>
    %c46_147 = arith.constant 46 : index
    %580 = memref.load %arg1[%c46_147] : memref<48xf32, #tpu.memory_space<smem>>
    %581 = vector.extract_strided_slice %507 {offsets = [3, 0], sizes = [17, 128], strides = [1, 1]} : vector<20x128xf32> to vector<17x128xf32>
    %582 = vector.broadcast %580 : f32 to vector<17x128xf32>
    %583 = arith.mulf %581, %582 : vector<17x128xf32>
    %584 = arith.addf %579, %583 : vector<17x128xf32>
    %c47_148 = arith.constant 47 : index
    %585 = memref.load %arg1[%c47_148] : memref<48xf32, #tpu.memory_space<smem>>
    %586 = vector.extract_strided_slice %508 {offsets = [3, 0], sizes = [17, 128], strides = [1, 1]} : vector<20x128xf32> to vector<17x128xf32>
    %587 = vector.broadcast %585 : f32 to vector<17x128xf32>
    %588 = arith.mulf %586, %587 : vector<17x128xf32>
    %589 = arith.addf %584, %588 : vector<17x128xf32>
    %590 = vector.extract_strided_slice %589 {offsets = [0, 0], sizes = [17, 10], strides = [1, 1]} : vector<17x128xf32> to vector<17x10xf32>
    %c2_149 = arith.constant 2 : index
    %591 = memref.load %arg2[%c2_149] : memref<3xf32, #tpu.memory_space<smem>>
    %592 = vector.broadcast %591 : f32 to vector<17x10xf32>
    %593 = arith.addf %590, %592 : vector<17x10xf32>
    %594 = arith.negf %593 : vector<17x10xf32>
    %595 = math.exp %594 : vector<17x10xf32>
    %cst_150 = arith.constant 1.000000e+00 : f32
    %596 = vector.broadcast %cst_150 : f32 to vector<17x10xf32>
    %597 = arith.addf %596, %595 : vector<17x10xf32>
    %598 = arith.divf %596, %597 : vector<17x10xf32>
    %c1_151 = arith.constant 1 : index
    %c2_152 = arith.constant 2 : index
    %c0_153 = arith.constant 0 : index
    %c0_154 = arith.constant 0 : index
    %599 = vector.load %arg3[%c1_151, %c2_152, %c0_153, %c0_154] : memref<2x3x17x10xf32, #tpu.memory_space<vmem>>, vector<1x1x17x10xf32>
    %600 = vector.shape_cast %599 : vector<1x1x17x10xf32> to vector<17x10xf32>
    %601 = vector.shape_cast %598 : vector<17x10xf32> to vector<1x1x17x10xf32>
    tpu.vector_store %arg3[%c1_151, %c2_152, %c0_153, %c0_154], %601 {strides = array<i32>} : memref<2x3x17x10xf32, #tpu.memory_space<vmem>>, vector<1x1x17x10xf32>,
    return
  }
}

</mosaic_0001>

<bundles_post_ra>
// kernel: tpu_custom_call.1
= control target key start
LH: loop header
LB: loop body
LE: loop exit
PB: predicated region body
PF: predicated region fallthrough
CT: control target
= control target key end

     0   :  { %s4190_s0 = inlined_call_operand.vmem [shape: f32[2,3,14,7], index: 0, kind: input, shape index: {}]   ;;  %s4191_s1 = inlined_call_operand.vmem [shape: f32[48], index: 1, kind: input, shape index: {}]   ;;  %s4192_s2 = inlined_call_operand.vmem [shape: f32[3], index: 2, kind: input, shape index: {}]   ;;  %s4193_s3 = inlined_call_operand.vmem [shape: f32[2,3,17,10], index: 3, kind: output, shape index: {}]  }
   0x1   :  { %4264 = sst [smem:[#allocation102_spill]] %s4193_s3 }
   0x2   :  { %8 = vsyncpa [#allocation4], 0  ;;  %s18_s14 = sshll.u32 %s4191_s1, 4  ;;  %s19_s14 = int_to_ptr.vmem [resolvable:$true] %s18_s14 }
   0x3   :  { %9 = vsyncpa [#allocation6], 0  ;;  %s28_s17 = sshll.u32 %s4192_s2, 4  ;;  %s2202_s18 = scalar_lea.vmem %s19_s14, 16  ;;  %s29_s17 = int_to_ptr.vmem [resolvable:$true] %s28_s17 }
   0x4   :  { %p2203_p0 = scmp.ne.s32.totalorder %s19_s14, %s2202_s18  ;;  %p2207_p1 = scmp.lt.s32.totalorder %s19_s14, %s19_s14 }
   0x5   :  { %p2208_p2 = scmp.lt.s32.totalorder %s2202_s18, %s2202_s18 }
   0x7   :  { %p2209_p3 = por %p2208_p2, %p2207_p1 }
   0x9   :  { %p2210_p4 = pnand %p2209_p3, %p2203_p0 }
   0xb   :  { %2213 = shalt.err (!%p2210_p4)
}
   0xc   :  { %s2230_s19 = smov [#allocation3]   ;;  %s2214_s20 = scalar_lea.vmem %s29_s17, 16 }
   0xd   :  { %21 = dma.vmem_to_smem %s19_s14, 16, %s2230_s19, [#allocation4]  }
   0xe   :  { %p2215_p5 = scmp.ne.s32.totalorder %s29_s17, %s2214_s20  ;;  %p2219_p6 = scmp.lt.s32.totalorder %s29_s17, %s29_s17 }
   0xf   :  { %p2220_p7 = scmp.lt.s32.totalorder %s2214_s20, %s2214_s20 }
  0x11   :  { %p2221_p8 = por %p2220_p7, %p2219_p6 }
  0x13   :  { %p2222_p9 = pnand %p2221_p8, %p2215_p5 }
  0x15   :  { %2225 = shalt.err (!%p2222_p9)
}
  0x16   :  { %s2231_s1 = smov [#allocation5]  }
  0x17   :  { %31 = dma.vmem_to_smem %s29_s17, 16, %s2231_s1, [#allocation6]  }
  0x18   :  { %2226 = dma.done.wait [#allocation4], 16  }
  0x19   :  { %2227 = vsyncadd [#allocation4], 4294967280 }
  0x1a   :  { %2228 = dma.done.wait [#allocation6], 16  }
  0x1b   :  { %2229 = vsyncadd [#allocation6], 4294967280 }
  0x1c   :  { %38 = sfence }
  0x1d   :  { %v42_v0 = vld [vmem:[%s4190_s0] sm:$0xff]  ;;  %v1997_v1 = vld [vmem:[%s4190_s0 + $0x10] sm:$0xff]  ;;  %s2232_s24 = smov 3   ;;  %v43_v2 = vld [vmem:[%s4190_s0 + $0x8] sm:$0x3f]  ;;  %v2233_v4 = vmov 0.0  }
  0x1e   :  { %46 = vrot.lane.b32.xlu0 %v42_v0, %s2232_s24  ;;  %373 = vrot.lane.b32.xlu1 %v1997_v1, %s2232_s24  ;;  %v1998_v3 = vld [vmem:[%s4190_s0 + $0x18] sm:$0x3f]  ;;  %39 = vst [vmem:[#allocation2] sm:$0xff] %v2233_v4  ;;  %40 = vst [vmem:[#allocation2 + $0x8] sm:$0xff] %v2233_v4  ;;  %v2022_v5 = vld [vmem:[%s4190_s0 + $0x20] sm:$0xff]  ;;  %vm52_vm0 = vcmask 80920  }
  0x1f   :  { %41 = vst [vmem:[#allocation2 + $0x10] sm:$0xf] %v2233_v4  ;;  %v2023_v6 = vld [vmem:[%s4190_s0 + $0x28] sm:$0x3f]  ;;  %v2048_v7 = vld [vmem:[%s4190_s0 + $0x38] sm:$0x3f] }
  0x20   :  { %v2047_v8 = vld [vmem:[%s4190_s0 + $0x30] sm:$0xff]  ;;  %v2070_v9 = vld [vmem:[%s4190_s0 + $0x40] sm:$0xff]  ;;  %v2071_v10 = vld [vmem:[%s4190_s0 + $0x48] sm:$0x3f]  ;;  %s1982_s18 = sld [smem:[#allocation3 + $0x4]]  ;;  %s1986_s19 = sld [smem:[#allocation3 + $0x8]] }
  0x21   :  { %v2096_v11 = vld [vmem:[%s4190_s0 + $0x58] sm:$0x3f]  ;;  %v2095_v12 = vld [vmem:[%s4190_s0 + $0x50] sm:$0xff]  ;;  %s1990_s20 = sld [smem:[#allocation3 + $0xc]]  ;;  %vm54_vm1 = vcmask 78872   ;;  %s2234_s1 = smov 127  }
  0x22   :  { %48 = vrot.lane.b32.xlu0 %v43_v2, %s2232_s24  ;;  %375 = vrot.lane.b32.xlu1 %v1998_v3, %s2232_s24  ;;  %s2305_s0 = sld [smem:[#allocation3 + $0x14]]  ;;  %s2309_s2 = sld [smem:[#allocation3 + $0x18]]  ;;  %vm117_vm2 = vcmask 1046528   ;;  %vm194_vm3 = vcmask 1045504   ;;  %vm271_vm4 = vcmask 1044480   ;;  %vm363_vm5 = vcmask 80896  }
  0x23   :  { %s2311_s21 = sld [smem:[#allocation3 + $0x1c]]  ;;  %s2235_s22 = smov 126   ;;  %vm366_vm6 = vcmask 73728  }
  0x24   :  { %s2370_s23 = sld [smem:[#allocation3 + $0x24]]  ;;  %s4215_s26 = smov 125  }
  0x25   :  { %s2380_s25 = sld [smem:[#allocation3 + $0x2c]]  ;;  %s2425_s28 = sld [smem:[#allocation3 + $0x8]] }
  0x26   :  { %694 = vrot.lane.b32.xlu0 %v2022_v5, %s2232_s24  ;;  %696 = vrot.lane.b32.xlu1 %v2023_v6, %s2232_s24  ;;  %v110_v17 = vstv %s1982_s18  ;;  %v187_v18 = vstv %s1986_s19  ;;  %s2394_s27 = sld [smem:[#allocation3 + $0x4]]  ;;  %s2513_s4 = sld [smem:[#allocation3 + $0x18]] }
  0x27   :  { %v264_v19 = vstv %s1990_s20  ;;  %s2427_s29 = sld [smem:[#allocation3 + $0xc]]  ;;  %s2105_s7 = sld [smem:[#allocation3 + $0x28]] }
  0x28   :  { %v435_v41 = vstv %s2305_s0  ;;  %v511_v50 = vstv %s2309_s2  ;;  %s2487_s30 = sld [smem:[#allocation3 + $0x14]]  ;;  %s2725_s9 = sld [smem:[#allocation3]] }
  0x29   :  { %v587_v51 = vstv %s2311_s21  ;;  %s2515_s5 = sld [smem:[#allocation3 + $0x1c]]  ;;  %s2727_s10 = sld [smem:[#allocation3 + $0x10]] }
  0x2a   :  { %1017 = vrot.lane.b32.xlu1 %v2048_v7, %s2232_s24  ;;  %1015 = vrot.lane.b32.xlu0 %v2047_v8, %s2232_s24  ;;  %s2101_s6 = sld [smem:[#allocation3 + $0x24]]  ;;  %s2729_s11 = sld [smem:[#allocation3 + $0x20]] }
  0x2b   :  { %s2109_s8 = sld [smem:[#allocation3 + $0x2c]]  ;;  %s2731_s12 = sld [smem:[#allocation3]] }
  0x2c   :  { %s2733_s13 = sld [smem:[#allocation3 + $0x1]]  ;;  %s2735_s14 = sld [smem:[#allocation3 + $0x5]] }
  0x2d   :  { %s2741_s15 = sld [smem:[#allocation3 + $0x9]]  ;;  %s2743_s16 = sld [smem:[#allocation3 + $0xd]] }
  0x2e   :  { %1336 = vrot.lane.b32.xlu0 %v2070_v9, %s2232_s24  ;;  %1338 = vrot.lane.b32.xlu1 %v2071_v10, %s2232_s24  ;;  %s2745_s17 = sld [smem:[#allocation3 + $0x2]]  ;;  %s2747_s18 = sld [smem:[#allocation3 + $0x6]] }
  0x2f   :  { %s2749_s19 = sld [smem:[#allocation3 + $0xa]]  ;;  %s2751_s20 = sld [smem:[#allocation3 + $0xe]] }
  0x30   :  { %s2753_s0 = sld [smem:[#allocation3 + $0x3]]  ;;  %s2755_s2 = sld [smem:[#allocation3 + $0x7]] }
  0x31   :  { %s2761_s21 = sld [smem:[#allocation3 + $0xb]]  ;;  %s4316_s3 = smov 125  }
  0x32   :  { %1659 = vrot.lane.b32.xlu1 %v2096_v11, %s2232_s24  ;;  %1657 = vrot.lane.b32.xlu0 %v2095_v12, %s2232_s24  ;;  %s2372_s24 = sld [smem:[#allocation3 + $0x28]] }
  0x90   :  { %v47_v13 = vpop.permute.xlu0 %46  ;;  %v374_v15 = vpop.permute.xlu1 %373 }
  0x91   :  { %53 = vst.msk [vmem:[#allocation2 + $0x3] sm:$0xff] %vm52_vm0, %v47_v13 }
  0x94   :  { %v49_v14 = vpop.permute.xlu0 %48  ;;  %v376_v20 = vpop.permute.xlu1 %375 }
  0x95   :  { %55 = vst.msk [vmem:[#allocation2 + $0xb] sm:$0x3f] %vm54_vm1, %v49_v14  ;;  %v756_v14 = vstv %s2370_s23  ;;  %s2763_s23 = sld [smem:[#allocation3 + $0xf]] }
  0x98   :  { %v2301_v16 = vld [vmem:[#allocation2] sm:$0xff]  ;;  %v695_v42 = vpop.permute.xlu0 %694  ;;  %v697_v43 = vpop.permute.xlu1 %696 }
  0x99   :  { %59 = vrot.lane.b32.xlu0 %v2301_v16, %s2234_s1  ;;  %v111_v21 = vmul.f32 %v110_v17, %v2301_v16  ;;  %v188_v22 = vmul.f32 %v187_v18, %v2301_v16  ;;  %v265_v25 = vmul.f32 %v264_v19, %v2301_v16 }
  0x9b   :  { %v118_v32 = vrot.slane %v111_v21, 1  ;;  %v195_v33 = vrot.slane %v188_v22, 2  ;;  %v272_v38 = vrot.slane %v265_v25, 3  ;;  %v908_v25 = vstv %s2380_s25  ;;  %s2767_s25 = sld [smem:[#allocation3 + $0x10]] }
  0x9c   :  { %v2313_v23 = vld [vmem:[#allocation2 + $0x8] sm:$0xff]  ;;  %v2315_v24 = vld [vmem:[#allocation2 + $0x10] sm:$0xf]  ;;  %v1018_v6 = vpop.permute.xlu1 %1017  ;;  %v1016_v7 = vpop.permute.xlu0 %1015 }
  0x9d   :  { %379 = vst.msk [vmem:[#allocation2 + $0x3] sm:$0xff] %vm52_vm0, %v374_v15  ;;  %61 = vrot.lane.b32.xlu1 %v2313_v23, %s2234_s1  ;;  %63 = vrot.lane.b32.xlu0 %v2315_v24, %s2234_s1  ;;  %v2325_v26 = vmul.f32 %v110_v17, %v2315_v24  ;;  %v112_v27 = vmul.f32 %v110_v17, %v2313_v23  ;;  %v832_v15 = vstv %s2372_s24  ;;  %s2765_s24 = sld [smem:[#allocation3 + $0x11]] }
  0x9e   :  { %380 = vst.msk [vmem:[#allocation2 + $0xb] sm:$0x3f] %vm54_vm1, %v376_v20  ;;  %v189_v28 = vmul.f32 %v187_v18, %v2313_v23  ;;  %v266_v29 = vmul.f32 %v264_v19, %v2313_v23  ;;  %v2331_v30 = vmul.f32 %v187_v18, %v2315_v24  ;;  %v2335_v34 = vmul.f32 %v264_v19, %v2315_v24 }
  0x9f   :  { %v4205_v31 = vrot.slane %v2325_v26, 1  ;;  %v119_v35 = vrot.slane %v112_v27, 1 }
  0xa0   :  { %v196_v36 = vrot.slane %v189_v28, 2  ;;  %v273_v37 = vrot.slane %v266_v29, 3  ;;  %v4202_v39 = vrot.slane %v2331_v30, 2  ;;  %v4201_v40 = vrot.slane %v2335_v34, 3 }
  0xa1   :  { %67 = vrot.lane.b32.xlu1 %v2313_v23, %s2235_s22  ;;  %65 = vrot.lane.b32.xlu0 %v2301_v16, %s2235_s22  ;;  %v2347_v44 = vsel %vm117_vm2, %v119_v35, %v4205_v31  ;;  %v2350_v45 = vsel %vm117_vm2, %v118_v32, %v119_v35  ;;  %v1077_v28 = vstv %s2394_s27  ;;  %s2769_s27 = sld [smem:[#allocation3 + $0x15]] }
  0xa2   :  { %v2353_v46 = vsel %vm194_vm3, %v195_v33, %v196_v36  ;;  %v2356_v47 = vsel %vm271_vm4, %v272_v38, %v273_v37  ;;  %v2361_v48 = vsel %vm194_vm3, %v196_v36, %v4202_v39  ;;  %v2366_v49 = vsel %vm271_vm4, %v273_v37, %v4201_v40 }
  0xa4   :  { %v2376_v53 = vld [vmem:[#allocation2] sm:$0xff] }
  0xa5   :  { %v2374_v52 = vld [vmem:[#allocation2 + $0x8] sm:$0xff]  ;;  %v2378_v54 = vld [vmem:[#allocation2 + $0x10] sm:$0xf]  ;;  %73 = vrot.lane.b32.xlu1 %v2313_v23, %s4215_s26  ;;  %69 = vrot.lane.b32.xlu0 %v2315_v24, %s2235_s22  ;;  %v436_v59 = vmul.f32 %v435_v41, %v2376_v53  ;;  %v512_v60 = vmul.f32 %v511_v50, %v2376_v53  ;;  %v588_v61 = vmul.f32 %v587_v51, %v2376_v53 }
  0xa6   :  { %700 = vst.msk [vmem:[#allocation2 + $0x3] sm:$0xff] %vm52_vm0, %v695_v42  ;;  %v2389_v55 = vmul.f32 %v435_v41, %v2378_v54  ;;  %v437_v56 = vmul.f32 %v435_v41, %v2374_v52  ;;  %v513_v57 = vmul.f32 %v511_v50, %v2374_v52  ;;  %v589_v58 = vmul.f32 %v587_v51, %v2374_v52 }
  0xa7   :  { %701 = vst.msk [vmem:[#allocation2 + $0xb] sm:$0x3f] %vm54_vm1, %v697_v43  ;;  %v2400_v62 = vmul.f32 %v511_v50, %v2378_v54  ;;  %v2404_v1 = vmul.f32 %v587_v51, %v2378_v54  ;;  %v442_v4 = vrot.slane %v436_v59, 1  ;;  %v518_v5 = vrot.slane %v512_v60, 2 }
  0xa8   :  { %4265 = vst [vmem:[#allocation9_spill] sm:$0xff] %v2389_v55  ;;  %v4200_v63 = vrot.slane %v2389_v55, 1  ;;  %v443_v0 = vrot.slane %v437_v56, 1  ;;  %v519_v2 = vrot.slane %v513_v57, 2  ;;  %v595_v3 = vrot.slane %v589_v58, 3  ;;  %v1337_v56 = vpop.permute.xlu0 %1336  ;;  %v1339_v57 = vpop.permute.xlu1 %1338 }
  0xa9   :  { %4266 = vst [vmem:[#allocation10_spill] sm:$0xff] %v2400_v62  ;;  %4267 = vst [vmem:[#allocation11_spill] sm:$0xff] %v2404_v1  ;;  %71 = vrot.lane.b32.xlu0 %v2301_v16, %s4215_s26  ;;  %384 = vrot.lane.b32.xlu1 %v2376_v53, %s2234_s1  ;;  %v594_v9 = vrot.slane %v588_v61, 3  ;;  %v4198_v10 = vrot.slane %v2400_v62, 2  ;;  %v4197_v11 = vrot.slane %v2404_v1, 3 }
  0xaa   :  { %v2413_v8 = vsel %vm117_vm2, %v443_v0, %v4200_v63  ;;  %v2418_v12 = vsel %vm117_vm2, %v442_v4, %v443_v0  ;;  %v2421_v13 = vsel %vm194_vm3, %v518_v5, %v519_v2  ;;  %v1229_v4 = vstv %s2427_s29  ;;  %s2773_s29 = sld [smem:[#allocation3 + $0x1d]] }
  0xab   :  { %4268 = vst [vmem:[#allocation12_spill] sm:$0xff] %v2413_v8  ;;  %4269 = vst [vmem:[#allocation13_spill] sm:$0xff] %v2418_v12  ;;  %v2436_v20 = vsel %vm271_vm4, %v594_v9, %v595_v3  ;;  %v2441_v21 = vsel %vm194_vm3, %v519_v2, %v4198_v10  ;;  %v2446_v22 = vsel %vm271_vm4, %v595_v3, %v4197_v11  ;;  %v1153_v3 = vstv %s2425_s28  ;;  %s2771_s28 = sld [smem:[#allocation3 + $0x19]] }
  0xac   :  { %4270 = vst [vmem:[#allocation14_spill] sm:$0xff] %v2421_v13  ;;  %4271 = vst [vmem:[#allocation15_spill] sm:$0xff] %v2436_v20 }
  0xad   :  { %v2429_v17 = vld [vmem:[#allocation2] sm:$0xff]  ;;  %4272 = vst [vmem:[#allocation16_spill] sm:$0xff] %v2441_v21  ;;  %4273 = vst [vmem:[#allocation17_spill] sm:$0xff] %v2446_v22  ;;  %75 = vrot.lane.b32.xlu0 %v2315_v24, %s4215_s26  ;;  %388 = vrot.lane.b32.xlu1 %v2378_v54, %s2234_s1 }
  0xae   :  { %v2431_v18 = vld [vmem:[#allocation2 + $0x8] sm:$0xff]  ;;  %v2433_v19 = vld [vmem:[#allocation2 + $0x10] sm:$0xf]  ;;  %v757_v35 = vmul.f32 %v756_v14, %v2429_v17  ;;  %v833_v37 = vmul.f32 %v832_v15, %v2429_v17  ;;  %v909_v38 = vmul.f32 %v908_v25, %v2429_v17 }
  0xaf   :  { %1022 = vst.msk [vmem:[#allocation2 + $0xb] sm:$0x3f] %vm54_vm1, %v1018_v6  ;;  %v2456_v27 = vmul.f32 %v756_v14, %v2433_v19  ;;  %v758_v29 = vmul.f32 %v756_v14, %v2431_v18  ;;  %v834_v32 = vmul.f32 %v832_v15, %v2431_v18  ;;  %v910_v33 = vmul.f32 %v908_v25, %v2431_v18 }
  0xb0   :  { %1021 = vst.msk [vmem:[#allocation2 + $0x3] sm:$0xff] %vm52_vm0, %v1016_v7  ;;  %v2467_v41 = vmul.f32 %v832_v15, %v2433_v19  ;;  %v763_v51 = vrot.slane %v757_v35, 1  ;;  %v839_v58 = vrot.slane %v833_v37, 2  ;;  %v915_v59 = vrot.slane %v909_v38, 3 }
  0xb1   :  { %4274 = vst [vmem:[#allocation18_spill] sm:$0xff] %v2456_v27  ;;  %v4196_v36 = vrot.slane %v2456_v27, 1  ;;  %386 = vrot.lane.b32.xlu0 %v2374_v52, %s2234_s1  ;;  %390 = vrot.lane.b32.xlu1 %v2376_v53, %s2235_s22  ;;  %v764_v42 = vrot.slane %v758_v29, 1  ;;  %v840_v43 = vrot.slane %v834_v32, 2  ;;  %v916_v50 = vrot.slane %v910_v33, 3 }
  0xb2   :  { %4275 = vst [vmem:[#allocation19_spill] sm:$0xff] %v2467_v41  ;;  %v4195_v60 = vrot.slane %v2467_v41, 2  ;;  %v2475_v61 = vmul.f32 %v908_v25, %v2433_v19 }
  0xb3   :  { %v2480_v0 = vsel %vm117_vm2, %v764_v42, %v4196_v36  ;;  %v2483_v2 = vsel %vm117_vm2, %v763_v51, %v764_v42  ;;  %v2496_v9 = vsel %vm194_vm3, %v839_v58, %v840_v43  ;;  %v2499_v14 = vsel %vm271_vm4, %v915_v59, %v916_v50 }
  0xb4   :  { %4276 = vst [vmem:[#allocation20_spill] sm:$0xff] %v2475_v61  ;;  %4277 = vst [vmem:[#allocation21_spill] sm:$0xff] %v2480_v0  ;;  %v2504_v15 = vsel %vm194_vm3, %v840_v43, %v4195_v60  ;;  %v4194_v25 = vrot.slane %v2475_v61, 3 }
  0xb5   :  { %4278 = vst [vmem:[#allocation22_spill] sm:$0xff] %v2483_v2  ;;  %4279 = vst [vmem:[#allocation23_spill] sm:$0xff] %v2496_v9  ;;  %392 = vrot.lane.b32.xlu0 %v2374_v52, %s2235_s22  ;;  %394 = vrot.lane.b32.xlu1 %v2378_v54, %s2235_s22 }
  0xb6   :  { %v2491_v6 = vld [vmem:[#allocation2 + $0x10] sm:$0xf]  ;;  %4280 = vst [vmem:[#allocation24_spill] sm:$0xff] %v2499_v14  ;;  %4281 = vst [vmem:[#allocation25_spill] sm:$0xff] %v2504_v15  ;;  %v2520_v29 = vsel %vm271_vm4, %v916_v50, %v4194_v25  ;;  %v1658_v25 = vpop.permute.xlu0 %1657 }
  0xb7   :  { %v2489_v5 = vld [vmem:[#allocation2] sm:$0xff]  ;;  %v2493_v7 = vld [vmem:[#allocation2 + $0x8] sm:$0xff]  ;;  %4282 = vst [vmem:[#allocation26_spill] sm:$0xff] %v2520_v29  ;;  %v2523_v32 = vmul.f32 %v1077_v28, %v2491_v6  ;;  %v2537_v59 = vmul.f32 %v1153_v3, %v2491_v6  ;;  %v2545_v11 = vmul.f32 %v1229_v4, %v2491_v6 }
  0xb8   :  { %1342 = vst.msk [vmem:[#allocation2 + $0x3] sm:$0xff] %vm52_vm0, %v1337_v56  ;;  %v1079_v33 = vmul.f32 %v1077_v28, %v2493_v7  ;;  %v1155_v35 = vmul.f32 %v1153_v3, %v2493_v7  ;;  %v1231_v37 = vmul.f32 %v1229_v4, %v2493_v7  ;;  %v1078_v38 = vmul.f32 %v1077_v28, %v2489_v5  ;;  %v1660_v28 = vpop.permute.xlu1 %1659 }
  0xb9   :  { %1343 = vst.msk [vmem:[#allocation2 + $0xb] sm:$0x3f] %vm54_vm1, %v1339_v57  ;;  %4283 = vst [vmem:[#allocation27_spill] sm:$0xff] %v2523_v32  ;;  %v4199_v42 = vrot.slane %v2523_v32, 1  ;;  %v1154_v51 = vmul.f32 %v1153_v3, %v2489_v5  ;;  %v1230_v56 = vmul.f32 %v1229_v4, %v2489_v5  ;;  %398 = vrot.lane.b32.xlu0 %v2374_v52, %s4215_s26  ;;  %396 = vrot.lane.b32.xlu1 %v2376_v53, %s4215_s26 }
  0xba   :  { %v1085_v43 = vrot.slane %v1079_v33, 1  ;;  %v1161_v50 = vrot.slane %v1155_v35, 2  ;;  %v1237_v57 = vrot.slane %v1231_v37, 3  ;;  %v1084_v58 = vrot.slane %v1078_v38, 1  ;;  %4284 = vst [vmem:[#allocation28_spill] sm:$0xff] %v2537_v59  ;;  %4286 = vst [vmem:[#allocation30_spill] sm:$0xff] %v2545_v11 }
  0xbb   :  { %v1160_v60 = vrot.slane %v1154_v51, 2  ;;  %v1236_v36 = vrot.slane %v1230_v56, 3  ;;  %v4204_v3 = vrot.slane %v2537_v59, 2  ;;  %v4203_v4 = vrot.slane %v2545_v11, 3 }
  0xbc   :  { %v2542_v33 = vsel %vm117_vm2, %v1085_v43, %v4199_v42  ;;  %v2548_v35 = vsel %vm117_vm2, %v1084_v58, %v1085_v43  ;;  %v1398_v56 = vstv %s2487_s30  ;;  %v1550_v43 = vstv %s2515_s5  ;;  %s2775_s30 = sld [smem:[#allocation3 + $0x12]]  ;;  %s2785_s5 = sld [smem:[#allocation3 + $0x1e]] }
  0xbd   :  { %4285 = vst [vmem:[#allocation29_spill] sm:$0xff] %v2542_v33  ;;  %4287 = vst [vmem:[#allocation31_spill] sm:$0xff] %v2548_v35  ;;  %v2558_v42 = vsel %vm194_vm3, %v1160_v60, %v1161_v50  ;;  %v2561_v51 = vsel %vm271_vm4, %v1236_v36, %v1237_v57  ;;  %400 = vrot.lane.b32.xlu1 %v2378_v54, %s4215_s26  ;;  %705 = vrot.lane.b32.xlu0 %v2429_v17, %s2234_s1  ;;  %v1474_v36 = vstv %s2513_s4  ;;  %s2783_s4 = sld [smem:[#allocation3 + $0x1a]] }
  0xbe   :  { %4288 = vst [vmem:[#allocation32_spill] sm:$0xff] %v2558_v42  ;;  %4289 = vst [vmem:[#allocation33_spill] sm:$0xff] %v2561_v51  ;;  %v2574_v60 = vsel %vm194_vm3, %v1161_v50, %v4204_v3  ;;  %v2581_v58 = vsel %vm271_vm4, %v1237_v57, %v4203_v4 }
  0xbf   :  { %v2551_v37 = vld [vmem:[#allocation2] sm:$0xff]  ;;  %4290 = vst [vmem:[#allocation34_spill] sm:$0xff] %v2574_v60  ;;  %4291 = vst [vmem:[#allocation35_spill] sm:$0xff] %v2581_v58 }
  0xc0   :  { %v2553_v38 = vld [vmem:[#allocation2 + $0x8] sm:$0xff]  ;;  %v2555_v10 = vld [vmem:[#allocation2 + $0x10] sm:$0xf]  ;;  %v1399_v39 = vmul.f32 %v1398_v56, %v2551_v37  ;;  %v1475_v50 = vmul.f32 %v1474_v36, %v2551_v37  ;;  %v1551_v3 = vmul.f32 %v1550_v43, %v2551_v37 }
  0xc1   :  { %1664 = vst.msk [vmem:[#allocation2 + $0xb] sm:$0x3f] %vm54_vm1, %v1660_v28  ;;  %v2584_v63 = vmul.f32 %v1398_v56, %v2555_v10  ;;  %v1400_v40 = vmul.f32 %v1398_v56, %v2553_v38  ;;  %v1476_v28 = vmul.f32 %v1474_v36, %v2553_v38  ;;  %707 = vrot.lane.b32.xlu1 %v2431_v18, %s2234_s1 }
  0xc2   :  { %1663 = vst.msk [vmem:[#allocation2 + $0x3] sm:$0xff] %vm52_vm0, %v1658_v25  ;;  %v1552_v25 = vmul.f32 %v1550_v43, %v2553_v38  ;;  %709 = vrot.lane.b32.xlu0 %v2433_v19, %s2234_s1  ;;  %v2598_v31 = vmul.f32 %v1474_v36, %v2555_v10  ;;  %v1405_v51 = vrot.slane %v1399_v39, 1  ;;  %v1481_v56 = vrot.slane %v1475_v50, 2  ;;  %4310 = sst [smem:[#allocation54_spill]] %s2785_s5  ;;  %s2803_s5 = sld [smem:[#allocation3 + $0x21]] }
  0xc3   :  { %4292 = vst [vmem:[#allocation36_spill] sm:$0xff] %v2584_v63  ;;  %v4211_v57 = vrot.slane %v2584_v63, 1  ;;  %v1406_v4 = vrot.slane %v1400_v40, 1  ;;  %v1482_v11 = vrot.slane %v1476_v28, 2  ;;  %v1557_v60 = vrot.slane %v1551_v3, 3 }
  0xc4   :  { %4293 = vst [vmem:[#allocation37_spill] sm:$0xff] %v2598_v31  ;;  %v1558_v58 = vrot.slane %v1552_v25, 3  ;;  %v4210_v42 = vrot.slane %v2598_v31, 2  ;;  %v2607_v32 = vmul.f32 %v1550_v43, %v2555_v10  ;;  %v1719_v43 = vstv %s2101_s6  ;;  %s2787_s6 = sld [smem:[#allocation3 + $0x20]] }
  0xc5   :  { %v2603_v59 = vsel %vm117_vm2, %v1406_v4, %v4211_v57  ;;  %v2610_v40 = vsel %vm117_vm2, %v1405_v51, %v1406_v4  ;;  %v2613_v36 = vsel %vm194_vm3, %v1481_v56, %v1482_v11  ;;  %713 = vrot.lane.b32.xlu1 %v2431_v18, %s2235_s22  ;;  %v2911_v29 = vstv %s2775_s30 }
  0xc6   :  { %4294 = vst [vmem:[#allocation38_spill] sm:$0xff] %v2603_v59  ;;  %4295 = vst [vmem:[#allocation39_spill] sm:$0xff] %v2607_v32  ;;  %711 = vrot.lane.b32.xlu0 %v2429_v17, %s2235_s22  ;;  %v2620_v39 = vsel %vm271_vm4, %v1557_v60, %v1558_v58  ;;  %v2625_v3 = vsel %vm194_vm3, %v1482_v11, %v4210_v42  ;;  %v4209_v51 = vrot.slane %v2607_v32, 3  ;;  %v1871_v42 = vstv %s2109_s8  ;;  %s2791_s8 = sld [smem:[#allocation3 + $0x13]] }
  0xc7   :  { %4296 = vst [vmem:[#allocation40_spill] sm:$0xff] %v2610_v40  ;;  %4297 = vst [vmem:[#allocation41_spill] sm:$0xff] %v2613_v36 }
  0xc8   :  { %4298 = vst [vmem:[#allocation42_spill] sm:$0xff] %v2620_v39  ;;  %4299 = vst [vmem:[#allocation43_spill] sm:$0xff] %v2625_v3  ;;  %v2631_v4 = vsel %vm271_vm4, %v1558_v58, %v4209_v51  ;;  %v2637_v60 = vld [vmem:[#allocation2 + $0x10] sm:$0xf]  ;;  %v1795_v51 = vstv %s2105_s7  ;;  %s2789_s7 = sld [smem:[#allocation5]] }
  0xc9   :  { %4300 = vst [vmem:[#allocation44_spill] sm:$0xff] %v2631_v4  ;;  %719 = vrot.lane.b32.xlu1 %v2431_v18, %s4215_s26  ;;  %v2639_v11 = vld [vmem:[#allocation2 + $0x8] sm:$0xff]  ;;  %v2645_v58 = vld [vmem:[#allocation2] sm:$0xff]  ;;  %v2648_v28 = vmul.f32 %v1719_v43, %v2637_v60  ;;  %v2667_v35 = vmul.f32 %v1795_v51, %v2637_v60  ;;  %v2670_v33 = vmul.f32 %v1871_v42, %v2637_v60 }
  0xca   :  { %715 = vrot.lane.b32.xlu0 %v2433_v19, %s2235_s22  ;;  %v1721_v25 = vmul.f32 %v1719_v43, %v2639_v11  ;;  %v1797_v57 = vmul.f32 %v1795_v51, %v2639_v11  ;;  %v1873_v32 = vmul.f32 %v1871_v42, %v2639_v11  ;;  %v1720_v4 = vmul.f32 %v1719_v43, %v2645_v58  ;;  %4311 = sst [smem:[#allocation55_spill]] %s2787_s6  ;;  %s2801_s6 = sld [smem:[#allocation3 + $0x1f]] }
  0xcb   :  { %4301 = vst [vmem:[#allocation45_spill] sm:$0xff] %v2648_v28  ;;  %v4220_v50 = vrot.slane %v2648_v28, 1  ;;  %v1872_v39 = vmul.f32 %v1871_v42, %v2645_v58  ;;  %4303 = vst [vmem:[#allocation47_spill] sm:$0xff] %v2667_v35  ;;  %v4218_v42 = vrot.slane %v2670_v33, 3  ;;  %v2884_v28 = vstv %s2769_s27  ;;  %s2938_s27 = sld [smem:[#allocation3 + $0xa]] }
  0xcc   :  { %v1727_v56 = vrot.slane %v1721_v25, 1  ;;  %v1796_v25 = vmul.f32 %v1795_v51, %v2645_v58  ;;  %v1803_v3 = vrot.slane %v1797_v57, 2  ;;  %v1879_v63 = vrot.slane %v1873_v32, 3  ;;  %4304 = vst [vmem:[#allocation48_spill] sm:$0xff] %v2670_v33  ;;  %4313 = sst [smem:[#allocation57_spill]] %s2791_s8  ;;  %s2807_s8 = sld [smem:[#allocation3 + $0x29]] }
  0xcd   :  { %1026 = vrot.lane.b32.xlu1 %v2489_v5, %s2234_s1  ;;  %v1726_v36 = vrot.slane %v1720_v4, 1  ;;  %v1878_v59 = vrot.slane %v1872_v39, 3  ;;  %v4219_v39 = vrot.slane %v2667_v35, 2  ;;  %v2818_v4 = vstv %s2733_s13  ;;  %s2876_s13 = sld [smem:[#allocation3 + $0x2b]] }
  0xce   :  { %717 = vrot.lane.b32.xlu0 %v2429_v17, %s4215_s26  ;;  %v2662_v31 = vsel %vm117_vm2, %v1727_v56, %v4220_v50  ;;  %v1802_v40 = vrot.slane %v1796_v25, 2  ;;  %4312 = sst [smem:[#allocation56_spill]] %s2789_s7  ;;  %s2805_s7 = sld [smem:[#allocation3 + $0x25]]  ;;  %v2836_v25 = vstv %s2745_s17  ;;  %v2852_v33 = vstv %s2751_s20 }
  0xcf   :  { %4302 = vst [vmem:[#allocation46_spill] sm:$0xff] %v2662_v31  ;;  %v2677_v43 = vsel %vm117_vm2, %v1726_v36, %v1727_v56  ;;  %v2683_v57 = vsel %vm271_vm4, %v1878_v59, %v1879_v63  ;;  %v2690_v51 = vsel %vm194_vm3, %v1803_v3, %v4219_v39  ;;  %v2695_v36 = vsel %vm271_vm4, %v1879_v63, %v4218_v42  ;;  %s4318_s17 = sld [smem:[#allocation54_spill]]  ;;  %s2908_s20 = sld [smem:[#allocation3 + $0xd]] }
  0xd0   :  { %4305 = vst [vmem:[#allocation49_spill] sm:$0xff] %v2677_v43  ;;  %v2680_v32 = vsel %vm194_vm3, %v1802_v40, %v1803_v3  ;;  %4307 = vst [vmem:[#allocation51_spill] sm:$0xff] %v2683_v57  ;;  %v78_v63 = vstv %s2725_s9  ;;  %v403_v59 = vstv %s2727_s10  ;;  %v724_v40 = vstv %s2729_s11  ;;  %s2831_s9 = sld [smem:[#allocation3 + $0x2a]]  ;;  %s2844_s10 = sld [smem:[#allocation5 + $0x1]] }
  0xd1   :  { %1030 = vrot.lane.b32.xlu1 %v2491_v6, %s2234_s1  ;;  %4306 = vst [vmem:[#allocation50_spill] sm:$0xff] %v2680_v32  ;;  %4308 = vst [vmem:[#allocation52_spill] sm:$0xff] %v2690_v51  ;;  %v1045_v3 = vstv %s2731_s12  ;;  %v2827_v56 = vstv %s2743_s16  ;;  %v2839_v42 = vstv %s2747_s18  ;;  %s2846_s11 = sld [smem:[#allocation3 + $0x2e]]  ;;  %v2849_v50 = vmul.f32 %v78_v63, %v2301_v16  ;;  %s2862_s12 = sld [smem:[#allocation3 + $0x27]] }
  0xd2   :  { %721 = vrot.lane.b32.xlu0 %v2433_v19, %s4215_s26  ;;  %4309 = vst [vmem:[#allocation53_spill] sm:$0xff] %v2695_v36  ;;  %4317 = sst [smem:[#allocation60_spill]] %s2807_s8  ;;  %v2842_v39 = vstv %s2749_s19  ;;  %v2858_v36 = vstv %s2755_s2  ;;  %v2865_v57 = vmul.f32 %v78_v63, %v2313_v23  ;;  %v2868_v35 = vmul.f32 %v78_v63, %v2315_v24  ;;  %s2891_s16 = sld [smem:[#allocation3 + $0x5]] }
  0xd3   :  { %s2829_s8 = sld [smem:[#allocation3 + $0x26]]  ;;  %v2871_v16 = vstv %s2761_s21  ;;  %v2874_v51 = vstv %s2763_s23  ;;  %v2881_v32 = vstv %s2765_s24  ;;  %v2887_v43 = vstv %s2771_s28  ;;  %s4319_s18 = sld [smem:[#allocation56_spill]] }
  0xd4   :  { %v1366_v23 = vstv %s2767_s25  ;;  %v2895_v24 = vstv %s2773_s29  ;;  %v2898_v63 = vmul.f32 %v403_v59, %v2376_v53  ;;  %v2901_v31 = vmul.f32 %v403_v59, %v2378_v54  ;;  %s2906_s19 = sld [smem:[#allocation3 + $0x9]]  ;;  %s4323_s2 = sld [smem:[#allocation57_spill]] }
  0xd5   :  { %1032 = vrot.lane.b32.xlu1 %v2489_v5, %s2235_s22  ;;  %v2904_v61 = vmul.f32 %v403_v59, %v2374_v52  ;;  %v2917_v41 = vmul.f32 %v724_v40, %v2429_v17  ;;  %v2920_v53 = vmul.f32 %v724_v40, %v2431_v18  ;;  %s2922_s21 = sld [smem:[#allocation3 + $0x2]]  ;;  %s2924_s24 = sld [smem:[#allocation3 + $0x6]]  ;;  %v2927_v54 = vstv %s2783_s4 }
  0xd6   :  { %1028 = vrot.lane.b32.xlu0 %v2493_v7, %s2234_s1  ;;  %4326 = vst [vmem:[#allocation63_spill] sm:$0xff] %v2927_v54  ;;  %v2930_v59 = vstv %s4318_s17  ;;  %v2933_v17 = vmul.f32 %v724_v40, %v2433_v19  ;;  %v2936_v18 = vmul.f32 %v1045_v3, %v2489_v5  ;;  %s2940_s28 = sld [smem:[#allocation3 + $0xe]]  ;;  %s2945_s29 = sld [smem:[#allocation5 + $0x2]]  ;;  %v2948_v9 = vmul.f32 %v1045_v3, %v2491_v6 }
  0xd7   :  { %4320 = vst [vmem:[#allocation61_spill] sm:$0xff] %v2917_v41  ;;  %4322 = vst [vmem:[#allocation62_spill] sm:$0xff] %v2920_v53  ;;  %s4331_s30 = sld [smem:[#allocation60_spill]]  ;;  %v2951_v19 = vmul.f32 %v1045_v3, %v2493_v7  ;;  %s2967_s4 = sld [smem:[#allocation3 + $0x7]]  ;;  %v2976_v3 = vstv %s2803_s5  ;;  %v3017_v53 = vstv %s2876_s13 }
  0xd8   :  { %4327 = vst [vmem:[#allocation64_spill] sm:$0xff] %v2930_v59  ;;  %4328 = vst [vmem:[#allocation65_spill] sm:$0xff] %v2933_v17  ;;  %s2996_s5 = sld [smem:[#allocation3 + $0xb]]  ;;  %s4004_s17 = sld [smem:[#allocation3 + $0x22]] }
  0xd9   :  { %1036 = vrot.lane.b32.xlu1 %v2491_v6, %s2235_s22  ;;  %4329 = vst [vmem:[#allocation66_spill] sm:$0xff] %v2936_v18  ;;  %v2943_v15 = vstv %s4319_s18  ;;  %4330 = vst [vmem:[#allocation67_spill] sm:$0xff] %v2948_v9  ;;  %s3701_s18 = sld [smem:[#allocation3 + $0x15]] }
  0xda   :  { %1034 = vrot.lane.b32.xlu0 %v2493_v7, %s2235_s22  ;;  %4332 = vst [vmem:[#allocation68_spill] sm:$0xff] %v2951_v19  ;;  %v2959_v40 = vstv %s4323_s2  ;;  %4339 = vst [vmem:[#allocation75_spill] sm:$0xff] %v2976_v3  ;;  %v2982_v19 = vmul.f32 %v1366_v23, %v2555_v10  ;;  %s3738_s2 = sld [smem:[#allocation3 + $0x12]] }
  0xdb   :  { %4334 = vst [vmem:[#allocation70_spill] sm:$0xff] %v2959_v40  ;;  %4352 = vst [vmem:[#allocation88_spill] sm:$0xff] %v3017_v53  ;;  %v3044_v53 = vstv %s2938_s27  ;;  %s3767_s27 = sld [smem:[#allocation3 + $0x13]] }
  0xdc   :  { %4341 = vst [vmem:[#allocation77_spill] sm:$0xff] %v2982_v19  ;;  %v3008_v19 = vstv %s2846_s11  ;;  %4360 = vst [vmem:[#allocation96_spill] sm:$0xff] %v3044_v53  ;;  %v3048_v3 = vstv %s2945_s29  ;;  %s3783_s29 = sld [smem:[#allocation3 + $0x1a]]  ;;  %s3965_s11 = sld [smem:[#allocation5 + $0x1]] }
  0xdd   :  { %1038 = vrot.lane.b32.xlu1 %v2489_v5, %s4215_s26  ;;  %4349 = vst [vmem:[#allocation85_spill] sm:$0xff] %v3008_v19  ;;  %4361 = vst [vmem:[#allocation97_spill] sm:$0xff] %v3048_v3 }
  0xde   :  { %1040 = vrot.lane.b32.xlu0 %v2493_v7, %s4215_s26  ;;  %v2973_v7 = vstv %s2801_s6  ;;  %s3328_s6 = sld [smem:[#allocation3 + $0x11]] }
  0xdf   :  { %4338 = vst [vmem:[#allocation74_spill] sm:$0xff] %v2973_v7 }
  0xe1   :  { %1042 = vrot.lane.b32.xlu1 %v2491_v6, %s4215_s26  ;;  %v2970_v6 = vmul.f32 %v1366_v23, %v2551_v37 }
  0xe2   :  { %1347 = vrot.lane.b32.xlu0 %v2551_v37, %s2234_s1 }
  0xe3   :  { %4337 = vst [vmem:[#allocation73_spill] sm:$0xff] %v2970_v6  ;;  %v2988_v6 = vstv %s4331_s30 }
  0xe4   :  { %4343 = vst [vmem:[#allocation79_spill] sm:$0xff] %v2988_v6 }
  0xe5   :  { %1349 = vrot.lane.b32.xlu1 %v2553_v38, %s2234_s1 }
  0xe6   :  { %1351 = vrot.lane.b32.xlu0 %v2555_v10, %s2234_s1 }
  0xe9   :  { %1355 = vrot.lane.b32.xlu1 %v2553_v38, %s2235_s22 }
  0xea   :  { %1353 = vrot.lane.b32.xlu0 %v2551_v37, %s2235_s22 }
  0xed   :  { %1361 = vrot.lane.b32.xlu1 %v2553_v38, %s4215_s26 }
  0xee   :  { %1357 = vrot.lane.b32.xlu0 %v2555_v10, %s2235_s22 }
  0xf1   :  { %1668 = vrot.lane.b32.xlu1 %v2645_v58, %s2234_s1 }
  0xf2   :  { %1359 = vrot.lane.b32.xlu0 %v2551_v37, %s4215_s26  ;;  %v2985_v37 = vstv %s2805_s7  ;;  %s3911_s7 = sld [smem:[#allocation3 + $0x21]] }
  0xf3   :  { %4342 = vst [vmem:[#allocation78_spill] sm:$0xff] %v2985_v37  ;;  %v3041_v37 = vstv %s2924_s24  ;;  %s4140_s24 = sld [smem:[#allocation5 + $0x2]] }
  0xf4   :  { %4359 = vst [vmem:[#allocation95_spill] sm:$0xff] %v3041_v37 }
  0xf5   :  { %1672 = vrot.lane.b32.xlu1 %v2637_v60, %s2234_s1 }
  0xf6   :  { %1363 = vrot.lane.b32.xlu0 %v2555_v10, %s4215_s26  ;;  %s2793_s26 = sld [smem:[#allocation3 + $0x17]]  ;;  %v3002_v10 = vstv %s2829_s8  ;;  %s3913_s8 = sld [smem:[#allocation3 + $0x25]] }
  0xf7   :  { %4347 = vst [vmem:[#allocation83_spill] sm:$0xff] %v3002_v10  ;;  %v3027_v10 = vstv %s2891_s16 }
  0xf8   :  { %4355 = vst [vmem:[#allocation91_spill] sm:$0xff] %v3027_v10 }
  0xf9   :  { %1674 = vrot.lane.b32.xlu1 %v2645_v58, %s2235_s22 }
  0xfa   :  { %1670 = vrot.lane.b32.xlu0 %v2639_v11, %s2234_s1  ;;  %s2781_s1 = sld [smem:[#allocation3 + $0x16]] }
  0xfc   :  { %4314 = sst [smem:[#allocation58_spill]] %s2793_s26  ;;  %s2814_s26 = sld [smem:[#allocation3 + $0x22]] }
  0xfd   :  { %1678 = vrot.lane.b32.xlu1 %v2637_v60, %s2235_s22  ;;  %s4324_s23 = sld [smem:[#allocation58_spill]] }
  0xfe   :  { %1676 = vrot.lane.b32.xlu0 %v2639_v11, %s2235_s22  ;;  %s2795_s22 = sld [smem:[#allocation3 + $0x1b]] }
 0x100   :  { %v2914_v14 = vstv %s2781_s1  ;;  %s2953_s1 = sld [smem:[#allocation3 + $0x3]] }
 0x101   :  { %1680 = vrot.lane.b32.xlu1 %v2645_v58, %s4316_s3  ;;  %v2824_v58 = vstv %s2741_s15  ;;  %s2889_s15 = sld [smem:[#allocation3 + $0x1]] }
 0x102   :  { %1682 = vrot.lane.b32.xlu0 %v2639_v11, %s4316_s3  ;;  %v2821_v11 = vstv %s2735_s14  ;;  %s2878_s14 = sld [smem:[#allocation3 + $0x2f]]  ;;  %v2994_v0 = vstv %s2814_s26 }
 0x103   :  { %v2962_v18 = vstv %s4324_s23  ;;  %4345 = vst [vmem:[#allocation81_spill] sm:$0xff] %v2994_v0  ;;  %s3309_s26 = sld [smem:[#allocation3 + $0xf]] }
 0x104   :  { %4315 = sst [smem:[#allocation59_spill]] %s2795_s22  ;;  %4335 = vst [vmem:[#allocation71_spill] sm:$0xff] %v2962_v18  ;;  %s4106_s23 = sld [smem:[#allocation3 + $0x2f]] }
 0x105   :  { %s2812_s22 = sld [smem:[#allocation3 + $0x2d]]  ;;  %1684 = vrot.lane.b32.xlu1 %v2637_v60, %s4316_s3  ;;  %v2855_v60 = vstv %s2753_s0  ;;  %s2860_s3 = sld [smem:[#allocation3 + $0x23]] }
 0x106   :  { %s4321_s0 = sld [smem:[#allocation55_spill]]  ;;  %s4325_s25 = sld [smem:[#allocation59_spill]]  ;;  %v3054_v10 = vstv %s2953_s1 }
 0x107   :  { %v3024_v0 = vstv %s2889_s15  ;;  %4363 = vst [vmem:[#allocation99_spill] sm:$0xff] %v3054_v10 }
 0x108   :  { %v3020_v41 = vstv %s2878_s14  ;;  %4354 = vst [vmem:[#allocation90_spill] sm:$0xff] %v3024_v0  ;;  %v3051_v0 = vstv %s2940_s28  ;;  %s3779_s28 = sld [smem:[#allocation3 + $0x16]] }
 0x109   :  { %4353 = vst [vmem:[#allocation89_spill] sm:$0xff] %v3020_v41  ;;  %4362 = vst [vmem:[#allocation98_spill] sm:$0xff] %v3051_v0 }
 0x10b   :  { %v60_v52 = vpop.permute.xlu0 %59  ;;  %v2991_v17 = vstv %s2812_s22  ;;  %s4387_s22 = sld [smem:[#allocation102_spill]] }
 0x10c   :  { %v2956_v5 = vstv %s4321_s0  ;;  %v2965_v27 = vstv %s4325_s25  ;;  %4344 = vst [vmem:[#allocation80_spill] sm:$0xff] %v2991_v17  ;;  %v3014_v17 = vstv %s2862_s12  ;;  %v131_v37 = vmul.f32 %v2821_v11, %v60_v52  ;;  %s3714_s0 = sld [smem:[#allocation5]] }
 0x10d   :  { %4333 = vst [vmem:[#allocation69_spill] sm:$0xff] %v2956_v5  ;;  %4336 = vst [vmem:[#allocation72_spill] sm:$0xff] %v2965_v27  ;;  %v2979_v5 = vmul.f32 %v1366_v23, %v2553_v38  ;;  %v2999_v38 = vstv %s2844_s10  ;;  %v3005_v23 = vstv %s2831_s9  ;;  %v208_v53 = vmul.f32 %v2824_v58, %v60_v52  ;;  %s3926_s9 = sld [smem:[#allocation3 + $0x29]]  ;;  %s3928_s10 = sld [smem:[#allocation3 + $0x2d]] }
 0x10e   :  { %4346 = vst [vmem:[#allocation82_spill] sm:$0xff] %v2999_v38  ;;  %4348 = vst [vmem:[#allocation84_spill] sm:$0xff] %v3005_v23  ;;  %v3030_v23 = vstv %s2906_s19  ;;  %v285_v20 = vmul.f32 %v2827_v56, %v60_v52  ;;  %v137_v27 = vrot.slane %v131_v37, 1  ;;  %s3705_s19 = sld [smem:[#allocation3 + $0x19]] }
 0x10f   :  { %4340 = vst [vmem:[#allocation76_spill] sm:$0xff] %v2979_v5  ;;  %v62_v9 = vpop.permute.xlu1 %61  ;;  %v64_v2 = vpop.permute.xlu0 %63  ;;  %v3011_v5 = vstv %s2860_s3  ;;  %4351 = vst [vmem:[#allocation87_spill] sm:$0xff] %v3014_v17  ;;  %v3038_v17 = vstv %s2922_s21  ;;  %v214_v59 = vrot.slane %v208_v53, 2  ;;  %s4075_s21 = sld [smem:[#allocation3 + $0x2b]] }
 0x110   :  { %4350 = vst [vmem:[#allocation86_spill] sm:$0xff] %v3011_v5  ;;  %v88_v38 = vmul.f32 %v2818_v4, %v62_v9  ;;  %4356 = vst [vmem:[#allocation92_spill] sm:$0xff] %v3030_v23  ;;  %v3035_v5 = vstv %s2908_s20  ;;  %v87_v23 = vmul.f32 %v2818_v4, %v60_v52  ;;  %v132_v1 = vmul.f32 %v2821_v11, %v62_v9  ;;  %s3707_s20 = sld [smem:[#allocation3 + $0x1d]] }
 0x111   :  { %4357 = vst [vmem:[#allocation93_spill] sm:$0xff] %v3035_v5  ;;  %4358 = vst [vmem:[#allocation94_spill] sm:$0xff] %v3038_v17  ;;  %v209_v5 = vmul.f32 %v2824_v58, %v62_v9  ;;  %v3060_v17 = vstv %s2967_s4  ;;  %v286_v0 = vmul.f32 %v2827_v56, %v62_v9  ;;  %v89_v10 = vmul.f32 %v2818_v4, %v64_v2  ;;  %s3806_s4 = sld [smem:[#allocation3 + $0x1e]] }
 0x112   :  { %4364 = vst [vmem:[#allocation100_spill] sm:$0xff] %v3060_v17  ;;  %v91_v3 = vadd.f32 %v88_v38, %v2865_v57  ;;  %v3069_v22 = vmul.f32 %v2821_v11, %v64_v2  ;;  %v3076_v17 = vstv %s2996_s5  ;;  %v3079_v13 = vmul.f32 %v2824_v58, %v64_v2  ;;  %s3813_s5 = sld [smem:[#allocation3 + $0x17]] }
 0x113   :  { %v68_v19 = vpop.permute.xlu1 %67  ;;  %v3032_v6 = vpop.permute.xlu0 %65  ;;  %4365 = vst [vmem:[#allocation101_spill] sm:$0xff] %v3076_v17  ;;  %v3082_v52 = vmul.f32 %v2827_v56, %v64_v2  ;;  %v90_v4 = vadd.f32 %v87_v23, %v2849_v50  ;;  %v138_v11 = vrot.slane %v132_v1, 1  ;;  %v215_v38 = vrot.slane %v209_v5, 2 }
 0x114   :  { %v96_v41 = vmul.f32 %v2836_v25, %v68_v19  ;;  %v95_v21 = vmul.f32 %v2836_v25, %v3032_v6  ;;  %v291_v17 = vrot.slane %v285_v20, 3  ;;  %v292_v58 = vrot.slane %v286_v0, 3 }
 0x115   :  { %v92_v12 = vadd.f32 %v89_v10, %v2868_v35  ;;  %v151_v2 = vmul.f32 %v2839_v42, %v68_v19  ;;  %v140_v50 = vrot.slane %v3069_v22, 1  ;;  %v4261_v1 = vrot.slane %v3079_v13, 2 }
 0x116   :  { %v99_v57 = vadd.f32 %v96_v41, %v91_v3  ;;  %v150_v41 = vmul.f32 %v2839_v42, %v3032_v6  ;;  %v4263_v5 = vrot.slane %v3082_v52, 3  ;;  %v139_v20 = vsel %vm117_vm2, %v137_v27, %v138_v11 }
 0x117   :  { %v3071_v7 = vpop.permute.xlu1 %73  ;;  %v3073_v62 = vpop.permute.xlu0 %69  ;;  %v216_v0 = vsel %vm194_vm3, %v214_v59, %v215_v38  ;;  %v98_v53 = vadd.f32 %v95_v21, %v90_v4  ;;  %v3101_v37 = vmul.f32 %v2842_v39, %v68_v19  ;;  %v3104_v10 = vmul.f32 %v2852_v33, %v68_v19 }
 0x118   :  { %v104_v9 = vmul.f32 %v2855_v60, %v3071_v7  ;;  %v152_v22 = vmul.f32 %v2839_v42, %v3073_v62  ;;  %v3112_v21 = vsel %vm271_vm4, %v291_v17, %v292_v58  ;;  %v141_v59 = vsel %vm117_vm2, %v138_v11, %v140_v50 }
 0x119   :  { %v170_v19 = vmul.f32 %v2858_v36, %v3071_v7  ;;  %v218_v4 = vsel %vm194_vm3, %v215_v38, %v4261_v1  ;;  %v304_v17 = vmul.f32 %v2852_v33, %v3032_v6 }
 0x11a   :  { %v107_v55 = vadd.f32 %v104_v9, %v99_v57  ;;  %v157_v57 = vrot.slane %v151_v2, 1  ;;  %v97_v9 = vmul.f32 %v2836_v25, %v3073_v62  ;;  %v3127_v2 = vsel %vm271_vm4, %v292_v58, %v4263_v5 }
 0x11b   :  { %v72_v56 = vpop.permute.xlu0 %71  ;;  %v3119_v42 = vpop.permute.xlu1 %384  ;;  %v311_v25 = vrot.slane %v3104_v10, 3  ;;  %v176_v40 = vrot.slane %v170_v19, 1 }
 0x11c   :  { %v127_v3 = vadd.f32 %v2347_v44, %v107_v55  ;;  %v103_v35 = vmul.f32 %v2855_v60, %v72_v56  ;;  %v169_v23 = vmul.f32 %v2858_v36, %v72_v56  ;;  %v156_v44 = vrot.slane %v150_v41, 1 }
 0x11d   :  { %v227_v55 = vmul.f32 %v2842_v39, %v3032_v6  ;;  %v100_v58 = vadd.f32 %v97_v9, %v92_v12 }
 0x11e   :  { %v106_v27 = vadd.f32 %v103_v35, %v98_v53  ;;  %v234_v53 = vrot.slane %v3101_v37, 2  ;;  %v159_v35 = vrot.slane %v152_v22, 1  ;;  %v175_v54 = vrot.slane %v169_v23, 1 }
 0x11f   :  { %v76_v41 = vpop.permute.xlu0 %75  ;;  %v158_v18 = vsel %vm117_vm2, %v156_v44, %v157_v57  ;;  %v233_v38 = vrot.slane %v227_v55, 2  ;;  %v146_v1 = vadd.f32 %v141_v59, %v127_v3  ;;  %v3141_v37 = vmul.f32 %v2842_v39, %v3073_v62  ;;  %v389_v44 = vpop.permute.xlu1 %388 }
 0x120   :  { %v126_v11 = vadd.f32 %v2350_v45, %v106_v27  ;;  %v105_v5 = vmul.f32 %v2855_v60, %v76_v41  ;;  %v171_v6 = vmul.f32 %v2858_v36, %v76_v41  ;;  %v247_v45 = vmul.f32 %v2871_v16, %v3071_v7 }
 0x121   :  { %v246_v22 = vmul.f32 %v2871_v16, %v72_v56  ;;  %v160_v23 = vsel %vm117_vm2, %v157_v57, %v159_v35  ;;  %v177_v3 = vsel %vm117_vm2, %v175_v54, %v176_v40  ;;  %v3148_v36 = vmul.f32 %v2874_v51, %v3071_v7 }
 0x122   :  { %v145_v8 = vadd.f32 %v139_v20, %v126_v11  ;;  %v108_v20 = vadd.f32 %v105_v5, %v100_v58  ;;  %v178_v12 = vrot.slane %v171_v6, 1  ;;  %v165_v60 = vadd.f32 %v160_v23, %v146_v1 }
 0x123   :  { %v3152_v55 = vmul.f32 %v2852_v33, %v3073_v62  ;;  %v248_v5 = vmul.f32 %v2871_v16, %v76_v41  ;;  %v310_v27 = vrot.slane %v304_v17, 3  ;;  %v236_v59 = vrot.slane %v3141_v37, 2 }
 0x124   :  { %v164_v10 = vadd.f32 %v158_v18, %v145_v8  ;;  %v323_v8 = vmul.f32 %v2874_v51, %v72_v56  ;;  %v4366_v18 = vrot.slane %v2325_v26, 1  ;;  %v179_v54 = vsel %vm117_vm2, %v176_v40, %v178_v12 }
 0x125   :  { %v184_v1 = vadd.f32 %v179_v54, %v165_v60  ;;  %v235_v19 = vsel %vm194_vm3, %v233_v38, %v234_v53  ;;  %v253_v62 = vrot.slane %v247_v45, 2  ;;  %v252_v33 = vrot.slane %v246_v22, 2 }
 0x126   :  { %v183_v39 = vadd.f32 %v177_v3, %v164_v10  ;;  %v128_v57 = vadd.f32 %v4366_v18, %v108_v20  ;;  %v330_v56 = vrot.slane %v3148_v36, 3  ;;  %v313_v26 = vrot.slane %v3152_v55, 3  ;;  %v387_v10 = vpop.permute.xlu0 %386 }
 0x127   :  { %v204_v40 = vadd.f32 %v2361_v48, %v184_v1  ;;  %v329_v58 = vrot.slane %v323_v8, 3  ;;  %v412_v16 = vmul.f32 %v2881_v32, %v3119_v42  ;;  %v255_v6 = vrot.slane %v248_v5, 2 }
 0x128   :  { %v203_v7 = vadd.f32 %v2353_v46, %v183_v39  ;;  %v147_v9 = vadd.f32 %v140_v50, %v128_v57  ;;  %v3167_v46 = vpop.permute.xlu1 %390  ;;  %v237_v38 = vsel %vm194_vm3, %v234_v53, %v236_v59  ;;  %v455_v50 = vmul.f32 %v2884_v28, %v3119_v42 }
 0x129   :  { %v223_v37 = vadd.f32 %v218_v4, %v204_v40  ;;  %v3175_v48 = vmul.f32 %v2887_v43, %v3119_v42  ;;  %v312_v23 = vsel %vm271_vm4, %v310_v27, %v311_v25  ;;  %v314_v53 = vsel %vm271_vm4, %v311_v25, %v313_v26 }
 0x12a   :  { %v222_v11 = vadd.f32 %v216_v0, %v203_v7  ;;  %v166_v17 = vadd.f32 %v159_v35, %v147_v9  ;;  %v254_v0 = vsel %vm194_vm3, %v252_v33, %v253_v62  ;;  %v3178_v35 = vmul.f32 %v2874_v51, %v76_v41  ;;  %v3207_v1 = vpop.permute.xlu0 %392 }
 0x12b   :  { %v242_v20 = vadd.f32 %v237_v38, %v223_v37  ;;  %v331_v4 = vsel %vm271_vm4, %v329_v58, %v330_v56  ;;  %v3187_v36 = vmul.f32 %v2895_v24, %v3119_v42  ;;  %v4367_v60 = vrot.slane %v2331_v30, 2 }
 0x12c   :  { %v241_v45 = vadd.f32 %v235_v19, %v222_v11  ;;  %v185_v22 = vadd.f32 %v178_v12, %v166_v17  ;;  %v256_v51 = vsel %vm194_vm3, %v253_v62, %v255_v6  ;;  %v415_v39 = vadd.f32 %v412_v16, %v2898_v63  ;;  %v3199_v27 = vpop.permute.xlu1 %394 }
 0x12d   :  { %v461_v8 = vrot.slane %v455_v50, 1  ;;  %v261_v18 = vadd.f32 %v256_v51, %v242_v20  ;;  %v537_v25 = vrot.slane %v3175_v48, 2  ;;  %v4368_v57 = vrot.slane %v3079_v13, 2 }
 0x12e   :  { %v260_v3 = vadd.f32 %v254_v0, %v241_v45  ;;  %v205_v12 = vadd.f32 %v4367_v60, %v185_v22  ;;  %v332_v5 = vrot.slane %v3178_v35, 3  ;;  %v456_v42 = vmul.f32 %v2884_v28, %v387_v10  ;;  %v4371_v60 = vld [vmem:[#allocation70_spill] sm:$0xff] }
 0x12f   :  { %v281_v7 = vadd.f32 %v2366_v49, %v261_v18  ;;  %v3205_v63 = vmul.f32 %v2884_v28, %v389_v44  ;;  %v613_v13 = vrot.slane %v3187_v36, 3  ;;  %v3211_v62 = vmul.f32 %v2887_v43, %v389_v44 }
 0x130   :  { %v280_v41 = vadd.f32 %v2356_v47, %v260_v3  ;;  %v224_v54 = vadd.f32 %v4368_v57, %v205_v12  ;;  %v414_v47 = vmul.f32 %v2881_v32, %v389_v44  ;;  %v3214_v33 = vmul.f32 %v2895_v24, %v389_v44 }
 0x131   :  { %v413_v49 = vmul.f32 %v2881_v32, %v387_v10  ;;  %v532_v11 = vmul.f32 %v2887_v43, %v387_v10  ;;  %v333_v40 = vsel %vm271_vm4, %v330_v56, %v332_v5  ;;  %v462_v58 = vrot.slane %v456_v42, 1 }
 0x132   :  { %v299_v30 = vadd.f32 %v3112_v21, %v280_v41  ;;  %v243_v19 = vadd.f32 %v236_v59, %v224_v54  ;;  %v300_v21 = vadd.f32 %v3127_v2, %v281_v7  ;;  %v3221_v16 = vmul.f32 %v2895_v24, %v387_v10  ;;  %v3235_v10 = vpop.permute.xlu0 %398 }
 0x133   :  { %v417_v38 = vadd.f32 %v414_v47, %v2901_v31  ;;  %v464_v44 = vrot.slane %v3205_v63, 1  ;;  %v4369_v45 = vrot.slane %v2335_v34, 3  ;;  %v540_v32 = vrot.slane %v3211_v62, 2  ;;  %v4372_v47 = vld [vmem:[#allocation12_spill] sm:$0xff] }
 0x134   :  { %v318_v9 = vadd.f32 %v312_v23, %v299_v30  ;;  %v262_v28 = vadd.f32 %v255_v6, %v243_v19  ;;  %v319_v17 = vadd.f32 %v314_v53, %v300_v21  ;;  %v616_v43 = vrot.slane %v3214_v33, 3  ;;  %v3231_v6 = vpop.permute.xlu1 %396 }
 0x135   :  { %v421_v56 = vmul.f32 %v2911_v29, %v3207_v1  ;;  %v416_v37 = vadd.f32 %v413_v49, %v2904_v61  ;;  %v538_v31 = vrot.slane %v532_v11, 2  ;;  %v4370_v34 = vrot.slane %v3082_v52, 3 }
 0x136   :  { %v337_v59 = vadd.f32 %v331_v4, %v318_v9  ;;  %v282_v2 = vadd.f32 %v4369_v45, %v262_v28  ;;  %v338_v24 = vadd.f32 %v333_v40, %v319_v17  ;;  %v463_v48 = vsel %vm117_vm2, %v461_v8, %v462_v58  ;;  %v4375_v17 = vld [vmem:[#allocation13_spill] sm:$0xff] }
 0x137   :  { %v614_v22 = vrot.slane %v3221_v16, 3  ;;  %v420_v35 = vmul.f32 %v2911_v29, %v3167_v46  ;;  %v475_v3 = vmul.f32 %v2914_v14, %v3207_v1  ;;  %v476_v61 = vmul.f32 %v2914_v14, %v3199_v27 }
 0x138   :  { %v342_v50 = vadd.f32 %v2943_v15, %v337_v59  ;;  %v301_v0 = vadd.f32 %v4370_v34, %v282_v2  ;;  %v343_v23 = vadd.f32 %v2943_v15, %v338_v24  ;;  %v465_v20 = vsel %vm117_vm2, %v462_v58, %v464_v44  ;;  %v3262_v54 = vpop.permute.xlu1 %400  ;;  %v4376_v34 = vld [vmem:[#allocation9_spill] sm:$0xff] }
 0x139   :  { %v424_v4 = vadd.f32 %v421_v56, %v416_v37  ;;  %v429_v12 = vmul.f32 %v4371_v60, %v3235_v10  ;;  %v3256_v41 = vsel %vm194_vm3, %v537_v25, %v538_v31  ;;  %v422_v8 = vmul.f32 %v2911_v29, %v3199_v27  ;;  %v4373_v29 = vld [vmem:[#allocation71_spill] sm:$0xff] }
 0x13a   :  { %v1994_v53 = vmul.f32 -1.442695, %v342_v50  ;;  %v320_v52 = vadd.f32 %v313_v26, %v301_v0  ;;  %v1995_v51 = vmul.f32 -1.442695, %v343_v23  ;;  %v423_v57 = vadd.f32 %v420_v35, %v415_v39 }
 0x13b   :  { %v474_v55 = vmul.f32 %v2914_v14, %v3167_v46  ;;  %v432_v26 = vadd.f32 %v429_v12, %v424_v4  ;;  %v481_v42 = vrot.slane %v475_v3, 1  ;;  %v483_v30 = vrot.slane %v476_v61, 1  ;;  %v4378_v3 = vld [vmem:[#allocation64_spill] sm:$0xff] }
 0x13c   :  { %2127 = vpow2.f32 %v1994_v53  ;;  %v339_v18 = vadd.f32 %v332_v5, %v320_v52  ;;  %v428_v7 = vmul.f32 %v4371_v60, %v3231_v6  ;;  %v494_v5 = vmul.f32 %v4373_v29, %v3235_v10 }
 0x13d   :  { %2129 = vpow2.f32 %v1995_v51  ;;  %v451_v19 = vadd.f32 %v4372_v47, %v432_v26  ;;  %v493_v39 = vmul.f32 %v4373_v29, %v3231_v6  ;;  %v541_v14 = vsel %vm194_vm3, %v538_v31, %v540_v32  ;;  %v3304_v26 = vpop.permute.xlu0 %705 }
 0x13e   :  { %v344_v25 = vadd.f32 %v2943_v15, %v339_v18  ;;  %v425_v9 = vadd.f32 %v422_v8, %v417_v38  ;;  %v431_v21 = vadd.f32 %v428_v7, %v423_v57  ;;  %v430_v49 = vmul.f32 %v4371_v60, %v3262_v54  ;;  %v4374_v15 = vld [vmem:[#allocation63_spill] sm:$0xff] }
 0x13f   :  { %v480_v28 = vrot.slane %v474_v55, 1  ;;  %v551_v40 = vmul.f32 %v4374_v15, %v3207_v1  ;;  %v470_v58 = vadd.f32 %v465_v20, %v451_v19  ;;  %v484_v59 = vsel %vm117_vm2, %v481_v42, %v483_v30  ;;  %v4379_v20 = vld [vmem:[#allocation72_spill] sm:$0xff] }
 0x140   :  { %v1996_v11 = vmul.f32 -1.442695, %v344_v25  ;;  %v450_v45 = vadd.f32 %v4375_v17, %v431_v21  ;;  %v433_v2 = vadd.f32 %v430_v49, %v425_v9  ;;  %v495_v56 = vmul.f32 %v4373_v29, %v3262_v54  ;;  %v4380_v29 = vld [vmem:[#allocation16_spill] sm:$0xff]  ;;  %v4381_v9 = vld [vmem:[#allocation14_spill] sm:$0xff] }
 0x141   :  { %v500_v38 = vrot.slane %v494_v5, 1  ;;  %v499_v24 = vrot.slane %v493_v39, 1  ;;  %v489_v50 = vadd.f32 %v484_v59, %v470_v58  ;;  %v552_v37 = vmul.f32 %v4374_v15, %v3199_v27  ;;  %v4382_v59 = vld [vmem:[#allocation10_spill] sm:$0xff] }
 0x142   :  { %2131 = vpow2.f32 %v1996_v11  ;;  %v469_v31 = vadd.f32 %v463_v48, %v450_v45  ;;  %v4377_v0 = vrot.slane %v4376_v34, 1  ;;  %v502_v23 = vrot.slane %v495_v56, 1 }
 0x143   :  { %v550_v53 = vmul.f32 %v4374_v15, %v3167_v46  ;;  %v3291_v61 = vmul.f32 %v4378_v3, %v3167_v46  ;;  %v482_v52 = vsel %vm117_vm2, %v480_v28, %v481_v42  ;;  %v570_v4 = vmul.f32 %v4379_v20, %v3235_v10 }
 0x144   :  { %v452_v35 = vadd.f32 %v4377_v0, %v433_v2  ;;  %v488_v12 = vadd.f32 %v482_v52, %v469_v31  ;;  %v503_v51 = vsel %vm117_vm2, %v500_v38, %v502_v23  ;;  %v571_v8 = vmul.f32 %v4379_v20, %v3262_v54  ;;  %v3318_v2 = vpop.permute.xlu1 %707  ;;  %v3323_v31 = vpop.permute.xlu0 %709 }
 0x145   :  { %v501_v57 = vsel %vm117_vm2, %v499_v24, %v500_v38  ;;  %v569_v46 = vmul.f32 %v4379_v20, %v3231_v6  ;;  %v508_v55 = vadd.f32 %v503_v51, %v489_v50  ;;  %v557_v7 = vrot.slane %v551_v40, 2 }
 0x146   :  { %v2128_v60 = vpop.eup %2127  ;;  %v471_v48 = vadd.f32 %v464_v44, %v452_v35  ;;  %v559_v25 = vrot.slane %v552_v37, 2  ;;  %v507_v47 = vadd.f32 %v501_v57, %v488_v12  ;;  %v627_v19 = vmul.f32 %v4378_v3, %v3207_v1  ;;  %v4384_v37 = vld [vmem:[#allocation74_spill] sm:$0xff] }
 0x147   :  { %v354_v18 = vadd.f32 1.0, %v2128_v60  ;;  %v2130_v42 = vpop.eup %2129  ;;  %v527_v5 = vadd.f32 %v4380_v29, %v508_v55  ;;  %v556_v39 = vrot.slane %v550_v53, 2  ;;  %v578_v11 = vrot.slane %v571_v8, 2  ;;  %v4386_v12 = vld [vmem:[#allocation15_spill] sm:$0xff] }
 0x148   :  { %v490_v63 = vadd.f32 %v483_v30, %v471_v48  ;;  %v355_v44 = vadd.f32 1.0, %v2130_v42  ;;  %v526_v21 = vadd.f32 %v4381_v9, %v507_v47  ;;  %v576_v28 = vrot.slane %v570_v4, 2  ;;  %v3354_v55 = vpop.permute.xlu0 %711  ;;  %v4388_v42 = vld [vmem:[#allocation11_spill] sm:$0xff]  ;;  %v4390_v47 = vld [vmem:[#allocation75_spill] sm:$0xff] }
 0x149   :  { %2133 = vrcp.f32 %v354_v18  ;;  %v575_v15 = vrot.slane %v569_v46, 2  ;;  %v546_v40 = vadd.f32 %v541_v14, %v527_v5  ;;  %v560_v30 = vsel %vm194_vm3, %v557_v7, %v559_v25  ;;  %v3351_v18 = vpop.permute.xlu1 %713  ;;  %v4391_v29 = vld [vmem:[#allocation78_spill] sm:$0xff] }
 0x14a   :  { %v509_v49 = vadd.f32 %v502_v23, %v490_v63  ;;  %2135 = vrcp.f32 %v355_v44  ;;  %v628_v58 = vmul.f32 %v4378_v3, %v3199_v27  ;;  %v545_v1 = vadd.f32 %v3256_v41, %v526_v21 }
 0x14b   :  { %v4383_v17 = vrot.slane %v4382_v59, 2  ;;  %v558_v38 = vsel %vm194_vm3, %v556_v39, %v557_v7  ;;  %v633_v24 = vrot.slane %v627_v19, 3  ;;  %v565_v50 = vadd.f32 %v560_v30, %v546_v40  ;;  %v4392_v39 = vld [vmem:[#allocation79_spill] sm:$0xff] }
 0x14c   :  { %v2132_v56 = vpop.eup %2131  ;;  %v647_v14 = vmul.f32 %v4384_v37, %v3262_v54  ;;  %v564_v0 = vadd.f32 %v558_v38, %v545_v1  ;;  %v579_v41 = vsel %vm194_vm3, %v576_v28, %v578_v11  ;;  %v646_v35 = vmul.f32 %v4384_v37, %v3235_v10  ;;  %v4385_v10 = vld [vmem:[#allocation17_spill] sm:$0xff]  ;;  %v4393_v1 = vld [vmem:[#allocation81_spill] sm:$0xff] }
 0x14d   :  { %v528_v45 = vadd.f32 %v4383_v17, %v509_v49  ;;  %v356_v34 = vadd.f32 1.0, %v2132_v56  ;;  %v577_v23 = vsel %vm194_vm3, %v575_v15, %v576_v28  ;;  %v645_v54 = vmul.f32 %v4384_v37, %v3231_v6  ;;  %v4394_v56 = vld [vmem:[#allocation61_spill] sm:$0xff] }
 0x14e   :  { %v584_v53 = vadd.f32 %v579_v41, %v565_v50  ;;  %v635_v3 = vrot.slane %v628_v58, 3  ;;  %v583_v52 = vadd.f32 %v577_v23, %v564_v0  ;;  %v632_v20 = vrot.slane %v3291_v61, 3 }
 0x14f   :  { %v547_v27 = vadd.f32 %v540_v32, %v528_v45  ;;  %2137 = vrcp.f32 %v356_v34  ;;  %v615_v32 = vsel %vm271_vm4, %v613_v13, %v614_v22  ;;  %v3343_v60 = vstv %s3309_s26  ;;  %v4396_v34 = vld [vmem:[#allocation62_spill] sm:$0xff]  ;;  %s3858_s26 = sld [smem:[#allocation3 + $0x1b]] }
 0x150   :  { %v603_v4 = vadd.f32 %v4385_v10, %v584_v53  ;;  %v617_v6 = vsel %vm271_vm4, %v614_v22, %v616_v43  ;;  %v602_v48 = vadd.f32 %v4386_v12, %v583_v52  ;;  %v654_v8 = vrot.slane %v647_v14, 3 }
 0x151   :  { %v566_v62 = vadd.f32 %v559_v25, %v547_v27  ;;  %v634_v13 = vsel %vm271_vm4, %v632_v20, %v633_v24  ;;  %v652_v61 = vrot.slane %v646_v35, 3  ;;  %v651_v57 = vrot.slane %v645_v54, 3  ;;  %v3393_v27 = vpop.permute.xlu0 %715  ;;  %v4397_v54 = vld [vmem:[#allocation80_spill] sm:$0xff]  ;;  %v4398_v20 = vld [vmem:[#allocation86_spill] sm:$0xff] }
 0x152   :  { %v622_v46 = vadd.f32 %v617_v6, %v603_v4  ;;  %v636_v16 = vsel %vm271_vm4, %v633_v24, %v635_v3  ;;  %v621_v22 = vadd.f32 %v615_v32, %v602_v48  ;;  %v4389_v7 = vrot.slane %v4388_v42, 3  ;;  %v4395_v24 = vld [vmem:[#allocation82_spill] sm:$0xff] }
 0x153   :  { %v585_v51 = vadd.f32 %v578_v11, %v566_v62  ;;  %v2134_v36 = vpop.eup %2133  ;;  %v733_v63 = vmul.f32 %v4390_v47, %v3304_v26  ;;  %v776_v5 = vmul.f32 %v4391_v29, %v3304_v26  ;;  %v852_v9 = vmul.f32 %v4392_v39, %v3304_v26 }
 0x154   :  { %364 = vst.msk [vmem:[%s4387_s22] sm:$0xff] %vm363_vm5, %v2134_v36  ;;  %v2136_v44 = vpop.eup %2135  ;;  %v641_v19 = vadd.f32 %v636_v16, %v622_v46  ;;  %v734_v21 = vmul.f32 %v4390_v47, %v3318_v2  ;;  %v640_v49 = vadd.f32 %v634_v13, %v621_v22  ;;  %v655_v28 = vsel %vm271_vm4, %v652_v61, %v654_v8  ;;  %v4400_v22 = vld [vmem:[#allocation21_spill] sm:$0xff] }
 0x155   :  { %v604_v25 = vadd.f32 %v4389_v7, %v585_v51  ;;  %365 = vst.msk [vmem:[%s4387_s22 + $0x8] sm:$0xff] %vm363_vm5, %v2136_v44  ;;  %v3379_v15 = vstv %s3328_s6  ;;  %v653_v40 = vsel %vm271_vm4, %v651_v57, %v652_v61  ;;  %v777_v58 = vmul.f32 %v4391_v29, %v3318_v2  ;;  %v4399_v57 = vld [vmem:[#allocation83_spill] sm:$0xff]  ;;  %v3426_v7 = vpop.permute.xlu0 %717  ;;  %s3883_s6 = sld [smem:[#allocation3 + $0x1f]] }
 0x156   :  { %v660_v30 = vadd.f32 %v655_v28, %v641_v19  ;;  %v742_v59 = vmul.f32 %v4393_v1, %v3351_v18  ;;  %v659_v17 = vadd.f32 %v653_v40, %v640_v49  ;;  %v736_v38 = vadd.f32 %v733_v63, %v4394_v56  ;;  %v4402_v40 = vld [vmem:[#allocation87_spill] sm:$0xff] }
 0x157   :  { %v623_v11 = vadd.f32 %v616_v43, %v604_v25  ;;  %v853_v33 = vmul.f32 %v4392_v39, %v3318_v2  ;;  %v3389_v43 = vpop.permute.xlu1 %719  ;;  %v782_v37 = vrot.slane %v776_v5, 1  ;;  %v858_v14 = vrot.slane %v852_v9, 2 }
 0x158   :  { %v665_v50 = vadd.f32 %v4395_v24, %v660_v30  ;;  %v737_v0 = vadd.f32 %v734_v21, %v4396_v34  ;;  %v664_v23 = vadd.f32 %v4395_v24, %v659_v17  ;;  %v928_v53 = vmul.f32 %v4397_v54, %v3304_v26  ;;  %v4403_v17 = vld [vmem:[#allocation65_spill] sm:$0xff] }
 0x159   :  { %v642_v45 = vadd.f32 %v635_v3, %v623_v11  ;;  %v2138_v41 = vpop.eup %2137  ;;  %v929_v3 = vmul.f32 %v4397_v54, %v3318_v2  ;;  %v783_v62 = vrot.slane %v777_v58, 1  ;;  %v750_v10 = vmul.f32 %v4398_v20, %v3389_v43  ;;  %v3474_v34 = vpop.permute.xlu0 %721 }
 0x15a   :  { %367 = vst.msk [vmem:[%s4387_s22 + $0x10] sm:$0x1] %vm366_vm6, %v2138_v41  ;;  %v2017_v52 = vmul.f32 -1.442695, %v665_v50  ;;  %v745_v32 = vadd.f32 %v742_v59, %v737_v0  ;;  %v2016_v6 = vmul.f32 -1.442695, %v664_v23  ;;  %v3409_v26 = vmul.f32 %v4391_v29, %v3323_v31 }
 0x15b   :  { %v661_v35 = vadd.f32 %v654_v8, %v642_v45  ;;  %v859_v12 = vrot.slane %v853_v33, 2  ;;  %v3413_v2 = vmul.f32 %v4392_v39, %v3323_v31  ;;  %v3417_v48 = vmul.f32 %v4397_v54, %v3323_v31  ;;  %v4401_v39 = vld [vmem:[#allocation84_spill] sm:$0xff] }
 0x15c   :  { %2139 = vpow2.f32 %v2017_v52  ;;  %v753_v51 = vadd.f32 %v750_v10, %v745_v32  ;;  %v934_v36 = vrot.slane %v928_v53, 3  ;;  %v741_v13 = vmul.f32 %v4393_v1, %v3354_v55  ;;  %v3481_v32 = vpop.permute.xlu1 %1026 }
 0x15d   :  { %v666_v4 = vadd.f32 %v4395_v24, %v661_v35  ;;  %2141 = vpow2.f32 %v2016_v6  ;;  %v935_v61 = vrot.slane %v929_v3, 3  ;;  %v796_v46 = vmul.f32 %v4399_v57, %v3351_v18  ;;  %v4405_v35 = vld [vmem:[#allocation22_spill] sm:$0xff] }
 0x15e   :  { %v795_v16 = vmul.f32 %v4399_v57, %v3354_v55  ;;  %v772_v42 = vadd.f32 %v4400_v22, %v753_v51  ;;  %v784_v25 = vsel %vm117_vm2, %v782_v37, %v783_v62  ;;  %v3430_v63 = vsel %vm194_vm3, %v858_v14, %v859_v12  ;;  %v4404_v37 = vld [vmem:[#allocation85_spill] sm:$0xff] }
 0x15f   :  { %v2018_v8 = vmul.f32 -1.442695, %v666_v4  ;;  %v735_v44 = vmul.f32 %v4390_v47, %v3323_v31  ;;  %v785_v19 = vrot.slane %v3409_v26, 1  ;;  %v861_v29 = vrot.slane %v3413_v2, 2 }
 0x160   :  { %v937_v5 = vrot.slane %v3417_v48, 3  ;;  %v3439_v9 = vmul.f32 %v4401_v39, %v3351_v18  ;;  %v744_v21 = vadd.f32 %v741_v13, %v736_v38  ;;  %v3443_v49 = vmul.f32 %v4401_v39, %v3354_v55 }
 0x161   :  { %2143 = vpow2.f32 %v2018_v8  ;;  %v3447_v11 = vmul.f32 %v4399_v57, %v3393_v27  ;;  %v749_v31 = vmul.f32 %v4398_v20, %v3426_v7  ;;  %v802_v47 = vrot.slane %v796_v46, 1  ;;  %v4406_v8 = vld [vmem:[#allocation88_spill] sm:$0xff] }
 0x162   :  { %v801_v28 = vrot.slane %v795_v16, 1  ;;  %v815_v30 = vmul.f32 %v4402_v40, %v3389_v43  ;;  %v814_v58 = vmul.f32 %v4402_v40, %v3426_v7  ;;  %v3456_v59 = vsel %vm271_vm4, %v934_v36, %v935_v61 }
 0x163   :  { %v738_v45 = vadd.f32 %v735_v44, %v4403_v17  ;;  %v743_v56 = vmul.f32 %v4393_v1, %v3393_v27  ;;  %v752_v38 = vadd.f32 %v749_v31, %v744_v21  ;;  %v786_v33 = vsel %vm117_vm2, %v783_v62, %v785_v19 }
 0x164   :  { %v862_v24 = vsel %vm194_vm3, %v859_v12, %v861_v29  ;;  %v3468_v50 = vsel %vm271_vm4, %v935_v61, %v937_v5  ;;  %v3472_v14 = vmul.f32 %v4404_v37, %v3351_v18  ;;  %v878_v1 = vrot.slane %v3439_v9, 2  ;;  %v4407_v9 = vld [vmem:[#allocation18_spill] sm:$0xff] }
 0x165   :  { %v877_v0 = vrot.slane %v3443_v49, 2  ;;  %v804_v41 = vrot.slane %v3447_v11, 1  ;;  %v771_v23 = vadd.f32 %v4405_v35, %v752_v38  ;;  %v803_v53 = vsel %vm117_vm2, %v801_v28, %v802_v47  ;;  %v3504_v28 = vpop.permute.xlu1 %1030 }
 0x166   :  { %v2140_v54 = vpop.eup %2139  ;;  %v791_v3 = vadd.f32 %v786_v33, %v772_v42  ;;  %v821_v52 = vrot.slane %v815_v30, 1  ;;  %v820_v62 = vrot.slane %v814_v58, 1  ;;  %v746_v4 = vadd.f32 %v743_v56, %v738_v45  ;;  %v4410_v33 = vld [vmem:[#allocation89_spill] sm:$0xff] }
 0x167   :  { %v2142_v18 = vpop.eup %2141  ;;  %v677_v10 = vadd.f32 1.0, %v2140_v54  ;;  %v790_v6 = vadd.f32 %v784_v25, %v771_v23  ;;  %v751_v12 = vmul.f32 %v4398_v20, %v3474_v34  ;;  %v3487_v51 = vmul.f32 %v4401_v39, %v3393_v27 }
 0x168   :  { %v676_v26 = vadd.f32 1.0, %v2142_v18  ;;  %v890_v36 = vmul.f32 %v4406_v8, %v3426_v7  ;;  %v816_v13 = vmul.f32 %v4402_v40, %v3474_v34  ;;  %v805_v57 = vsel %vm117_vm2, %v802_v47, %v804_v41 }
 0x169   :  { %2145 = vrcp.f32 %v677_v10  ;;  %v809_v46 = vadd.f32 %v803_v53, %v790_v6  ;;  %v754_v16 = vadd.f32 %v751_v12, %v746_v4  ;;  %v822_v20 = vsel %vm117_vm2, %v820_v62, %v821_v52  ;;  %v3521_v6 = vpop.permute.xlu0 %1028 }
 0x16a   :  { %2147 = vrcp.f32 %v676_v26  ;;  %v823_v42 = vrot.slane %v816_v13, 1  ;;  %v947_v25 = vmul.f32 %v4404_v37, %v3354_v55  ;;  %v810_v44 = vadd.f32 %v805_v57, %v791_v3  ;;  %v4409_v55 = vld [vmem:[#allocation23_spill] sm:$0xff]  ;;  %v4411_v3 = vld [vmem:[#allocation25_spill] sm:$0xff]  ;;  %v3527_v26 = vpop.permute.xlu1 %1032 }
 0x16b   :  { %v2144_v61 = vpop.eup %2143  ;;  %v828_v39 = vadd.f32 %v822_v20, %v809_v46  ;;  %v4408_v21 = vrot.slane %v4407_v9, 1  ;;  %v891_v11 = vmul.f32 %v4406_v8, %v3389_v43  ;;  %v892_v47 = vmul.f32 %v4406_v8, %v3474_v34  ;;  %v4413_v8 = vld [vmem:[#allocation19_spill] sm:$0xff]  ;;  %v4415_v46 = vld [vmem:[#allocation91_spill] sm:$0xff] }
 0x16c   :  { %v678_v22 = vadd.f32 1.0, %v2144_v61  ;;  %v824_v31 = vsel %vm117_vm2, %v821_v52, %v823_v42  ;;  %v3508_v40 = vmul.f32 %v4404_v37, %v3393_v27  ;;  %v954_v45 = vrot.slane %v3472_v14, 3 }
 0x16d   :  { %v773_v49 = vadd.f32 %v4408_v21, %v754_v16  ;;  %v847_v30 = vadd.f32 %v4409_v55, %v828_v39  ;;  %v829_v17 = vadd.f32 %v824_v31, %v810_v44  ;;  %v880_v56 = vrot.slane %v3487_v51, 2  ;;  %v4418_v31 = vld [vmem:[#allocation66_spill] sm:$0xff]  ;;  %v4419_v55 = vld [vmem:[#allocation93_spill] sm:$0xff] }
 0x16e   :  { %2149 = vrcp.f32 %v678_v22  ;;  %v896_v38 = vrot.slane %v890_v36, 2  ;;  %v966_v35 = vmul.f32 %v4410_v33, %v3426_v7  ;;  %v879_v23 = vsel %vm194_vm3, %v877_v0, %v878_v1  ;;  %v4416_v22 = vld [vmem:[#allocation92_spill] sm:$0xff] }
 0x16f   :  { %v792_v58 = vadd.f32 %v785_v19, %v773_v49  ;;  %v866_v54 = vadd.f32 %v3430_v63, %v847_v30  ;;  %v848_v27 = vadd.f32 %v4411_v3, %v829_v17  ;;  %v953_v37 = vrot.slane %v947_v25, 3  ;;  %v4417_v25 = vld [vmem:[#allocation24_spill] sm:$0xff] }
 0x170   :  { %v897_v52 = vrot.slane %v891_v11, 2  ;;  %v967_v19 = vmul.f32 %v4410_v33, %v3389_v43  ;;  %v899_v62 = vrot.slane %v892_v47, 2  ;;  %v956_v14 = vrot.slane %v3508_v40, 3 }
 0x171   :  { %v811_v53 = vadd.f32 %v804_v41, %v792_v58  ;;  %v885_v18 = vadd.f32 %v879_v23, %v866_v54  ;;  %v867_v4 = vadd.f32 %v862_v24, %v848_v27  ;;  %v881_v7 = vsel %vm194_vm3, %v878_v1, %v880_v56  ;;  %v4412_v41 = vld [vmem:[#allocation90_spill] sm:$0xff]  ;;  %v4420_v58 = vld [vmem:[#allocation26_spill] sm:$0xff]  ;;  %v3582_v54 = vpop.permute.xlu1 %1036 }
 0x172   :  { %v898_v63 = vsel %vm194_vm3, %v896_v38, %v897_v52  ;;  %v972_v0 = vrot.slane %v966_v35, 3  ;;  %v1054_v12 = vmul.f32 %v4412_v41, %v3481_v32  ;;  %v4414_v36 = vrot.slane %v4413_v8, 2  ;;  %v3572_v38 = vpop.permute.xlu0 %1034 }
 0x173   :  { %v830_v10 = vadd.f32 %v823_v42, %v811_v53  ;;  %v2146_v51 = vpop.eup %2145  ;;  %v904_v43 = vadd.f32 %v898_v63, %v885_v18  ;;  %v886_v61 = vadd.f32 %v881_v7, %v867_v4  ;;  %v3533_v24 = vmul.f32 %v4410_v33, %v3474_v34  ;;  %v4423_v63 = vld [vmem:[#allocation67_spill] sm:$0xff] }
 0x174   :  { %v2148_v57 = vpop.eup %2147  ;;  %2020 = vst.msk [vmem:[%s4387_s22 + $0x20] sm:$0xff] %vm363_vm5, %v2146_v51  ;;  %v973_v1 = vrot.slane %v967_v19, 3  ;;  %v3541_v16 = vmul.f32 %v4415_v46, %v3481_v32  ;;  %v3545_v20 = vmul.f32 %v4416_v22, %v3481_v32  ;;  %v900_v42 = vsel %vm194_vm3, %v897_v52, %v899_v62 }
 0x175   :  { %v849_v13 = vadd.f32 %v4414_v36, %v830_v10  ;;  %2019 = vst.msk [vmem:[%s4387_s22 + $0x18] sm:$0xff] %vm363_vm5, %v2148_v57  ;;  %v955_v34 = vsel %vm271_vm4, %v953_v37, %v954_v45  ;;  %v923_v44 = vadd.f32 %v4417_v25, %v904_v43  ;;  %v905_v9 = vadd.f32 %v900_v42, %v886_v61  ;;  %v4421_v10 = vld [vmem:[#allocation20_spill] sm:$0xff] }
 0x176   :  { %v957_v49 = vsel %vm271_vm4, %v954_v45, %v956_v14  ;;  %v974_v11 = vsel %vm271_vm4, %v972_v0, %v973_v1  ;;  %v1057_v47 = vadd.f32 %v1054_v12, %v4418_v31  ;;  %v3563_v30 = vmul.f32 %v4419_v55, %v3481_v32  ;;  %v3610_v57 = vpop.permute.xlu0 %1040 }
 0x177   :  { %v868_v39 = vadd.f32 %v861_v29, %v849_v13  ;;  %v942_v2 = vadd.f32 %v3456_v59, %v923_v44  ;;  %v924_v17 = vadd.f32 %v4420_v58, %v905_v9  ;;  %v975_v45 = vrot.slane %v3533_v24, 3  ;;  %v4425_v13 = vld [vmem:[#allocation97_spill] sm:$0xff]  ;;  %v4427_v44 = vld [vmem:[#allocation95_spill] sm:$0xff] }
 0x178   :  { %v2150_v21 = vpop.eup %2149  ;;  %v1103_v33 = vrot.slane %v3541_v16, 1  ;;  %v1179_v35 = vrot.slane %v3545_v20, 2  ;;  %v1056_v32 = vmul.f32 %v4412_v41, %v3504_v28  ;;  %v3580_v23 = vmul.f32 %v4415_v46, %v3504_v28  ;;  %v3616_v20 = vpop.permute.xlu1 %1038 }
 0x179   :  { %2021 = vst.msk [vmem:[%s4387_s22 + $0x28] sm:$0x1] %vm366_vm6, %v2150_v21  ;;  %v887_v29 = vadd.f32 %v880_v56, %v868_v39  ;;  %v961_v59 = vadd.f32 %v955_v34, %v942_v2  ;;  %v943_v53 = vadd.f32 %v3468_v50, %v924_v17  ;;  %v1098_v3 = vmul.f32 %v4415_v46, %v3521_v6  ;;  %v4426_v46 = vld [vmem:[#allocation68_spill] sm:$0xff]  ;;  %v4428_v21 = vld [vmem:[#allocation99_spill] sm:$0xff] }
 0x17a   :  { %v1255_v27 = vrot.slane %v3563_v30, 3  ;;  %v3590_v37 = vmul.f32 %v4416_v22, %v3504_v28  ;;  %v1055_v52 = vmul.f32 %v4412_v41, %v3521_v6  ;;  %v1174_v19 = vmul.f32 %v4416_v22, %v3521_v6  ;;  %v4424_v41 = vld [vmem:[#allocation94_spill] sm:$0xff] }
 0x17b   :  { %v906_v56 = vadd.f32 %v899_v62, %v887_v29  ;;  %v980_v18 = vadd.f32 %v974_v11, %v961_v59  ;;  %v4422_v62 = vrot.slane %v4421_v10, 3  ;;  %v962_v50 = vadd.f32 %v957_v49, %v943_v53  ;;  %v4431_v10 = vld [vmem:[#allocation96_spill] sm:$0xff] }
 0x17c   :  { %v976_v7 = vsel %vm271_vm4, %v973_v1, %v975_v45  ;;  %v1059_v0 = vadd.f32 %v1056_v32, %v4423_v63  ;;  %v1106_v12 = vrot.slane %v3580_v23, 1  ;;  %v3603_v51 = vmul.f32 %v4419_v55, %v3504_v28  ;;  %v4429_v32 = vld [vmem:[#allocation29_spill] sm:$0xff] }
 0x17d   :  { %v925_v4 = vadd.f32 %v4422_v62, %v906_v56  ;;  %v1063_v43 = vmul.f32 %v4424_v41, %v3572_v38  ;;  %v981_v36 = vadd.f32 %v976_v7, %v962_v50  ;;  %v985_v61 = vadd.f32 %v4425_v13, %v980_v18  ;;  %v3649_v56 = vpop.permute.xlu1 %1042 }
 0x17e   :  { %v1104_v24 = vrot.slane %v1098_v3, 1  ;;  %v1182_v1 = vrot.slane %v3590_v37, 2  ;;  %v1058_v16 = vadd.f32 %v1055_v52, %v4426_v46  ;;  %v1180_v22 = vrot.slane %v1174_v19, 2  ;;  %v4430_v3 = vld [vmem:[#allocation100_spill] sm:$0xff] }
 0x17f   :  { %v944_v8 = vadd.f32 %v937_v5, %v925_v4  ;;  %v1062_v28 = vmul.f32 %v4424_v41, %v3527_v26  ;;  %v986_v5 = vadd.f32 %v4425_v13, %v981_v36  ;;  %v2041_v42 = vmul.f32 -1.442695, %v985_v61  ;;  %v4433_v61 = vld [vmem:[#allocation31_spill] sm:$0xff] }
 0x180   :  { %v3623_v34 = vmul.f32 %v4419_v55, %v3521_v6  ;;  %v1066_v25 = vadd.f32 %v1063_v43, %v1058_v16  ;;  %v1117_v39 = vmul.f32 %v4427_v44, %v3572_v38  ;;  %v3629_v9 = vmul.f32 %v4427_v44, %v3582_v54 }
 0x181   :  { %v963_v48 = vadd.f32 %v956_v14, %v944_v8  ;;  %v1071_v49 = vmul.f32 %v4428_v21, %v3610_v57  ;;  %2151 = vpow2.f32 %v2041_v42  ;;  %v2042_v14 = vmul.f32 -1.442695, %v986_v5  ;;  %v4432_v8 = vld [vmem:[#allocation98_spill] sm:$0xff] }
 0x182   :  { %v1105_v11 = vsel %vm117_vm2, %v1103_v33, %v1104_v24  ;;  %v1107_v6 = vsel %vm117_vm2, %v1104_v24, %v1106_v12  ;;  %v3638_v31 = vsel %vm194_vm3, %v1179_v35, %v1180_v22  ;;  %v1065_v55 = vadd.f32 %v1062_v28, %v1057_v47 }
 0x183   :  { %v982_v40 = vadd.f32 %v975_v45, %v963_v48  ;;  %v1074_v2 = vadd.f32 %v1071_v49, %v1066_v25  ;;  %2153 = vpow2.f32 %v2042_v14  ;;  %v1116_v58 = vmul.f32 %v4427_v44, %v3527_v26  ;;  %v4436_v14 = vld [vmem:[#allocation101_spill] sm:$0xff] }
 0x184   :  { %v1064_v17 = vmul.f32 %v4424_v41, %v3582_v54  ;;  %v1123_v45 = vrot.slane %v1117_v39, 1  ;;  %v1125_v33 = vrot.slane %v3629_v9, 1  ;;  %v1070_v35 = vmul.f32 %v4428_v21, %v3616_v20  ;;  %v4434_v39 = vld [vmem:[#allocation27_spill] sm:$0xff] }
 0x185   :  { %v987_v29 = vadd.f32 %v4425_v13, %v982_v40  ;;  %v1093_v59 = vadd.f32 %v4429_v32, %v1074_v2  ;;  %v1183_v53 = vsel %vm194_vm3, %v1180_v22, %v1182_v1  ;;  %v1136_v52 = vmul.f32 %v4430_v3, %v3610_v57 }
 0x186   :  { %v1135_v19 = vmul.f32 %v4430_v3, %v3616_v20  ;;  %v1256_v18 = vrot.slane %v3623_v34, 3  ;;  %v1193_v62 = vmul.f32 %v4431_v10, %v3572_v38  ;;  %v1073_v50 = vadd.f32 %v1070_v35, %v1065_v55 }
 0x187   :  { %v2043_v47 = vmul.f32 -1.442695, %v987_v29  ;;  %v1112_v4 = vadd.f32 %v1107_v6, %v1093_v59  ;;  %v1192_v7 = vmul.f32 %v4431_v10, %v3527_v26  ;;  %v1067_v63 = vadd.f32 %v1064_v17, %v1059_v0 }
 0x188   :  { %v1072_v41 = vmul.f32 %v4428_v21, %v3649_v56  ;;  %v1122_v43 = vrot.slane %v1116_v58, 1  ;;  %v3667_v36 = vmul.f32 %v4432_v8, %v3527_v26  ;;  %v1126_v13 = vsel %vm117_vm2, %v1123_v45, %v1125_v33 }
 0x189   :  { %2155 = vpow2.f32 %v2043_v47  ;;  %v1092_v24 = vadd.f32 %v4433_v61, %v1073_v50  ;;  %v1142_v46 = vrot.slane %v1136_v52, 1  ;;  %v1141_v16 = vrot.slane %v1135_v19, 1  ;;  %v3693_v19 = vpop.permute.xlu0 %1347 }
 0x18a   :  { %v1075_v22 = vadd.f32 %v1072_v41, %v1067_v63  ;;  %v1137_v28 = vmul.f32 %v4430_v3, %v3649_v56  ;;  %v1199_v48 = vrot.slane %v1193_v62, 2  ;;  %v3675_v0 = vmul.f32 %v4432_v8, %v3572_v38  ;;  %v4438_v62 = vld [vmem:[#allocation34_spill] sm:$0xff] }
 0x18b   :  { %v1111_v5 = vadd.f32 %v1105_v11, %v1092_v24  ;;  %v1131_v42 = vadd.f32 %v1126_v13, %v1112_v4  ;;  %v2152_v25 = vpop.eup %2151  ;;  %v1124_v26 = vsel %vm117_vm2, %v1122_v43, %v1123_v45  ;;  %v1194_v44 = vmul.f32 %v4431_v10, %v3582_v54 }
 0x18c   :  { %v4435_v9 = vrot.slane %v4434_v39, 1  ;;  %v1144_v49 = vrot.slane %v1137_v28, 1  ;;  %v997_v40 = vadd.f32 1.0, %v2152_v25  ;;  %v1212_v6 = vmul.f32 %v4436_v14, %v3610_v57 }
 0x18d   :  { %v1130_v55 = vadd.f32 %v1124_v26, %v1111_v5  ;;  %v1211_v38 = vmul.f32 %v4436_v14, %v3616_v20  ;;  %v2154_v11 = vpop.eup %2153  ;;  %v1143_v2 = vsel %vm117_vm2, %v1141_v16, %v1142_v46  ;;  %v1213_v17 = vmul.f32 %v4436_v14, %v3649_v56  ;;  %v4439_v16 = vld [vmem:[#allocation28_spill] sm:$0xff] }
 0x18e   :  { %v1094_v21 = vadd.f32 %v4435_v9, %v1075_v22  ;;  %v1145_v58 = vsel %vm117_vm2, %v1142_v46, %v1144_v49  ;;  %v998_v45 = vadd.f32 1.0, %v2154_v11  ;;  %2157 = vrcp.f32 %v997_v40  ;;  %v3736_v9 = vpop.permute.xlu1 %1349 }
 0x18f   :  { %v1149_v32 = vadd.f32 %v1143_v2, %v1130_v55  ;;  %v1150_v59 = vadd.f32 %v1145_v58, %v1131_v42  ;;  %v1198_v35 = vrot.slane %v1192_v7, 2  ;;  %v1275_v47 = vrot.slane %v3675_v0, 3  ;;  %v3727_v42 = vpop.permute.xlu0 %1351 }
 0x190   :  { %v1113_v29 = vadd.f32 %v1106_v12, %v1094_v21  ;;  %v1201_v3 = vrot.slane %v1194_v44, 2  ;;  %2159 = vrcp.f32 %v998_v45  ;;  %v3697_v23 = vmul.f32 %v4432_v8, %v3582_v54  ;;  %v4437_v12 = vld [vmem:[#allocation32_spill] sm:$0xff]  ;;  %v4443_v45 = vld [vmem:[#allocation30_spill] sm:$0xff] }
 0x191   :  { %v1168_v10 = vadd.f32 %v4437_v12, %v1149_v32  ;;  %v1169_v4 = vadd.f32 %v4438_v62, %v1150_v59  ;;  %v1218_v63 = vrot.slane %v1212_v6, 2  ;;  %v1217_v41 = vrot.slane %v1211_v38, 2 }
 0x192   :  { %v1132_v52 = vadd.f32 %v1125_v33, %v1113_v29  ;;  %v1220_v7 = vrot.slane %v1213_v17, 2  ;;  %v1200_v33 = vsel %vm194_vm3, %v1198_v35, %v1199_v48  ;;  %v1202_v54 = vsel %vm194_vm3, %v1199_v48, %v1201_v3 }
 0x193   :  { %v2156_v50 = vpop.eup %2155  ;;  %v1187_v61 = vadd.f32 %v3638_v31, %v1168_v10  ;;  %v1188_v24 = vadd.f32 %v1183_v53, %v1169_v4  ;;  %v1288_v8 = vmul.f32 %v3343_v60, %v3610_v57  ;;  %v1287_v46 = vmul.f32 %v3343_v60, %v3616_v20 }
 0x194   :  { %v1151_v43 = vadd.f32 %v1144_v49, %v1132_v52  ;;  %v999_v13 = vadd.f32 1.0, %v2156_v50  ;;  %v4440_v22 = vrot.slane %v4439_v16, 2  ;;  %v3720_v0 = vmul.f32 %v3343_v60, %v3649_v56  ;;  %v4442_v49 = vld [vmem:[#allocation35_spill] sm:$0xff] }
 0x195   :  { %v1206_v31 = vadd.f32 %v1200_v33, %v1187_v61  ;;  %v1207_v53 = vadd.f32 %v1202_v54, %v1188_v24  ;;  %v1277_v48 = vrot.slane %v3697_v23, 3  ;;  %v1219_v5 = vsel %vm194_vm3, %v1217_v41, %v1218_v63  ;;  %v4445_v33 = vld [vmem:[#allocation69_spill] sm:$0xff]  ;;  %v2200_v24 = vld [vmem:[#allocation2 + $0x10] sm:$0xf]  ;;  %v2201_v16 = vld [vmem:[#allocation2 + $0x8] sm:$0xff] }
 0x196   :  { %v1170_v28 = vadd.f32 %v4440_v22, %v1151_v43  ;;  %2161 = vrcp.f32 %v999_v13  ;;  %v1221_v20 = vsel %vm194_vm3, %v1218_v63, %v1220_v7  ;;  %v1258_v25 = vrot.slane %v3603_v51, 3  ;;  %v3781_v63 = vpop.permute.xlu1 %1355  ;;  %v2199_v13 = vld [vmem:[#allocation2] sm:$0xff] }
 0x197   :  { %v1257_v60 = vsel %vm271_vm4, %v1255_v27, %v1256_v18  ;;  %v1225_v56 = vadd.f32 %v1219_v5, %v1206_v31  ;;  %v1226_v26 = vadd.f32 %v1221_v20, %v1207_v53  ;;  %v1274_v44 = vrot.slane %v3667_v36, 3  ;;  %v4441_v27 = vld [vmem:[#allocation33_spill] sm:$0xff]  ;;  %v4446_v53 = vld [vmem:[#allocation73_spill] sm:$0xff] }
 0x198   :  { %v1189_v57 = vadd.f32 %v1182_v1, %v1170_v28  ;;  %v1294_v39 = vrot.slane %v1288_v8, 3  ;;  %v1293_v37 = vrot.slane %v1287_v46, 3  ;;  %v2158_v51 = vpop.eup %2157  ;;  %v1259_v30 = vsel %vm271_vm4, %v1256_v18, %v1258_v25 }
 0x199   :  { %v1244_v21 = vadd.f32 %v4441_v27, %v1225_v56  ;;  %v1245_v40 = vadd.f32 %v4442_v49, %v1226_v26  ;;  %v1296_v36 = vrot.slane %v3720_v0, 3  ;;  %2044 = vst.msk [vmem:[%s4387_s22 + $0x30] sm:$0xff] %vm363_vm5, %v2158_v51  ;;  %v1276_v14 = vsel %vm271_vm4, %v1274_v44, %v1275_v47 }
 0x19a   :  { %v1208_v1 = vadd.f32 %v1201_v3, %v1189_v57  ;;  %v1278_v6 = vsel %vm271_vm4, %v1275_v47, %v1277_v48  ;;  %v1417_v34 = vstv %s3701_s18  ;;  %v2160_v38 = vpop.eup %2159  ;;  %v1493_v2 = vstv %s3705_s19  ;;  %v3765_v47 = vpop.permute.xlu0 %1353  ;;  %s4024_s18 = sld [smem:[#allocation3 + $0x26]]  ;;  %s4026_s19 = sld [smem:[#allocation3 + $0x23]] }
 0x19b   :  { %v1263_v18 = vadd.f32 %v1257_v60, %v1244_v21  ;;  %v1264_v11 = vadd.f32 %v1259_v30, %v1245_v40  ;;  %v1569_v29 = vstv %s3707_s20  ;;  %2045 = vst.msk [vmem:[%s4387_s22 + $0x38] sm:$0xff] %vm363_vm5, %v2160_v38  ;;  %v1295_v58 = vsel %vm271_vm4, %v1293_v37, %v1294_v39  ;;  %v3819_v21 = vpop.permute.xlu1 %1361  ;;  %s4038_s20 = sld [smem:[#allocation3 + $0x27]] }
 0x19c   :  { %v1227_v55 = vadd.f32 %v1220_v7, %v1208_v1  ;;  %v1305_v17 = vstv %s3714_s0  ;;  %v4444_v32 = vrot.slane %v4443_v45, 3  ;;  %v1375_v35 = vmul.f32 %v3379_v15, %v3693_v19  ;;  %s4047_s0 = sld [smem:[#allocation3 + $0x2a]] }
 0x19d   :  { %v1282_v3 = vadd.f32 %v1276_v14, %v1263_v18  ;;  %v1283_v52 = vadd.f32 %v1278_v6, %v1264_v11  ;;  %v1297_v23 = vsel %vm271_vm4, %v1294_v39, %v1296_v36  ;;  %v1418_v12 = vmul.f32 %v1417_v34, %v3693_v19 }
 0x19e   :  { %v1246_v59 = vadd.f32 %v4444_v32, %v1227_v55  ;;  %v3772_v62 = vmul.f32 %v1493_v2, %v3693_v19  ;;  %v3775_v4 = vmul.f32 %v1569_v29, %v3693_v19  ;;  %v1376_v50 = vmul.f32 %v3379_v15, %v3736_v9  ;;  %v3808_v56 = vpop.permute.xlu0 %1357 }
 0x19f   :  { %v1301_v43 = vadd.f32 %v1295_v58, %v1282_v3  ;;  %v1302_v7 = vadd.f32 %v1297_v23, %v1283_v52  ;;  %v3786_v61 = vmul.f32 %v2199_v13, %v4445_v33  ;;  %v3789_v19 = vmul.f32 %v2200_v24, %v4445_v33 }
 0x1a0   :  { %v1265_v10 = vadd.f32 %v1258_v25, %v1246_v59  ;;  %v2162_v41 = vpop.eup %2161  ;;  %v1419_v8 = vmul.f32 %v1417_v34, %v3736_v9  ;;  %v3797_v46 = vstv %s3738_s2  ;;  %v3800_v22 = vmul.f32 %v2201_v16, %v4445_v33  ;;  %s4065_s2 = sld [smem:[#allocation3 + $0x2e]] }
 0x1a1   :  { %2046 = vst.msk [vmem:[%s4387_s22 + $0x40] sm:$0x1] %vm366_vm6, %v2162_v41  ;;  %v1306_v28 = vadd.f32 %v1305_v17, %v1301_v43  ;;  %v1307_v31 = vadd.f32 %v1305_v17, %v1302_v7  ;;  %v1378_v0 = vadd.f32 %v1375_v35, %v4446_v53  ;;  %v1424_v5 = vrot.slane %v1418_v12, 1  ;;  %v4448_v12 = vld [vmem:[#allocation38_spill] sm:$0xff] }
 0x1a2   :  { %v1284_v54 = vadd.f32 %v1277_v48, %v1265_v10  ;;  %v1500_v20 = vrot.slane %v3772_v62, 2  ;;  %v1576_v25 = vrot.slane %v3775_v4, 3  ;;  %v4447_v48 = vld [vmem:[#allocation76_spill] sm:$0xff]  ;;  %v1495_v39 = vmul.f32 %v1493_v2, %v3736_v9  ;;  %v3841_v58 = vpop.permute.xlu0 %1359  ;;  %v4449_v41 = vld [vmem:[#allocation77_spill] sm:$0xff] }
 0x1a3   :  { %v1379_v60 = vadd.f32 %v1376_v50, %v4447_v48  ;;  %v2064_v26 = vmul.f32 -1.442695, %v1306_v28  ;;  %v2065_v44 = vmul.f32 -1.442695, %v1307_v31  ;;  %v1384_v37 = vmul.f32 %v3797_v46, %v3781_v63 }
 0x1a4   :  { %v1303_v57 = vadd.f32 %v1296_v36, %v1284_v54  ;;  %v1425_v51 = vrot.slane %v1419_v8, 1  ;;  %v1571_v30 = vmul.f32 %v1569_v29, %v3736_v9  ;;  %v3817_v27 = vstv %s3767_s27 }
 0x1a5   :  { %2163 = vpow2.f32 %v2064_v26  ;;  %v3822_v49 = vmul.f32 %v1417_v34, %v3727_v42  ;;  %v3825_v40 = vmul.f32 %v1493_v2, %v3727_v42  ;;  %v3828_v36 = vmul.f32 %v1569_v29, %v3727_v42 }
 0x1a6   :  { %v1308_v1 = vadd.f32 %v1305_v17, %v1303_v57  ;;  %2165 = vpow2.f32 %v2065_v44  ;;  %v1377_v9 = vmul.f32 %v3379_v15, %v3727_v42  ;;  %v1436_v6 = vstv %s3779_s28  ;;  %v4450_v57 = vld [vmem:[#allocation40_spill] sm:$0xff] }
 0x1a7   :  { %v3834_v55 = vstv %s3783_s29  ;;  %v1387_v38 = vadd.f32 %v1384_v37, %v1379_v60  ;;  %v1383_v34 = vmul.f32 %v3797_v46, %v3765_v47  ;;  %v1392_v18 = vmul.f32 %v3817_v27, %v3819_v21 }
 0x1a8   :  { %v2066_v14 = vmul.f32 -1.442695, %v1308_v1  ;;  %v1426_v11 = vsel %vm117_vm2, %v1424_v5, %v1425_v51  ;;  %v1501_v2 = vrot.slane %v1495_v39, 2  ;;  %v1577_v29 = vrot.slane %v1571_v30, 3 }
 0x1a9   :  { %v1427_v15 = vrot.slane %v3822_v49, 1  ;;  %v1503_v42 = vrot.slane %v3825_v40, 2  ;;  %v1579_v17 = vrot.slane %v3828_v36, 3  ;;  %v1395_v45 = vadd.f32 %v1392_v18, %v1387_v38  ;;  %v3905_v38 = vpop.permute.xlu0 %1363 }
 0x1aa   :  { %2167 = vpow2.f32 %v2066_v14  ;;  %v3847_v32 = vstv %s3806_s4  ;;  %v3850_v59 = vmul.f32 %v1436_v6, %v3781_v63  ;;  %v3854_v35 = vmul.f32 %v3834_v55, %v3781_v63 }
 0x1ab   :  { %v1437_v3 = vmul.f32 %v1436_v6, %v3765_v47  ;;  %v1386_v52 = vadd.f32 %v1383_v34, %v1378_v0  ;;  %v1455_v23 = vstv %s3813_s5  ;;  %v1414_v10 = vadd.f32 %v4448_v12, %v1395_v45 }
 0x1ac   :  { %v1391_v62 = vmul.f32 %v3817_v27, %v3841_v58  ;;  %v3864_v4 = vsel %vm194_vm3, %v1500_v20, %v1501_v2  ;;  %v3867_v50 = vsel %vm271_vm4, %v1576_v25, %v1577_v29  ;;  %v1380_v43 = vadd.f32 %v1377_v9, %v4449_v41 }
 0x1ad   :  { %v1456_v7 = vmul.f32 %v1455_v23, %v3841_v58  ;;  %v1428_v13 = vsel %vm117_vm2, %v1425_v51, %v1427_v15  ;;  %v3876_v33 = vmul.f32 %v3847_v32, %v3781_v63  ;;  %v1513_v24 = vmul.f32 %v3834_v55, %v3765_v47 }
 0x1ae   :  { %v1394_v54 = vadd.f32 %v1391_v62, %v1386_v52  ;;  %v1444_v8 = vrot.slane %v3850_v59, 1  ;;  %v1443_v16 = vrot.slane %v1437_v3, 1  ;;  %v1589_v28 = vmul.f32 %v3847_v32, %v3765_v47  ;;  %v3915_v3 = vpop.permute.xlu1 %1668 }
 0x1af   :  { %v1457_v31 = vmul.f32 %v1455_v23, %v3819_v21  ;;  %v2164_v53 = vpop.eup %2163  ;;  %v3889_v63 = vsel %vm194_vm3, %v1501_v2, %v1503_v42  ;;  %v3894_v0 = vsel %vm271_vm4, %v1577_v29, %v1579_v17  ;;  %v1520_v5 = vrot.slane %v3854_v35, 2 }
 0x1b0   :  { %v1413_v20 = vadd.f32 %v4450_v57, %v1394_v54  ;;  %v2166_v47 = vpop.eup %2165  ;;  %v1318_v25 = vadd.f32 1.0, %v2164_v53  ;;  %v1385_v48 = vmul.f32 %v3797_v46, %v3808_v56  ;;  %v3901_v60 = vmul.f32 %v1436_v6, %v3808_v56 }
 0x1b1   :  { %v1462_v26 = vrot.slane %v1456_v7, 1  ;;  %v1319_v44 = vadd.f32 1.0, %v2166_v47  ;;  %v1596_v39 = vrot.slane %v3876_v33, 3  ;;  %v1519_v37 = vrot.slane %v1513_v24, 2  ;;  %v4451_v7 = vld [vmem:[#allocation41_spill] sm:$0xff] }
 0x1b2   :  { %v1432_v1 = vadd.f32 %v1426_v11, %v1413_v20  ;;  %2169 = vrcp.f32 %v1318_v25  ;;  %v1445_v30 = vsel %vm117_vm2, %v1443_v16, %v1444_v8  ;;  %v1595_v14 = vrot.slane %v1589_v28, 3 }
 0x1b3   :  { %v1463_v9 = vrot.slane %v1457_v31, 1  ;;  %2171 = vrcp.f32 %v1319_v44  ;;  %v1531_v46 = vstv %s3858_s26  ;;  %v1388_v18 = vadd.f32 %v1385_v48, %v1380_v43 }
 0x1b4   :  { %v2168_v51 = vpop.eup %2167  ;;  %v1451_v6 = vadd.f32 %v1445_v30, %v1432_v1  ;;  %v1446_v2 = vrot.slane %v3901_v60, 1  ;;  %v1532_v11 = vmul.f32 %v1531_v46, %v3841_v58  ;;  %v1433_v45 = vadd.f32 %v1428_v13, %v1414_v10 }
 0x1b5   :  { %v1320_v34 = vadd.f32 1.0, %v2168_v51  ;;  %v1464_v29 = vsel %vm117_vm2, %v1462_v26, %v1463_v9  ;;  %v1393_v52 = vmul.f32 %v3817_v27, %v3905_v38  ;;  %v1521_v12 = vsel %vm194_vm3, %v1519_v37, %v1520_v5  ;;  %v3960_v26 = vpop.permute.xlu1 %1672 }
 0x1b6   :  { %v1470_v59 = vadd.f32 %v1464_v29, %v1451_v6  ;;  %v3923_v62 = vstv %s3883_s6  ;;  %v1533_v41 = vmul.f32 %v1531_v46, %v3819_v21  ;;  %v1458_v10 = vmul.f32 %v1455_v23, %v3905_v38 }
 0x1b7   :  { %2173 = vrcp.f32 %v1320_v34  ;;  %v3933_v43 = vmul.f32 %v3834_v55, %v3808_v56  ;;  %v3937_v27 = vmul.f32 %v3847_v32, %v3808_v56  ;;  %v1396_v24 = vadd.f32 %v1393_v52, %v1388_v18  ;;  %v4452_v56 = vld [vmem:[#allocation36_spill] sm:$0xff] }
 0x1b8   :  { %v1489_v13 = vadd.f32 %v4451_v7, %v1470_v59  ;;  %v1447_v54 = vsel %vm117_vm2, %v1444_v8, %v1446_v2  ;;  %v1538_v16 = vrot.slane %v1532_v11, 2  ;;  %v1608_v28 = vmul.f32 %v3923_v62, %v3841_v58 }
 0x1b9   :  { %v1465_v31 = vrot.slane %v1458_v10, 1  ;;  %v1597_v23 = vsel %vm271_vm4, %v1595_v14, %v1596_v39  ;;  %v1452_v55 = vadd.f32 %v1447_v54, %v1433_v45  ;;  %v4453_v32 = vrot.slane %v4452_v56, 1  ;;  %v4455_v45 = vld [vmem:[#allocation42_spill] sm:$0xff]  ;;  %v4456_v54 = vld [vmem:[#allocation37_spill] sm:$0xff] }
 0x1ba   :  { %v1508_v53 = vadd.f32 %v3864_v4, %v1489_v13  ;;  %v1539_v20 = vrot.slane %v1533_v41, 2  ;;  %v3951_v8 = vmul.f32 %v3923_v62, %v3819_v21  ;;  %v3955_v58 = vmul.f32 %v1531_v46, %v3905_v38  ;;  %v1671_v41 = vpop.permute.xlu0 %1670 }
 0x1bb   :  { %v1415_v57 = vadd.f32 %v4453_v32, %v1396_v24  ;;  %v1466_v47 = vsel %vm117_vm2, %v1463_v9, %v1465_v31  ;;  %v1522_v25 = vrot.slane %v3933_v43, 2  ;;  %v1598_v21 = vrot.slane %v3937_v27, 3  ;;  %v4454_v9 = vld [vmem:[#allocation43_spill] sm:$0xff] }
 0x1bc   :  { %v1527_v48 = vadd.f32 %v1521_v12, %v1508_v53  ;;  %v1471_v60 = vadd.f32 %v1466_v47, %v1452_v55  ;;  %v2170_v44 = vpop.eup %2169  ;;  %v1540_v37 = vsel %vm194_vm3, %v1538_v16, %v1539_v20  ;;  %v1614_v1 = vrot.slane %v1608_v28, 3  ;;  %v4006_v28 = vpop.permute.xlu1 %1674 }
 0x1bd   :  { %v1434_v4 = vadd.f32 %v1427_v15, %v1415_v57  ;;  %v1695_v51 = vstv %s3911_s7  ;;  %v2172_v30 = vpop.eup %2171  ;;  %2067 = vst.msk [vmem:[%s4387_s22 + $0x48] sm:$0xff] %vm363_vm5, %v2170_v44  ;;  %v1738_v15 = vstv %s3913_s8  ;;  %v1615_v46 = vrot.slane %v3951_v8, 3 }
 0x1be   :  { %v1546_v49 = vadd.f32 %v1540_v37, %v1527_v48  ;;  %v1490_v34 = vadd.f32 %v4454_v9, %v1471_v60  ;;  %2068 = vst.msk [vmem:[%s4387_s22 + $0x50] sm:$0xff] %vm363_vm5, %v2172_v30  ;;  %v1814_v6 = vstv %s3926_s9  ;;  %v1890_v18 = vstv %s3928_s10  ;;  %v4030_v40 = vpop.permute.xlu0 %1676 }
 0x1bf   :  { %v1453_v14 = vadd.f32 %v1446_v2, %v1434_v4  ;;  %v1541_v29 = vrot.slane %v3955_v58, 2  ;;  %v1696_v52 = vmul.f32 %v1695_v51, %v3915_v3  ;;  %v1523_v10 = vsel %vm194_vm3, %v1520_v5, %v1522_v25 }
 0x1c0   :  { %v1565_v59 = vadd.f32 %v4455_v45, %v1546_v49  ;;  %v1509_v2 = vadd.f32 %v3889_v63, %v1490_v34  ;;  %v1599_v43 = vsel %vm271_vm4, %v1596_v39, %v1598_v21  ;;  %v1616_v7 = vsel %vm271_vm4, %v1614_v1, %v1615_v46  ;;  %v4041_v1 = vpop.permute.xlu1 %1678 }
 0x1c1   :  { %v2174_v11 = vpop.eup %2173  ;;  %v1472_v12 = vadd.f32 %v1465_v31, %v1453_v14  ;;  %v3998_v63 = vmul.f32 %v1738_v15, %v3915_v3  ;;  %v1815_v24 = vmul.f32 %v1814_v6, %v3915_v3  ;;  %v4457_v35 = vrot.slane %v4456_v54, 2  ;;  %v4459_v14 = vld [vmem:[#allocation39_spill] sm:$0xff] }
 0x1c2   :  { %2069 = vst.msk [vmem:[%s4387_s22 + $0x58] sm:$0x1] %vm366_vm6, %v2174_v11  ;;  %v1584_v13 = vadd.f32 %v3867_v50, %v1565_v59  ;;  %v1528_v5 = vadd.f32 %v1523_v10, %v1509_v2  ;;  %v4009_v33 = vmul.f32 %v1890_v18, %v3915_v3  ;;  %v1542_v39 = vsel %vm194_vm3, %v1539_v20, %v1541_v29 }
 0x1c3   :  { %v1491_v16 = vadd.f32 %v4457_v35, %v1472_v12  ;;  %v1610_v31 = vmul.f32 %v3923_v62, %v3905_v38  ;;  %v1698_v50 = vmul.f32 %v1695_v51, %v3960_v26  ;;  %v1699_v53 = vadd.f32 %v1696_v52, %v3786_v61  ;;  %v4458_v61 = vld [vmem:[#allocation44_spill] sm:$0xff] }
 0x1c4   :  { %v1603_v55 = vadd.f32 %v1597_v23, %v1584_v13  ;;  %v1547_v32 = vadd.f32 %v1542_v39, %v1528_v5  ;;  %v1626_v57 = vstv %s3965_s11  ;;  %v4020_v8 = vmul.f32 %v1738_v15, %v3960_v26 }
 0x1c5   :  { %v1510_v56 = vadd.f32 %v1503_v42, %v1491_v16  ;;  %v4022_v3 = vmul.f32 %v1738_v15, %v1671_v41  ;;  %v1816_v47 = vmul.f32 %v1814_v6, %v1671_v41  ;;  %v1745_v62 = vrot.slane %v3998_v63, 1 }
 0x1c6   :  { %v1622_v38 = vadd.f32 %v1616_v7, %v1603_v55  ;;  %v1566_v20 = vadd.f32 %v4458_v61, %v1547_v32  ;;  %v1821_v42 = vrot.slane %v1815_v24, 2  ;;  %v1617_v58 = vrot.slane %v1610_v31, 3 }
 0x1c7   :  { %v1529_v23 = vadd.f32 %v1522_v25, %v1510_v56  ;;  %v4033_v48 = vadd.f32 %v1698_v50, %v3789_v19  ;;  %v4036_v4 = vmul.f32 %v1814_v6, %v3960_v26  ;;  %v1697_v25 = vmul.f32 %v1695_v51, %v1671_v41 }
 0x1c8   :  { %v1585_v44 = vadd.f32 %v3894_v0, %v1566_v20  ;;  %v1627_v37 = vadd.f32 %v1626_v57, %v1622_v38  ;;  %v1748_v30 = vrot.slane %v4020_v8, 1  ;;  %v1746_v49 = vrot.slane %v4022_v3, 1  ;;  %v4461_v38 = vld [vmem:[#allocation46_spill] sm:$0xff] }
 0x1c9   :  { %v1548_v60 = vadd.f32 %v1541_v29, %v1529_v23  ;;  %v1822_v15 = vrot.slane %v1816_v47, 2  ;;  %v4045_v19 = vmul.f32 %v1890_v18, %v1671_v41  ;;  %v4460_v9 = vrot.slane %v4459_v14, 3  ;;  %v4061_v41 = vpop.permute.xlu0 %1682 }
 0x1ca   :  { %v1604_v6 = vadd.f32 %v1599_v43, %v1585_v44  ;;  %v2089_v0 = vmul.f32 -1.442695, %v1627_v37  ;;  %v1703_v29 = vstv %s4004_s17  ;;  %v1618_v51 = vsel %vm271_vm4, %v1615_v46, %v1617_v58 }
 0x1cb   :  { %v1567_v34 = vadd.f32 %v4460_v9, %v1548_v60  ;;  %v1824_v11 = vrot.slane %v4036_v4, 2  ;;  %v4055_v45 = vmul.f32 %v1890_v18, %v3960_v26  ;;  %v1705_v59 = vmul.f32 %v1703_v29, %v4030_v40  ;;  %v4462_v9 = vld [vmem:[#allocation49_spill] sm:$0xff] }
 0x1cc   :  { %v1623_v12 = vadd.f32 %v1618_v51, %v1604_v6  ;;  %2175 = vpow2.f32 %v2089_v0  ;;  %v1700_v2 = vadd.f32 %v1697_v25, %v3800_v22  ;;  %v1898_v10 = vrot.slane %v4045_v19, 3  ;;  %v4077_v22 = vpop.permute.xlu1 %1680 }
 0x1cd   :  { %v1586_v52 = vadd.f32 %v1579_v17, %v1567_v34  ;;  %v1757_v46 = vstv %s4024_s18  ;;  %v1704_v26 = vmul.f32 %v1703_v29, %v4006_v28  ;;  %v1711_v18 = vstv %s4026_s19 }
 0x1ce   :  { %v1628_v17 = vadd.f32 %v1626_v57, %v1623_v12  ;;  %v1747_v43 = vsel %vm117_vm2, %v1745_v62, %v1746_v49  ;;  %v4073_v7 = vsel %vm194_vm3, %v1821_v42, %v1822_v15  ;;  %v1759_v63 = vmul.f32 %v1757_v46, %v4030_v40 }
 0x1cf   :  { %v1605_v36 = vadd.f32 %v1598_v21, %v1586_v52  ;;  %v1776_v13 = vstv %s4038_s20  ;;  %v1708_v24 = vadd.f32 %v1705_v59, %v1700_v2  ;;  %v1713_v54 = vmul.f32 %v1711_v18, %v4061_v41 }
 0x1d0   :  { %v2090_v16 = vmul.f32 -1.442695, %v1628_v17  ;;  %v4085_v27 = vsel %vm194_vm3, %v1822_v15, %v1824_v11  ;;  %v4088_v21 = vmul.f32 %v1757_v46, %v4041_v1  ;;  %v1833_v5 = vstv %s4047_s0  ;;  %v4101_v42 = vpop.permute.xlu1 %1684 }
 0x1d1   :  { %v1624_v35 = vadd.f32 %v1617_v58, %v1605_v36  ;;  %v1707_v39 = vadd.f32 %v1704_v26, %v1699_v53  ;;  %v1758_v31 = vmul.f32 %v1757_v46, %v4006_v28  ;;  %v1716_v50 = vadd.f32 %v1713_v54, %v1708_v24 }
 0x1d2   :  { %2177 = vpow2.f32 %v2090_v16  ;;  %v1778_v56 = vmul.f32 %v1776_v13, %v4061_v41  ;;  %v1712_v32 = vmul.f32 %v1711_v18, %v4077_v22  ;;  %v1765_v3 = vrot.slane %v1759_v63, 1 }
 0x1d3   :  { %v1629_v55 = vadd.f32 %v1626_v57, %v1624_v35  ;;  %v1706_v47 = vmul.f32 %v1703_v29, %v4041_v1  ;;  %v1735_v62 = vadd.f32 %v4461_v38, %v1716_v50  ;;  %v1777_v23 = vmul.f32 %v1776_v13, %v4077_v22  ;;  %v4465_v38 = vld [vmem:[#allocation50_spill] sm:$0xff] }
 0x1d4   :  { %v1767_v53 = vrot.slane %v4088_v21, 1  ;;  %v1749_v57 = vsel %vm117_vm2, %v1746_v49, %v1748_v30  ;;  %v1715_v20 = vadd.f32 %v1712_v32, %v1707_v39  ;;  %v1909_v58 = vstv %s4065_s2 }
 0x1d5   :  { %v2091_v61 = vmul.f32 -1.442695, %v1629_v55  ;;  %v1764_v60 = vrot.slane %v1758_v31, 1  ;;  %v1834_v44 = vmul.f32 %v1833_v5, %v4006_v28  ;;  %v1754_v37 = vadd.f32 %v1749_v57, %v1735_v62  ;;  %v4466_v57 = vld [vmem:[#allocation52_spill] sm:$0xff] }
 0x1d6   :  { %v2176_v25 = vpop.eup %2175  ;;  %v1852_v15 = vstv %s4075_s21  ;;  %v1784_v14 = vrot.slane %v1778_v56, 1  ;;  %v1734_v34 = vadd.f32 %v4462_v9, %v1715_v20  ;;  %v1783_v0 = vrot.slane %v1777_v23, 1 }
 0x1d7   :  { %2179 = vpow2.f32 %v2091_v61  ;;  %v1639_v6 = vadd.f32 1.0, %v2176_v25  ;;  %v1709_v49 = vadd.f32 %v1706_v47, %v4033_v48  ;;  %v1714_v29 = vmul.f32 %v1711_v18, %v4101_v42 }
 0x1d8   :  { %v1835_v51 = vmul.f32 %v1833_v5, %v4030_v40  ;;  %v1768_v59 = vsel %vm117_vm2, %v1765_v3, %v1767_v53  ;;  %v1753_v52 = vadd.f32 %v1747_v43, %v1734_v34  ;;  %v1779_v12 = vmul.f32 %v1776_v13, %v4101_v42  ;;  %v4463_v13 = vld [vmem:[#allocation45_spill] sm:$0xff] }
 0x1d9   :  { %2181 = vrcp.f32 %v1639_v6  ;;  %v1766_v2 = vsel %vm117_vm2, %v1764_v60, %v1765_v3  ;;  %v1773_v46 = vadd.f32 %v1768_v59, %v1754_v37  ;;  %v1717_v26 = vadd.f32 %v1714_v29, %v1709_v49 }
 0x1da   :  { %v1836_v36 = vmul.f32 %v1833_v5, %v4041_v1  ;;  %v1854_v17 = vmul.f32 %v1852_v15, %v4061_v41  ;;  %v1772_v63 = vadd.f32 %v1766_v2, %v1753_v52  ;;  %v1786_v48 = vrot.slane %v1779_v12, 1 }
 0x1db   :  { %v4118_v18 = vmul.f32 %v1909_v58, %v4006_v28  ;;  %v1785_v24 = vsel %vm117_vm2, %v1783_v0, %v1784_v14  ;;  %v1853_v43 = vmul.f32 %v1852_v15, %v4077_v22  ;;  %v4464_v54 = vrot.slane %v4463_v13, 1 }
 0x1dc   :  { %v2178_v16 = vpop.eup %2177  ;;  %v1841_v21 = vrot.slane %v1835_v51, 2  ;;  %v1791_v39 = vadd.f32 %v1785_v24, %v1772_v63  ;;  %v1787_v5 = vsel %vm117_vm2, %v1784_v14, %v1786_v48  ;;  %v1855_v31 = vmul.f32 %v1852_v15, %v4101_v42  ;;  %v4470_v24 = vld [vmem:[#allocation53_spill] sm:$0xff] }
 0x1dd   :  { %v1736_v35 = vadd.f32 %v4464_v54, %v1717_v26  ;;  %v1640_v50 = vadd.f32 1.0, %v2178_v16  ;;  %v1840_v55 = vrot.slane %v1834_v44, 2  ;;  %v1792_v56 = vadd.f32 %v1787_v5, %v1773_v46  ;;  %v4471_v5 = vld [vmem:[#allocation48_spill] sm:$0xff] }
 0x1de   :  { %v1843_v32 = vrot.slane %v1836_v36, 2  ;;  %v1928_v3 = vstv %s4106_s23  ;;  %v1860_v47 = vrot.slane %v1854_v17, 2  ;;  %v1810_v62 = vadd.f32 %v4465_v38, %v1791_v39  ;;  %v4469_v36 = vld [vmem:[#allocation51_spill] sm:$0xff] }
 0x1df   :  { %v1755_v28 = vadd.f32 %v1748_v30, %v1736_v35  ;;  %2183 = vrcp.f32 %v1640_v50  ;;  %v1859_v23 = vrot.slane %v1853_v43, 2  ;;  %v1811_v20 = vadd.f32 %v4466_v57, %v1792_v56 }
 0x1e0   :  { %v1842_v37 = vsel %vm194_vm3, %v1840_v55, %v1841_v21  ;;  %v1911_v25 = vmul.f32 %v1909_v58, %v4030_v40  ;;  %v1829_v44 = vadd.f32 %v4073_v7, %v1810_v62  ;;  %v1862_v8 = vrot.slane %v1855_v31, 2  ;;  %v4467_v7 = vld [vmem:[#allocation47_spill] sm:$0xff] }
 0x1e1   :  { %v1774_v61 = vadd.f32 %v1767_v53, %v1755_v28  ;;  %v2180_v60 = vpop.eup %2179  ;;  %v1912_v15 = vmul.f32 %v1909_v58, %v4041_v1  ;;  %v1830_v9 = vadd.f32 %v4085_v27, %v1811_v20  ;;  %v1844_v34 = vsel %vm194_vm3, %v1841_v21, %v1843_v32 }
 0x1e2   :  { %v1641_v30 = vadd.f32 1.0, %v2180_v60  ;;  %v1930_v53 = vmul.f32 %v1928_v3, %v4061_v41  ;;  %v1848_v6 = vadd.f32 %v1842_v37, %v1829_v44  ;;  %v1929_v0 = vmul.f32 %v1928_v3, %v4077_v22 }
 0x1e3   :  { %v1793_v14 = vadd.f32 %v1786_v48, %v1774_v61  ;;  %v2182_v49 = vpop.eup %2181  ;;  %v1861_v40 = vsel %vm194_vm3, %v1859_v23, %v1860_v47  ;;  %v4468_v29 = vrot.slane %v4467_v7, 2  ;;  %v1849_v1 = vadd.f32 %v1844_v34, %v1830_v9 }
 0x1e4   :  { %2185 = vrcp.f32 %v1641_v30  ;;  %v1897_v58 = vrot.slane %v4009_v33, 3  ;;  %2092 = vst.msk [vmem:[%s4387_s22 + $0x60] sm:$0xff] %vm363_vm5, %v2182_v49  ;;  %v1867_v41 = vadd.f32 %v1861_v40, %v1848_v6  ;;  %v1863_v22 = vsel %vm194_vm3, %v1860_v47, %v1862_v8 }
 0x1e5   :  { %v1812_v51 = vadd.f32 %v4468_v29, %v1793_v14  ;;  %v1931_v27 = vmul.f32 %v1928_v3, %v4101_v42  ;;  %v1900_v59 = vrot.slane %v4055_v45, 3  ;;  %v1917_v52 = vrot.slane %v1911_v25, 3 }
 0x1e6   :  { %v1868_v2 = vadd.f32 %v1863_v22, %v1849_v1  ;;  %v1899_v33 = vsel %vm271_vm4, %v1897_v58, %v1898_v10  ;;  %v1916_v46 = vrot.slane %v4118_v18, 3  ;;  %v1919_v26 = vrot.slane %v1912_v15, 3 }
 0x1e7   :  { %v1831_v12 = vadd.f32 %v1824_v11, %v1812_v51  ;;  %v1886_v17 = vadd.f32 %v4469_v36, %v1867_v41  ;;  %v1936_v63 = vrot.slane %v1930_v53, 3  ;;  %v1935_v48 = vrot.slane %v1929_v0, 3 }
 0x1e8   :  { %v1887_v45 = vadd.f32 %v4470_v24, %v1868_v2  ;;  %v1901_v4 = vsel %vm271_vm4, %v1898_v10, %v1900_v59  ;;  %v1938_v43 = vrot.slane %v1931_v27, 3  ;;  %v1918_v54 = vsel %vm271_vm4, %v1916_v46, %v1917_v52 }
 0x1e9   :  { %v1850_v42 = vadd.f32 %v1843_v32, %v1831_v12  ;;  %v1905_v11 = vadd.f32 %v1899_v33, %v1886_v17  ;;  %v2184_v13 = vpop.eup %2183  ;;  %v1920_v16 = vsel %vm271_vm4, %v1917_v52, %v1919_v26  ;;  %v1937_v39 = vsel %vm271_vm4, %v1935_v48, %v1936_v63 }
 0x1ea   :  { %v1906_v18 = vadd.f32 %v1901_v4, %v1887_v45  ;;  %2093 = vst.msk [vmem:[%s4387_s22 + $0x68] sm:$0xff] %vm363_vm5, %v2184_v13  ;;  %v1947_v19 = vstv %s4140_s24  ;;  %v4472_v10 = vrot.slane %v4471_v5, 3  ;;  %v1939_v28 = vsel %vm271_vm4, %v1936_v63, %v1938_v43 }
 0x1eb   :  { %v1869_v35 = vadd.f32 %v1862_v8, %v1850_v42  ;;  %v1924_v21 = vadd.f32 %v1918_v54, %v1905_v11 }
 0x1ec   :  { %v1925_v50 = vadd.f32 %v1920_v16, %v1906_v18 }
 0x1ed   :  { %v1888_v31 = vadd.f32 %v4472_v10, %v1869_v35  ;;  %v1943_v55 = vadd.f32 %v1937_v39, %v1924_v21 }
 0x1ee   :  { %v2186_v56 = vpop.eup %2185  ;;  %v1944_v3 = vadd.f32 %v1939_v28, %v1925_v50 }
 0x1ef   :  { %v1907_v32 = vadd.f32 %v1900_v59, %v1888_v31  ;;  %2094 = vst.msk [vmem:[%s4387_s22 + $0x70] sm:$0x1] %vm366_vm6, %v2186_v56  ;;  %v1948_v47 = vadd.f32 %v1947_v19, %v1943_v55 }
 0x1f0   :  { %v1949_v62 = vadd.f32 %v1947_v19, %v1944_v3 }
 0x1f1   :  { %v1926_v38 = vadd.f32 %v1919_v26, %v1907_v32  ;;  %v2114_v23 = vmul.f32 -1.442695, %v1948_v47 }
 0x1f2   :  { %v2115_v57 = vmul.f32 -1.442695, %v1949_v62 }
 0x1f3   :  { %v1945_v61 = vadd.f32 %v1938_v43, %v1926_v38  ;;  %2187 = vpow2.f32 %v2114_v23 }
 0x1f4   :  { %2189 = vpow2.f32 %v2115_v57 }
 0x1f5   :  { %v1950_v20 = vadd.f32 %v1947_v19, %v1945_v61 }
 0x1f7   :  { %v2116_v60 = vmul.f32 -1.442695, %v1950_v20 }
 0x1f9   :  { %2191 = vpow2.f32 %v2116_v60 }
 0x1fd   :  { %v2188_v37 = vpop.eup %2187 }
 0x1fe   :  { %v2190_v25 = vpop.eup %2189  ;;  %v1960_v44 = vadd.f32 1.0, %v2188_v37 }
 0x1ff   :  { %v1961_v8 = vadd.f32 1.0, %v2190_v25 }
 0x200   :  { %2193 = vrcp.f32 %v1960_v44 }
 0x201   :  { %2195 = vrcp.f32 %v1961_v8 }
 0x203   :  { %v2192_v30 = vpop.eup %2191 }
 0x204   :  { %v1962_v15 = vadd.f32 1.0, %v2192_v30 }
 0x206   :  { %2197 = vrcp.f32 %v1962_v15 }
 0x20a   :  { %v2194_v14 = vpop.eup %2193 }
 0x20b   :  { %v2196_v9 = vpop.eup %2195  ;;  %2117 = vst.msk [vmem:[%s4387_s22 + $0x78] sm:$0xff] %vm363_vm5, %v2194_v14 }
 0x20c   :  { %2118 = vst.msk [vmem:[%s4387_s22 + $0x80] sm:$0xff] %vm363_vm5, %v2196_v9 }
 0x210   :  { %v2198_v34 = vpop.eup %2197 }
 0x211   :  { %2119 = vst.msk [vmem:[%s4387_s22 + $0x88] sm:$0x1] %vm366_vm6, %v2198_v34 }
 0x212   :  { %1977 = vsyncpa [#allocation4], 1 }
 0x213   :  { %1978 = vsyncpa [#allocation6], 1 }

</bundles_post_ra>
